<compile_context>
chip_gen: v7x
topology: tpu7x:2x2x1
jax: 0.10.0
libtpu: 0.0.40
codegen_flags: <defaults>
</compile_context>

<pallas_src>
import jax
import jax.numpy as jnp
from jax.experimental import pallas as pl
from jax.experimental.pallas import tpu as pltpu

# Layer widths of the MLP (including input and output feature sizes).
LAYER_SIZES = [2, 128, 256, 512, 1024, 1024, 512, 256, 128, 8]
N_LAYERS = len(LAYER_SIZES) - 1
PAD_IN = 128  # layer-0 input (K=2) is zero-padded up to one full lane width


def _round_up(n, m):
    return ((n + m - 1) // m) * m


def _vmem_limit_bytes(default=48 * 1024 * 1024):
    """VMEM request that is safe on v5e/v6e (128 MiB) and v7x (64 MiB)."""
    try:
        info = pltpu.get_tpu_info()
        cap = getattr(info, "vmem_capacity_bytes", None)
        if cap:
            return int(min(default, (cap * 3) // 4))
    except Exception:
        pass
    return default


_VMEM_LIMIT = _vmem_limit_bytes()


def _mlp_kernel(x_ref, *refs):
    """Fused 9-layer MLP + log_softmax for one batch tile.

    refs = (w_0..w_8, b_0..b_8, out_ref).  Weights/activations are bf16 for
    the MXU; accumulation, bias-add, ReLU and the log-softmax epilogue are
    fp32.  Weights use constant index_maps so they are DMA'd into VMEM once
    and stay resident across all batch-tile grid steps.
    """
    w_refs = refs[:N_LAYERS]
    b_refs = refs[N_LAYERS:2 * N_LAYERS]
    out_ref = refs[2 * N_LAYERS]

    h = x_ref[...]  # (TB, 128) bf16
    for i in range(N_LAYERS):
        # MXU matmul (bf16 x bf16 -> fp32 accumulate), bias add on the VPU.
        acc = jnp.dot(h, w_refs[i][...], preferred_element_type=jnp.float32)
        acc = acc + b_refs[i][...]
        if i < N_LAYERS - 1:
            acc = jnp.maximum(acc, 0.0)          # ReLU in fp32
            h = acc.astype(jnp.bfloat16)          # back to bf16 for next MXU pass
        else:
            h = acc                               # final logits stay fp32

    # LogSoftmax over dim=1 (feature axis), numerically stable, fp32.
    m = jnp.max(h, axis=-1, keepdims=True)
    shifted = h - m
    lse = jnp.log(jnp.sum(jnp.exp(shifted), axis=-1, keepdims=True))
    out_ref[...] = (shifted - lse).astype(out_ref.dtype)


@jax.jit
def very_deep_model(x, weights, biases):
    """Runs the fused Pallas kernel.

    x:        (B, insize) float32
    weights:  list of (in_features, out_features) float32 arrays
    biases:   list of (1, out_features) float32 arrays
    returns:  (B, outsize) float32 log-probabilities
    """
    B = x.shape[0]
    insize = LAYER_SIZES[0]
    out_f = LAYER_SIZES[-1]

    # --- pad layer 0: (2,128) weight -> (128,128), x feature dim 2 -> 128 ---
    w0 = jnp.zeros((PAD_IN, LAYER_SIZES[1]), jnp.float32)
    w0 = w0.at[:insize, :].set(weights[0].astype(jnp.float32))
    x_p = jnp.zeros((B, PAD_IN), jnp.float32).at[:, :insize].set(
        x.astype(jnp.float32))

    # bf16 weights (MXU / HBM traffic), fp32 biases (VPU math).
    ws = [w0.astype(jnp.bfloat16)] + [w.astype(jnp.bfloat16)
                                      for w in weights[1:]]
    bs = [b.astype(jnp.float32) for b in biases]

    # --- batch tiling: TB rows per grid step, batch axis is "parallel" ---
    TB = min(256, _round_up(B, 8))
    Bp = _round_up(B, TB)
    if Bp != B:
        x_p = jnp.pad(x_p, ((0, Bp - B), (0, 0)))
    x_p = x_p.astype(jnp.bfloat16)
    num_tiles = Bp // TB

    in_specs = [pl.BlockSpec((TB, PAD_IN), lambda i: (i, 0))]
    for w in ws:   # resident weights: constant block index across the grid
        in_specs.append(pl.BlockSpec(w.shape, lambda i: (0, 0)))
    for b in bs:
        in_specs.append(pl.BlockSpec(b.shape, lambda i: (0, 0)))
    out_specs = pl.BlockSpec((TB, out_f), lambda i: (i, 0))

    out = pl.pallas_call(
        _mlp_kernel,
        out_shape=jax.ShapeDtypeStruct((Bp, out_f), jnp.float32),
        grid_spec=pltpu.PrefetchScalarGridSpec(
            num_scalar_prefetch=0,
            grid=(num_tiles,),
            in_specs=in_specs,
            out_specs=out_specs,
        ),
        compiler_params=pltpu.CompilerParams(
            dimension_semantics=("parallel",),
            vmem_limit_bytes=_VMEM_LIMIT,
        ),
    )(x_p, *ws, *bs)

    return out[:B]


def init_params(key, layer_sizes):
    """Deterministic init mimicking PyTorch nn.Linear default:
    U(-1/sqrt(fan_in), +1/sqrt(fan_in)) for both weight and bias."""
    weights, biases = [], []
    for i in range(len(layer_sizes) - 1):
        fan_in, fan_out = layer_sizes[i], layer_sizes[i + 1]
        key, wk, bk = jax.random.split(key, 3)
        bound = 1.0 / jnp.sqrt(jnp.float32(fan_in))
        w = jax.random.uniform(
            wk, (fan_in, fan_out), jnp.float32, minval=-bound, maxval=bound)
        b = jax.random.uniform(
            bk, (1, fan_out), jnp.float32, minval=-bound, maxval=bound)
        weights.append(w)
        biases.append(b)
    return weights, biases


if __name__ == "__main__":
    key = jax.random.PRNGKey(0)
    key, xk = jax.random.split(key)

    batch, insize = 8, LAYER_SIZES[0]
    x = jax.random.normal(xk, (batch, insize), dtype=jnp.float32)

    weights, biases = init_params(key, LAYER_SIZES)

    out = very_deep_model(x, weights, biases)
    out = jax.block_until_ready(out)

    # Sanity checks: correct shape, finite, log-probs sum to 1 in prob space.
    assert out.shape == (batch, LAYER_SIZES[-1]), out.shape
    assert bool(jnp.all(jnp.isfinite(out)))
    probs_sum = jnp.sum(jnp.exp(out), axis=-1)
    assert bool(jnp.allclose(probs_sum, 1.0, atol=1e-3)), probs_sum

    print("KERNEL_OK")
</pallas_src>

<mosaic_0001>
module attributes {stable_mosaic.version = 11 : i64} {
  func.func @_mlp_kernel(%arg0: i32, %arg1: memref<8x128xbf16, #tpu.memory_space<vmem>>, %arg2: memref<128x128xbf16, #tpu.memory_space<vmem>>, %arg3: memref<128x256xbf16, #tpu.memory_space<vmem>>, %arg4: memref<256x512xbf16, #tpu.memory_space<vmem>>, %arg5: memref<512x1024xbf16, #tpu.memory_space<vmem>>, %arg6: memref<1024x1024xbf16, #tpu.memory_space<vmem>>, %arg7: memref<1024x512xbf16, #tpu.memory_space<vmem>>, %arg8: memref<512x256xbf16, #tpu.memory_space<vmem>>, %arg9: memref<256x128xbf16, #tpu.memory_space<vmem>>, %arg10: memref<128x8xbf16, #tpu.memory_space<vmem>>, %arg11: memref<1x128xf32, #tpu.memory_space<vmem>>, %arg12: memref<1x256xf32, #tpu.memory_space<vmem>>, %arg13: memref<1x512xf32, #tpu.memory_space<vmem>>, %arg14: memref<1x1024xf32, #tpu.memory_space<vmem>>, %arg15: memref<1x1024xf32, #tpu.memory_space<vmem>>, %arg16: memref<1x512xf32, #tpu.memory_space<vmem>>, %arg17: memref<1x256xf32, #tpu.memory_space<vmem>>, %arg18: memref<1x128xf32, #tpu.memory_space<vmem>>, %arg19: memref<1x8xf32, #tpu.memory_space<vmem>>, %arg20: memref<8x8xf32, #tpu.memory_space<vmem>>) attributes {dimension_semantics = [#tpu.dimension_semantics<parallel>], iteration_bounds = array<i64: 1>, scalar_prefetch = 0 : i64, scratch_operands = 0 : i64, tpu.core_type = #tpu.core_type<tc>, window_params = [{transform_indices = @transform_0, window_bounds = array<i64: 8, 128>}, {pipeline_mode = #tpu.pipeline_mode<synchronous>, transform_indices = @transform_1, window_bounds = array<i64: 128, 128>}, {pipeline_mode = #tpu.pipeline_mode<synchronous>, transform_indices = @transform_2, window_bounds = array<i64: 128, 256>}, {pipeline_mode = #tpu.pipeline_mode<synchronous>, transform_indices = @transform_3, window_bounds = array<i64: 256, 512>}, {pipeline_mode = #tpu.pipeline_mode<synchronous>, transform_indices = @transform_4, window_bounds = array<i64: 512, 1024>}, {pipeline_mode = #tpu.pipeline_mode<synchronous>, transform_indices = @transform_5, window_bounds = array<i64: 1024, 1024>}, {pipeline_mode = #tpu.pipeline_mode<synchronous>, transform_indices = @transform_6, window_bounds = array<i64: 1024, 512>}, {pipeline_mode = #tpu.pipeline_mode<synchronous>, transform_indices = @transform_7, window_bounds = array<i64: 512, 256>}, {pipeline_mode = #tpu.pipeline_mode<synchronous>, transform_indices = @transform_8, window_bounds = array<i64: 256, 128>}, {pipeline_mode = #tpu.pipeline_mode<synchronous>, transform_indices = @transform_9, window_bounds = array<i64: 128, 8>}, {pipeline_mode = #tpu.pipeline_mode<synchronous>, transform_indices = @transform_10, window_bounds = array<i64: 1, 128>}, {pipeline_mode = #tpu.pipeline_mode<synchronous>, transform_indices = @transform_11, window_bounds = array<i64: 1, 256>}, {pipeline_mode = #tpu.pipeline_mode<synchronous>, transform_indices = @transform_12, window_bounds = array<i64: 1, 512>}, {pipeline_mode = #tpu.pipeline_mode<synchronous>, transform_indices = @transform_13, window_bounds = array<i64: 1, 1024>}, {pipeline_mode = #tpu.pipeline_mode<synchronous>, transform_indices = @transform_14, window_bounds = array<i64: 1, 1024>}, {pipeline_mode = #tpu.pipeline_mode<synchronous>, transform_indices = @transform_15, window_bounds = array<i64: 1, 512>}, {pipeline_mode = #tpu.pipeline_mode<synchronous>, transform_indices = @transform_16, window_bounds = array<i64: 1, 256>}, {pipeline_mode = #tpu.pipeline_mode<synchronous>, transform_indices = @transform_17, window_bounds = array<i64: 1, 128>}, {pipeline_mode = #tpu.pipeline_mode<synchronous>, transform_indices = @transform_18, window_bounds = array<i64: 1, 8>}, {transform_indices = @transform_19, window_bounds = array<i64: 8, 8>}]} {
    %c0 = arith.constant 0 : index
    %c0_0 = arith.constant 0 : index
    %0 = vector.load %arg1[%c0, %c0_0] : memref<8x128xbf16, #tpu.memory_space<vmem>>, vector<8x128xbf16>
    %c0_1 = arith.constant 0 : index
    %c0_2 = arith.constant 0 : index
    %1 = vector.load %arg2[%c0_1, %c0_2] : memref<128x128xbf16, #tpu.memory_space<vmem>>, vector<128x128xbf16>
    %cst = arith.constant dense<0.000000e+00> : vector<8x128xf32>
    %2 = tpu.matmul %0, %1, %cst {dimension_numbers = #tpu.dot_dimension_numbers<[1], [0], [0], [1], [0, 0, 1, 1], [], []>} : vector<8x128xbf16>, vector<128x128xbf16>, vector<8x128xf32> -> vector<8x128xf32>
    %c0_3 = arith.constant 0 : index
    %c0_4 = arith.constant 0 : index
    %3 = vector.load %arg11[%c0_3, %c0_4] : memref<1x128xf32, #tpu.memory_space<vmem>>, vector<1x128xf32>
    %4 = vector.broadcast %3 : vector<1x128xf32> to vector<8x128xf32>
    %5 = arith.addf %2, %4 : vector<8x128xf32>
    %cst_5 = arith.constant 0.000000e+00 : f32
    %6 = vector.broadcast %cst_5 : f32 to vector<8x128xf32>
    %7 = arith.maximumf %5, %6 : vector<8x128xf32>
    %8 = arith.truncf %7 : vector<8x128xf32> to vector<8x128xbf16>
    %c0_6 = arith.constant 0 : index
    %c0_7 = arith.constant 0 : index
    %9 = vector.load %arg3[%c0_6, %c0_7] : memref<128x256xbf16, #tpu.memory_space<vmem>>, vector<128x256xbf16>
    %cst_8 = arith.constant dense<0.000000e+00> : vector<8x256xf32>
    %10 = tpu.matmul %8, %9, %cst_8 {dimension_numbers = #tpu.dot_dimension_numbers<[1], [0], [0], [1], [0, 0, 1, 1], [], []>} : vector<8x128xbf16>, vector<128x256xbf16>, vector<8x256xf32> -> vector<8x256xf32>
    %c0_9 = arith.constant 0 : index
    %c0_10 = arith.constant 0 : index
    %11 = vector.load %arg12[%c0_9, %c0_10] : memref<1x256xf32, #tpu.memory_space<vmem>>, vector<1x256xf32>
    %12 = vector.broadcast %11 : vector<1x256xf32> to vector<8x256xf32>
    %13 = arith.addf %10, %12 : vector<8x256xf32>
    %cst_11 = arith.constant 0.000000e+00 : f32
    %14 = vector.broadcast %cst_11 : f32 to vector<8x256xf32>
    %15 = arith.maximumf %13, %14 : vector<8x256xf32>
    %16 = arith.truncf %15 : vector<8x256xf32> to vector<8x256xbf16>
    %c0_12 = arith.constant 0 : index
    %c0_13 = arith.constant 0 : index
    %17 = vector.load %arg4[%c0_12, %c0_13] : memref<256x512xbf16, #tpu.memory_space<vmem>>, vector<256x512xbf16>
    %cst_14 = arith.constant dense<0.000000e+00> : vector<8x512xf32>
    %18 = tpu.matmul %16, %17, %cst_14 {dimension_numbers = #tpu.dot_dimension_numbers<[1], [0], [0], [1], [0, 0, 1, 1], [], []>} : vector<8x256xbf16>, vector<256x512xbf16>, vector<8x512xf32> -> vector<8x512xf32>
    %c0_15 = arith.constant 0 : index
    %c0_16 = arith.constant 0 : index
    %19 = vector.load %arg13[%c0_15, %c0_16] : memref<1x512xf32, #tpu.memory_space<vmem>>, vector<1x512xf32>
    %20 = vector.broadcast %19 : vector<1x512xf32> to vector<8x512xf32>
    %21 = arith.addf %18, %20 : vector<8x512xf32>
    %cst_17 = arith.constant 0.000000e+00 : f32
    %22 = vector.broadcast %cst_17 : f32 to vector<8x512xf32>
    %23 = arith.maximumf %21, %22 : vector<8x512xf32>
    %24 = arith.truncf %23 : vector<8x512xf32> to vector<8x512xbf16>
    %c0_18 = arith.constant 0 : index
    %c0_19 = arith.constant 0 : index
    %25 = vector.load %arg5[%c0_18, %c0_19] : memref<512x1024xbf16, #tpu.memory_space<vmem>>, vector<512x1024xbf16>
    %cst_20 = arith.constant dense<0.000000e+00> : vector<8x1024xf32>
    %26 = tpu.matmul %24, %25, %cst_20 {dimension_numbers = #tpu.dot_dimension_numbers<[1], [0], [0], [1], [0, 0, 1, 1], [], []>} : vector<8x512xbf16>, vector<512x1024xbf16>, vector<8x1024xf32> -> vector<8x1024xf32>
    %c0_21 = arith.constant 0 : index
    %c0_22 = arith.constant 0 : index
    %27 = vector.load %arg14[%c0_21, %c0_22] : memref<1x1024xf32, #tpu.memory_space<vmem>>, vector<1x1024xf32>
    %28 = vector.broadcast %27 : vector<1x1024xf32> to vector<8x1024xf32>
    %29 = arith.addf %26, %28 : vector<8x1024xf32>
    %cst_23 = arith.constant 0.000000e+00 : f32
    %30 = vector.broadcast %cst_23 : f32 to vector<8x1024xf32>
    %31 = arith.maximumf %29, %30 : vector<8x1024xf32>
    %32 = arith.truncf %31 : vector<8x1024xf32> to vector<8x1024xbf16>
    %c0_24 = arith.constant 0 : index
    %c0_25 = arith.constant 0 : index
    %33 = vector.load %arg6[%c0_24, %c0_25] : memref<1024x1024xbf16, #tpu.memory_space<vmem>>, vector<1024x1024xbf16>
    %cst_26 = arith.constant dense<0.000000e+00> : vector<8x1024xf32>
    %34 = tpu.matmul %32, %33, %cst_26 {dimension_numbers = #tpu.dot_dimension_numbers<[1], [0], [0], [1], [0, 0, 1, 1], [], []>} : vector<8x1024xbf16>, vector<1024x1024xbf16>, vector<8x1024xf32> -> vector<8x1024xf32>
    %c0_27 = arith.constant 0 : index
    %c0_28 = arith.constant 0 : index
    %35 = vector.load %arg15[%c0_27, %c0_28] : memref<1x1024xf32, #tpu.memory_space<vmem>>, vector<1x1024xf32>
    %36 = vector.broadcast %35 : vector<1x1024xf32> to vector<8x1024xf32>
    %37 = arith.addf %34, %36 : vector<8x1024xf32>
    %cst_29 = arith.constant 0.000000e+00 : f32
    %38 = vector.broadcast %cst_29 : f32 to vector<8x1024xf32>
    %39 = arith.maximumf %37, %38 : vector<8x1024xf32>
    %40 = arith.truncf %39 : vector<8x1024xf32> to vector<8x1024xbf16>
    %c0_30 = arith.constant 0 : index
    %c0_31 = arith.constant 0 : index
    %41 = vector.load %arg7[%c0_30, %c0_31] : memref<1024x512xbf16, #tpu.memory_space<vmem>>, vector<1024x512xbf16>
    %cst_32 = arith.constant dense<0.000000e+00> : vector<8x512xf32>
    %42 = tpu.matmul %40, %41, %cst_32 {dimension_numbers = #tpu.dot_dimension_numbers<[1], [0], [0], [1], [0, 0, 1, 1], [], []>} : vector<8x1024xbf16>, vector<1024x512xbf16>, vector<8x512xf32> -> vector<8x512xf32>
    %c0_33 = arith.constant 0 : index
    %c0_34 = arith.constant 0 : index
    %43 = vector.load %arg16[%c0_33, %c0_34] : memref<1x512xf32, #tpu.memory_space<vmem>>, vector<1x512xf32>
    %44 = vector.broadcast %43 : vector<1x512xf32> to vector<8x512xf32>
    %45 = arith.addf %42, %44 : vector<8x512xf32>
    %cst_35 = arith.constant 0.000000e+00 : f32
    %46 = vector.broadcast %cst_35 : f32 to vector<8x512xf32>
    %47 = arith.maximumf %45, %46 : vector<8x512xf32>
    %48 = arith.truncf %47 : vector<8x512xf32> to vector<8x512xbf16>
    %c0_36 = arith.constant 0 : index
    %c0_37 = arith.constant 0 : index
    %49 = vector.load %arg8[%c0_36, %c0_37] : memref<512x256xbf16, #tpu.memory_space<vmem>>, vector<512x256xbf16>
    %cst_38 = arith.constant dense<0.000000e+00> : vector<8x256xf32>
    %50 = tpu.matmul %48, %49, %cst_38 {dimension_numbers = #tpu.dot_dimension_numbers<[1], [0], [0], [1], [0, 0, 1, 1], [], []>} : vector<8x512xbf16>, vector<512x256xbf16>, vector<8x256xf32> -> vector<8x256xf32>
    %c0_39 = arith.constant 0 : index
    %c0_40 = arith.constant 0 : index
    %51 = vector.load %arg17[%c0_39, %c0_40] : memref<1x256xf32, #tpu.memory_space<vmem>>, vector<1x256xf32>
    %52 = vector.broadcast %51 : vector<1x256xf32> to vector<8x256xf32>
    %53 = arith.addf %50, %52 : vector<8x256xf32>
    %cst_41 = arith.constant 0.000000e+00 : f32
    %54 = vector.broadcast %cst_41 : f32 to vector<8x256xf32>
    %55 = arith.maximumf %53, %54 : vector<8x256xf32>
    %56 = arith.truncf %55 : vector<8x256xf32> to vector<8x256xbf16>
    %c0_42 = arith.constant 0 : index
    %c0_43 = arith.constant 0 : index
    %57 = vector.load %arg9[%c0_42, %c0_43] : memref<256x128xbf16, #tpu.memory_space<vmem>>, vector<256x128xbf16>
    %cst_44 = arith.constant dense<0.000000e+00> : vector<8x128xf32>
    %58 = tpu.matmul %56, %57, %cst_44 {dimension_numbers = #tpu.dot_dimension_numbers<[1], [0], [0], [1], [0, 0, 1, 1], [], []>} : vector<8x256xbf16>, vector<256x128xbf16>, vector<8x128xf32> -> vector<8x128xf32>
    %c0_45 = arith.constant 0 : index
    %c0_46 = arith.constant 0 : index
    %59 = vector.load %arg18[%c0_45, %c0_46] : memref<1x128xf32, #tpu.memory_space<vmem>>, vector<1x128xf32>
    %60 = vector.broadcast %59 : vector<1x128xf32> to vector<8x128xf32>
    %61 = arith.addf %58, %60 : vector<8x128xf32>
    %cst_47 = arith.constant 0.000000e+00 : f32
    %62 = vector.broadcast %cst_47 : f32 to vector<8x128xf32>
    %63 = arith.maximumf %61, %62 : vector<8x128xf32>
    %64 = arith.truncf %63 : vector<8x128xf32> to vector<8x128xbf16>
    %c0_48 = arith.constant 0 : index
    %c0_49 = arith.constant 0 : index
    %65 = vector.load %arg10[%c0_48, %c0_49] : memref<128x8xbf16, #tpu.memory_space<vmem>>, vector<128x8xbf16>
    %cst_50 = arith.constant dense<0.000000e+00> : vector<8x8xf32>
    %66 = tpu.matmul %64, %65, %cst_50 {dimension_numbers = #tpu.dot_dimension_numbers<[1], [0], [0], [1], [0, 0, 1, 1], [], []>} : vector<8x128xbf16>, vector<128x8xbf16>, vector<8x8xf32> -> vector<8x8xf32>
    %c0_51 = arith.constant 0 : index
    %c0_52 = arith.constant 0 : index
    %67 = vector.load %arg19[%c0_51, %c0_52] : memref<1x8xf32, #tpu.memory_space<vmem>>, vector<1x8xf32>
    %68 = vector.broadcast %67 : vector<1x8xf32> to vector<8x8xf32>
    %69 = arith.addf %66, %68 : vector<8x8xf32>
    %cst_53 = arith.constant dense<0xFF800000> : vector<8xf32>
    %70 = vector.multi_reduction <maximumf>, %69, %cst_53 [1] : vector<8x8xf32> to vector<8xf32>
    %71 = vector.shape_cast %70 : vector<8xf32> to vector<8x1xf32>
    %72 = vector.broadcast %71 : vector<8x1xf32> to vector<8x8xf32>
    %73 = arith.subf %69, %72 : vector<8x8xf32>
    %74 = math.exp %73 : vector<8x8xf32>
    %cst_54 = arith.constant dense<0.000000e+00> : vector<8xf32>
    %75 = vector.multi_reduction <add>, %74, %cst_54 [1] : vector<8x8xf32> to vector<8xf32>
    %76 = vector.shape_cast %75 : vector<8xf32> to vector<8x1xf32>
    %77 = math.log %76 : vector<8x1xf32>
    %78 = vector.broadcast %77 : vector<8x1xf32> to vector<8x8xf32>
    %79 = arith.subf %73, %78 : vector<8x8xf32>
    %c0_55 = arith.constant 0 : index
    %c0_56 = arith.constant 0 : index
    %80 = vector.load %arg20[%c0_55, %c0_56] : memref<8x8xf32, #tpu.memory_space<vmem>>, vector<8x8xf32>
    tpu.vector_store %arg20[%c0_55, %c0_56], %79 {strides = array<i32>} : memref<8x8xf32, #tpu.memory_space<vmem>>, vector<8x8xf32>,
    return
  }
  func.func @transform_0(%arg0: i32) -> (i32, i32) {
    %c0_i32 = arith.constant 0 : i32
    %c0_i32_0 = arith.constant 0 : i32
    return %arg0, %c0_i32 : i32, i32
  }
  func.func @transform_1(%arg0: i32) -> (i32, i32) {
    %c0_i32 = arith.constant 0 : i32
    %c0_i32_0 = arith.constant 0 : i32
    %c0_i32_1 = arith.constant 0 : i32
    return %c0_i32, %c0_i32_0 : i32, i32
  }
  func.func @transform_2(%arg0: i32) -> (i32, i32) {
    %c0_i32 = arith.constant 0 : i32
    %c0_i32_0 = arith.constant 0 : i32
    %c0_i32_1 = arith.constant 0 : i32
    return %c0_i32, %c0_i32_0 : i32, i32
  }
  func.func @transform_3(%arg0: i32) -> (i32, i32) {
    %c0_i32 = arith.constant 0 : i32
    %c0_i32_0 = arith.constant 0 : i32
    %c0_i32_1 = arith.constant 0 : i32
    return %c0_i32, %c0_i32_0 : i32, i32
  }
  func.func @transform_4(%arg0: i32) -> (i32, i32) {
    %c0_i32 = arith.constant 0 : i32
    %c0_i32_0 = arith.constant 0 : i32
    %c0_i32_1 = arith.constant 0 : i32
    return %c0_i32, %c0_i32_0 : i32, i32
  }
  func.func @transform_5(%arg0: i32) -> (i32, i32) {
    %c0_i32 = arith.constant 0 : i32
    %c0_i32_0 = arith.constant 0 : i32
    %c0_i32_1 = arith.constant 0 : i32
    return %c0_i32, %c0_i32_0 : i32, i32
  }
  func.func @transform_6(%arg0: i32) -> (i32, i32) {
    %c0_i32 = arith.constant 0 : i32
    %c0_i32_0 = arith.constant 0 : i32
    %c0_i32_1 = arith.constant 0 : i32
    return %c0_i32, %c0_i32_0 : i32, i32
  }
  func.func @transform_7(%arg0: i32) -> (i32, i32) {
    %c0_i32 = arith.constant 0 : i32
    %c0_i32_0 = arith.constant 0 : i32
    %c0_i32_1 = arith.constant 0 : i32
    return %c0_i32, %c0_i32_0 : i32, i32
  }
  func.func @transform_8(%arg0: i32) -> (i32, i32) {
    %c0_i32 = arith.constant 0 : i32
    %c0_i32_0 = arith.constant 0 : i32
    %c0_i32_1 = arith.constant 0 : i32
    return %c0_i32, %c0_i32_0 : i32, i32
  }
  func.func @transform_9(%arg0: i32) -> (i32, i32) {
    %c0_i32 = arith.constant 0 : i32
    %c0_i32_0 = arith.constant 0 : i32
    %c0_i32_1 = arith.constant 0 : i32
    return %c0_i32, %c0_i32_0 : i32, i32
  }
  func.func @transform_10(%arg0: i32) -> (i32, i32) {
    %c0_i32 = arith.constant 0 : i32
    %c0_i32_0 = arith.constant 0 : i32
    %c0_i32_1 = arith.constant 0 : i32
    return %c0_i32, %c0_i32_0 : i32, i32
  }
  func.func @transform_11(%arg0: i32) -> (i32, i32) {
    %c0_i32 = arith.constant 0 : i32
    %c0_i32_0 = arith.constant 0 : i32
    %c0_i32_1 = arith.constant 0 : i32
    return %c0_i32, %c0_i32_0 : i32, i32
  }
  func.func @transform_12(%arg0: i32) -> (i32, i32) {
    %c0_i32 = arith.constant 0 : i32
    %c0_i32_0 = arith.constant 0 : i32
    %c0_i32_1 = arith.constant 0 : i32
    return %c0_i32, %c0_i32_0 : i32, i32
  }
  func.func @transform_13(%arg0: i32) -> (i32, i32) {
    %c0_i32 = arith.constant 0 : i32
    %c0_i32_0 = arith.constant 0 : i32
    %c0_i32_1 = arith.constant 0 : i32
    return %c0_i32, %c0_i32_0 : i32, i32
  }
  func.func @transform_14(%arg0: i32) -> (i32, i32) {
    %c0_i32 = arith.constant 0 : i32
    %c0_i32_0 = arith.constant 0 : i32
    %c0_i32_1 = arith.constant 0 : i32
    return %c0_i32, %c0_i32_0 : i32, i32
  }
  func.func @transform_15(%arg0: i32) -> (i32, i32) {
    %c0_i32 = arith.constant 0 : i32
    %c0_i32_0 = arith.constant 0 : i32
    %c0_i32_1 = arith.constant 0 : i32
    return %c0_i32, %c0_i32_0 : i32, i32
  }
  func.func @transform_16(%arg0: i32) -> (i32, i32) {
    %c0_i32 = arith.constant 0 : i32
    %c0_i32_0 = arith.constant 0 : i32
    %c0_i32_1 = arith.constant 0 : i32
    return %c0_i32, %c0_i32_0 : i32, i32
  }
  func.func @transform_17(%arg0: i32) -> (i32, i32) {
    %c0_i32 = arith.constant 0 : i32
    %c0_i32_0 = arith.constant 0 : i32
    %c0_i32_1 = arith.constant 0 : i32
    return %c0_i32, %c0_i32_0 : i32, i32
  }
  func.func @transform_18(%arg0: i32) -> (i32, i32) {
    %c0_i32 = arith.constant 0 : i32
    %c0_i32_0 = arith.constant 0 : i32
    %c0_i32_1 = arith.constant 0 : i32
    return %c0_i32, %c0_i32_0 : i32, i32
  }
  func.func @transform_19(%arg0: i32) -> (i32, i32) {
    %c0_i32 = arith.constant 0 : i32
    %c0_i32_0 = arith.constant 0 : i32
    return %arg0, %c0_i32 : i32, i32
  }
}

</mosaic_0001>

<bundles_post_ra>
// kernel: very_deep_model.1
= control target key start
LH: loop header
LB: loop body
LE: loop exit
PB: predicated region body
PF: predicated region fallthrough
CT: control target
= control target key end

     0   :  { %s15248_s0 = inlined_call_operand.vmem [shape: bf16[8,128], index: 0, kind: input, shape index: {}]   ;;  %s15249_s1 = inlined_call_operand.vmem [shape: bf16[128,128], index: 1, kind: input, shape index: {}]   ;;  %s15250_s2 = inlined_call_operand.vmem [shape: bf16[128,256], index: 2, kind: input, shape index: {}]   ;;  %s15251_s3 = inlined_call_operand.vmem [shape: bf16[256,512], index: 3, kind: input, shape index: {}]   ;;  %s15252_s4 = inlined_call_operand.vmem [shape: bf16[512,1024], index: 4, kind: input, shape index: {}]   ;;  %s15253_s5 = inlined_call_operand.vmem [shape: bf16[1024,1024], index: 5, kind: input, shape index: {}]   ;;  %s15254_s6 = inlined_call_operand.vmem [shape: bf16[1024,512], index: 6, kind: input, shape index: {}]   ;;  %s15255_s7 = inlined_call_operand.vmem [shape: bf16[512,256], index: 7, kind: input, shape index: {}]   ;;  %s15256_s8 = inlined_call_operand.vmem [shape: bf16[256,128], index: 8, kind: input, shape index: {}]   ;;  %s15257_s9 = inlined_call_operand.vmem [shape: bf16[128,8], index: 9, kind: input, shape index: {}]   ;;  %s15258_s10 = inlined_call_operand.vmem [shape: f32[1,128], index: 10, kind: input, shape index: {}]   ;;  %s15259_s11 = inlined_call_operand.vmem [shape: f32[1,256], index: 11, kind: input, shape index: {}]   ;;  %s15260_s12 = inlined_call_operand.vmem [shape: f32[1,512], index: 12, kind: input, shape index: {}]   ;;  %s15261_s13 = inlined_call_operand.vmem [shape: f32[1,1024], index: 13, kind: input, shape index: {}]   ;;  %s15262_s14 = inlined_call_operand.vmem [shape: f32[1,1024], index: 14, kind: input, shape index: {}]   ;;  %s15263_s15 = inlined_call_operand.vmem [shape: f32[1,512], index: 15, kind: input, shape index: {}]   ;;  %s15264_s16 = inlined_call_operand.vmem [shape: f32[1,256], index: 16, kind: input, shape index: {}]   ;;  %s15265_s17 = inlined_call_operand.vmem [shape: f32[1,128], index: 17, kind: input, shape index: {}]   ;;  %s15266_s18 = inlined_call_operand.vmem [shape: f32[1,8], index: 18, kind: input, shape index: {}]   ;;  %s15267_s19 = inlined_call_operand.hbm [shape: f32[8,8], index: 19, kind: output, shape index: {}]  }
   0x1   :  { %15271 = sst [smem:[#allocation5_spill]] %s15248_s0 }
   0x2   :  { %15272 = sst [smem:[#allocation6_spill]] %s15249_s1 }
   0x3   :  { %15273 = sst [smem:[#allocation7_spill]] %s15250_s2 }
   0x4   :  { %15274 = sst [smem:[#allocation8_spill]] %s15251_s3 }
   0x5   :  { %s15275_s20 = sld [smem:[#allocation6_spill]]  ;;  %v11290_v1 = vmov 0.0   ;;  %vm11291_vm0 = vmmov 0   ;;  %s15276_s22 = sld [smem:[#allocation7_spill]]  ;;  %v11292_v26 = vmov 0  }
   0x6   :  { %10470 = vmatprep.subr.bf16.mxu1 %v11290_v1  ;;  %10486 = vmatprep.mubr.msk.bf16.mxu1 %vm11291_vm0, %v11290_v1  ;;  %s15277_s24 = sld [smem:[#allocation5_spill]] }
   0xb   :  { %v10628_v0 = vld [vmem:[%s15275_s20] sm:$0xff]   ;;  %v10629_v2 = vld [vmem:[%s15275_s20 + $0x8] sm:$0xff]   ;;  %v10630_v3 = vld [vmem:[%s15275_s20 + $0x10] sm:$0xff]  }
   0xc   :  { %10471 = vmatpush3.bf16.msra.mxu1 %v10628_v0  ;;  %v10631_v4 = vld [vmem:[%s15275_s20 + $0x18] sm:$0xff]   ;;  %v10632_v5 = vld [vmem:[%s15275_s20 + $0x20] sm:$0xff]   ;;  %v10633_v6 = vld [vmem:[%s15275_s20 + $0x28] sm:$0xff]  }
   0xd   :  { %10472 = vmatprep.subr.bf16.mxu1 %v11290_v1  ;;  %v10634_v7 = vld [vmem:[%s15275_s20 + $0x30] sm:$0xff]   ;;  %v10635_v8 = vld [vmem:[%s15275_s20 + $0x38] sm:$0xff]   ;;  %v10638_v9 = vld [vmem:[%s15276_s22 + $0x4] ss:$8 sps:$4 sm:$0xff]   ;;  %s15278_s20 = sld [smem:[#allocation8_spill]] }
   0xe   :  { %v64_v10 = vld [vmem:[%s15277_s24] sm:$0xf]  ;;  %v10641_v12 = vld [vmem:[%s15276_s22 + $0x14] ss:$8 sps:$4 sm:$0xff]   ;;  %v10639_v13 = vld [vmem:[%s15276_s22 + $0x10] ss:$8 sps:$4 sm:$0xff]  }
   0xf   :  { %v10636_v11 = vld [vmem:[%s15276_s22] ss:$8 sps:$4 sm:$0xff]   ;;  %v10644_v14 = vld [vmem:[%s15276_s22 + $0x24] ss:$8 sps:$4 sm:$0xff]   ;;  %v10647_v16 = vld [vmem:[%s15276_s22 + $0x34] ss:$8 sps:$4 sm:$0xff]  }
  0x10   :  { %10473 = vmatpush3.bf16.msra.mxu1 %v10629_v2  ;;  %v10642_v15 = vld [vmem:[%s15276_s22 + $0x20] ss:$8 sps:$4 sm:$0xff]   ;;  %v10645_v17 = vld [vmem:[%s15276_s22 + $0x30] ss:$8 sps:$4 sm:$0xff]   ;;  %v10650_v18 = vld [vmem:[%s15276_s22 + $0x44] ss:$8 sps:$4 sm:$0xff]  }
  0x11   :  { %10474 = vmatprep.subr.bf16.mxu1 %v11290_v1  ;;  %v10648_v19 = vld [vmem:[%s15276_s22 + $0x40] ss:$8 sps:$4 sm:$0xff]   ;;  %v10653_v20 = vld [vmem:[%s15276_s22 + $0x54] ss:$8 sps:$4 sm:$0xff]   ;;  %v10651_v21 = vld [vmem:[%s15276_s22 + $0x50] ss:$8 sps:$4 sm:$0xff]  }
  0x12   :  { %v10656_v22 = vld [vmem:[%s15276_s22 + $0x64] ss:$8 sps:$4 sm:$0xff]   ;;  %v10654_v23 = vld [vmem:[%s15276_s22 + $0x60] ss:$8 sps:$4 sm:$0xff]   ;;  %v10659_v24 = vld [vmem:[%s15276_s22 + $0x74] ss:$8 sps:$4 sm:$0xff]  }
  0x13   :  { %v10657_v25 = vld [vmem:[%s15276_s22 + $0x70] ss:$8 sps:$4 sm:$0xff]   ;;  %v10660_v27 = vld [vmem:[%s15278_s20 + $0x4] ss:$16 sps:$4 sm:$0xff]   ;;  %v10664_v28 = vld [vmem:[%s15278_s20 + $0xc] ss:$16 sps:$4 sm:$0xff]  }
  0x14   :  { %10475 = vmatpush3.bf16.msra.mxu1 %v10630_v3  ;;  %v10665_v29 = vld [vmem:[%s15278_s20] ss:$16 sps:$4 sm:$0xff]   ;;  %v10666_v30 = vld [vmem:[%s15278_s20 + $0x24] ss:$16 sps:$4 sm:$0xff]   ;;  %737 = vmatprep.subr.bf16.mxu0 %v10660_v27 }
  0x15   :  { %10476 = vmatprep.subr.bf16.mxu1 %v11290_v1  ;;  %v10671_v31 = vld [vmem:[%s15278_s20 + $0x20] ss:$16 sps:$4 sm:$0xff]   ;;  %738 = vmatpush1.bf16.msra.mxu0 %v10665_v29  ;;  %v10672_v32 = vld [vmem:[%s15278_s20 + $0x44] ss:$16 sps:$4 sm:$0xff]  }
  0x16   :  { %739 = vmatprep.subr.bf16.mxu0 %v10666_v30  ;;  %v10677_v33 = vld [vmem:[%s15278_s20 + $0x40] ss:$16 sps:$4 sm:$0xff]   ;;  %v10678_v34 = vld [vmem:[%s15278_s20 + $0x64] ss:$16 sps:$4 sm:$0xff]  }
  0x17   :  { %v10683_v35 = vld [vmem:[%s15278_s20 + $0x60] ss:$16 sps:$4 sm:$0xff]   ;;  %v10684_v36 = vld [vmem:[%s15278_s20 + $0x84] ss:$16 sps:$4 sm:$0xff]  }
  0x18   :  { %10477 = vmatpush3.bf16.msra.mxu1 %v10631_v4  ;;  %v10689_v37 = vld [vmem:[%s15278_s20 + $0x80] ss:$16 sps:$4 sm:$0xff]   ;;  %v10690_v38 = vld [vmem:[%s15278_s20 + $0xa4] ss:$16 sps:$4 sm:$0xff]  }
  0x19   :  { %10478 = vmatprep.subr.bf16.mxu1 %v11290_v1  ;;  %740 = vmatpush1.bf16.msra.mxu0 %v10671_v31  ;;  %v10695_v39 = vld [vmem:[%s15278_s20 + $0xa0] ss:$16 sps:$4 sm:$0xff]   ;;  %v10696_v40 = vld [vmem:[%s15278_s20 + $0xc4] ss:$16 sps:$4 sm:$0xff]  }
  0x1a   :  { %741 = vmatprep.subr.bf16.mxu0 %v10672_v32  ;;  %v10701_v41 = vld [vmem:[%s15278_s20 + $0xc0] ss:$16 sps:$4 sm:$0xff]   ;;  %v10702_v42 = vld [vmem:[%s15278_s20 + $0xe4] ss:$16 sps:$4 sm:$0xff]  }
  0x1b   :  { %v10707_v43 = vld [vmem:[%s15278_s20 + $0xe0] ss:$16 sps:$4 sm:$0xff]   ;;  %v10708_v44 = vld [vmem:[%s15278_s20 + $0x104] ss:$16 sps:$4 sm:$0xff]  }
  0x1c   :  { %10479 = vmatpush3.bf16.msra.mxu1 %v10632_v5  ;;  %v10713_v45 = vld [vmem:[%s15278_s20 + $0x100] ss:$16 sps:$4 sm:$0xff]   ;;  %v10714_v46 = vld [vmem:[%s15278_s20 + $0x124] ss:$16 sps:$4 sm:$0xff]  }
  0x1d   :  { %10480 = vmatprep.subr.bf16.mxu1 %v11290_v1  ;;  %742 = vmatpush1.bf16.msra.mxu0 %v10677_v33  ;;  %v10719_v47 = vld [vmem:[%s15278_s20 + $0x120] ss:$16 sps:$4 sm:$0xff]   ;;  %v10720_v48 = vld [vmem:[%s15278_s20 + $0x144] ss:$16 sps:$4 sm:$0xff]  }
  0x1e   :  { %743 = vmatprep.subr.bf16.mxu0 %v10678_v34  ;;  %v10725_v49 = vld [vmem:[%s15278_s20 + $0x140] ss:$16 sps:$4 sm:$0xff]   ;;  %v10726_v50 = vld [vmem:[%s15278_s20 + $0x164] ss:$16 sps:$4 sm:$0xff]  }
  0x1f   :  { %v10731_v51 = vld [vmem:[%s15278_s20 + $0x160] ss:$16 sps:$4 sm:$0xff]   ;;  %v10732_v52 = vld [vmem:[%s15278_s20 + $0x184] ss:$16 sps:$4 sm:$0xff]  }
  0x20   :  { %10481 = vmatpush3.bf16.msra.mxu1 %v10633_v6  ;;  %v10737_v53 = vld [vmem:[%s15278_s20 + $0x180] ss:$16 sps:$4 sm:$0xff]   ;;  %v10738_v54 = vld [vmem:[%s15278_s20 + $0x1a4] ss:$16 sps:$4 sm:$0xff]  }
  0x21   :  { %10482 = vmatprep.subr.bf16.mxu1 %v11290_v1  ;;  %744 = vmatpush1.bf16.msra.mxu0 %v10683_v35  ;;  %v10743_v55 = vld [vmem:[%s15278_s20 + $0x1a0] ss:$16 sps:$4 sm:$0xff]  }
  0x22   :  { %745 = vmatprep.subr.bf16.mxu0 %v10684_v36 }
  0x24   :  { %10483 = vmatpush3.bf16.msra.mxu1 %v10634_v7 }
  0x25   :  { %10484 = vmatprep.subr.bf16.mxu1 %v11290_v1  ;;  %746 = vmatpush1.bf16.msra.mxu0 %v10689_v37 }
  0x26   :  { %747 = vmatprep.subr.bf16.mxu0 %v10690_v38 }
  0x28   :  { %10485 = vmatpush3.bf16.msra.mxu1 %v10635_v8 }
  0x29   :  { %286 = vmatprep.subr.bf16.mxu1 %v10638_v9  ;;  %748 = vmatpush1.bf16.msra.mxu0 %v10695_v39 }
  0x2a   :  { %749 = vmatprep.subr.bf16.mxu0 %v10696_v40 }
  0x2b   :  { %10487 = vmatmul.mubr.bf16.vlgmr.msra.gmra.mrb[0].mxu1 %v64_v10 }
  0x2c   :  { %287 = vmatpush1.bf16.msra.mxu1 %v10636_v11  ;;  %318 = vmatprep.mubr.bf16.mxu1 %v11292_v26 }
  0x2d   :  { %288 = vmatprep.subr.bf16.mxu1 %v10641_v12  ;;  %750 = vmatpush1.bf16.msra.mxu0 %v10701_v41 }
  0x2e   :  { %751 = vmatprep.subr.bf16.mxu0 %v10702_v42 }
  0x30   :  { %289 = vmatpush1.bf16.msra.mxu1 %v10639_v13 }
  0x31   :  { %290 = vmatprep.subr.bf16.mxu1 %v10644_v14  ;;  %752 = vmatpush1.bf16.msra.mxu0 %v10707_v43 }
  0x32   :  { %753 = vmatprep.subr.bf16.mxu0 %v10708_v44 }
  0x34   :  { %291 = vmatpush1.bf16.msra.mxu1 %v10642_v15 }
  0x35   :  { %292 = vmatprep.subr.bf16.mxu1 %v10647_v16  ;;  %754 = vmatpush1.bf16.msra.mxu0 %v10713_v45 }
  0x36   :  { %755 = vmatprep.subr.bf16.mxu0 %v10714_v46 }
  0x38   :  { %293 = vmatpush1.bf16.msra.mxu1 %v10645_v17 }
  0x39   :  { %294 = vmatprep.subr.bf16.mxu1 %v10650_v18  ;;  %756 = vmatpush1.bf16.msra.mxu0 %v10719_v47 }
  0x3a   :  { %757 = vmatprep.subr.bf16.mxu0 %v10720_v48 }
  0x3c   :  { %295 = vmatpush1.bf16.msra.mxu1 %v10648_v19 }
  0x3d   :  { %296 = vmatprep.subr.bf16.mxu1 %v10653_v20  ;;  %758 = vmatpush1.bf16.msra.mxu0 %v10725_v49 }
  0x3e   :  { %759 = vmatprep.subr.bf16.mxu0 %v10726_v50 }
  0x40   :  { %297 = vmatpush1.bf16.msra.mxu1 %v10651_v21 }
  0x41   :  { %298 = vmatprep.subr.bf16.mxu1 %v10656_v22  ;;  %760 = vmatpush1.bf16.msra.mxu0 %v10731_v51 }
  0x42   :  { %761 = vmatprep.subr.bf16.mxu0 %v10732_v52 }
  0x44   :  { %299 = vmatpush1.bf16.msra.mxu1 %v10654_v23 }
  0x45   :  { %300 = vmatprep.subr.bf16.mxu1 %v10659_v24  ;;  %762 = vmatpush1.bf16.msra.mxu0 %v10737_v53 }
  0x46   :  { %763 = vmatprep.subr.bf16.mxu0 %v10738_v54 }
  0x48   :  { %301 = vmatpush1.bf16.msra.mxu1 %v10657_v25 }
  0x49   :  { %778 = vmatprep.subr.bf16.mxu1 %v10664_v28  ;;  %764 = vmatpush1.bf16.msra.mxu0 %v10743_v55 }
  0x4a   :  { %24 = vsyncpa [#allocation3], 0  ;;  %v9227_v56 = vld [vmem:[%s15258_s10] ss:$0 sm:$0xff]  ;;  %v10662_v63 = vld [vmem:[%s15278_s20 + $0x8] ss:$16 sps:$4 sm:$0xff]   ;;  %v196_v44 = vlaneseq }
  0x4b   :  { %v10670_v2 = vld [vmem:[%s15278_s20 + $0x2c] ss:$16 sps:$4 sm:$0xff]   ;;  %v10668_v3 = vld [vmem:[%s15278_s20 + $0x28] ss:$16 sps:$4 sm:$0xff]   ;;  %v10744_v28 = vld [vmem:[%s15278_s20 + $0x1c4] ss:$16 sps:$4 sm:$0xff]  }
  0x4c   :  { %v10676_v4 = vld [vmem:[%s15278_s20 + $0x4c] ss:$16 sps:$4 sm:$0xff]   ;;  %v10674_v5 = vld [vmem:[%s15278_s20 + $0x48] ss:$16 sps:$4 sm:$0xff]   ;;  %v10749_v31 = vld [vmem:[%s15278_s20 + $0x1c0] ss:$16 sps:$4 sm:$0xff]   ;;  %765 = vmatprep.subr.bf16.mxu0 %v10744_v28 }
  0x4d   :  { %v10682_v6 = vld [vmem:[%s15278_s20 + $0x6c] ss:$16 sps:$4 sm:$0xff]   ;;  %v10680_v7 = vld [vmem:[%s15278_s20 + $0x68] ss:$16 sps:$4 sm:$0xff]   ;;  %766 = vmatpush1.bf16.msra.mxu0 %v10749_v31  ;;  %v10750_v32 = vld [vmem:[%s15278_s20 + $0x1e4] ss:$16 sps:$4 sm:$0xff]  }
  0x4e   :  { %v10688_v8 = vld [vmem:[%s15278_s20 + $0x8c] ss:$16 sps:$4 sm:$0xff]   ;;  %v10686_v9 = vld [vmem:[%s15278_s20 + $0x88] ss:$16 sps:$4 sm:$0xff]   ;;  %v10755_v35 = vld [vmem:[%s15278_s20 + $0x1e0] ss:$16 sps:$4 sm:$0xff]   ;;  %767 = vmatprep.subr.bf16.mxu0 %v10750_v32 }
  0x4f   :  { %v10694_v10 = vld [vmem:[%s15278_s20 + $0xac] ss:$16 sps:$4 sm:$0xff]   ;;  %v10692_v11 = vld [vmem:[%s15278_s20 + $0xa8] ss:$16 sps:$4 sm:$0xff]   ;;  %v827_v36 = vld [vmem:[%s15252_s4] sm:$0xff]  ;;  %v11686_v45 = vshrl.u32 %v196_v44, 7 }
  0x50   :  { %v10700_v12 = vld [vmem:[%s15278_s20 + $0xcc] ss:$16 sps:$4 sm:$0xff]   ;;  %v10698_v13 = vld [vmem:[%s15278_s20 + $0xc8] ss:$16 sps:$4 sm:$0xff]   ;;  %v831_v37 = vld [vmem:[%s15252_s4 + $0x20] sm:$0xff]  ;;  %vm9199_vm1 = vcmask 64512  }
  0x51   :  { %v10706_v14 = vld [vmem:[%s15278_s20 + $0xec] ss:$16 sps:$4 sm:$0xff]   ;;  %v10704_v15 = vld [vmem:[%s15278_s20 + $0xe8] ss:$16 sps:$4 sm:$0xff]   ;;  %768 = vmatpush1.bf16.msra.mxu0 %v10755_v35  ;;  %v9316_v39 = vcombine.low %v827_v36, %v831_v37  ;;  %v9317_v40 = vcombine.high %v827_v36, %v831_v37  ;;  %v11689_v46 = vsub.s32 0, %v11686_v45  ;;  %v11695_v48 = vsub.s32 1, %v11686_v45 }
  0x52   :  { %v10712_v16 = vld [vmem:[%s15278_s20 + $0x10c] ss:$16 sps:$4 sm:$0xff]   ;;  %v10710_v17 = vld [vmem:[%s15278_s20 + $0x108] ss:$16 sps:$4 sm:$0xff]   ;;  %v194_v47 = vld [vmem:[%s15259_s11] sm:$0x3] }
  0x53   :  { %v10718_v18 = vld [vmem:[%s15278_s20 + $0x12c] ss:$16 sps:$4 sm:$0xff]   ;;  %v10716_v19 = vld [vmem:[%s15278_s20 + $0x128] ss:$16 sps:$4 sm:$0xff]   ;;  %2405 = vmatprep.subr.bf16.mxu0 %v9317_v40  ;;  %v199_v49 = vrot.slane %v194_v47, %v11689_v46  ;;  %v203_v50 = vrot.slane %v194_v47, %v11695_v48  ;;  %v867_v28 = vld [vmem:[%s15252_s4 + $0x140] sm:$0xff] }
  0x54   :  { %v10724_v20 = vld [vmem:[%s15278_s20 + $0x14c] ss:$16 sps:$4 sm:$0xff]   ;;  %v10722_v21 = vld [vmem:[%s15278_s20 + $0x148] ss:$16 sps:$4 sm:$0xff]   ;;  %v875_v36 = vld [vmem:[%s15252_s4 + $0x180] sm:$0xff] }
  0x55   :  { %v10730_v22 = vld [vmem:[%s15278_s20 + $0x16c] ss:$16 sps:$4 sm:$0xff]   ;;  %v10728_v23 = vld [vmem:[%s15278_s20 + $0x168] ss:$16 sps:$4 sm:$0xff]   ;;  %v879_v37 = vld [vmem:[%s15252_s4 + $0x1a0] sm:$0xff] }
  0x56   :  { %v10736_v24 = vld [vmem:[%s15278_s20 + $0x18c] ss:$16 sps:$4 sm:$0xff]   ;;  %v10734_v25 = vld [vmem:[%s15278_s20 + $0x188] ss:$16 sps:$4 sm:$0xff]   ;;  %v883_v44 = vld [vmem:[%s15252_s4 + $0x1c0] sm:$0xff] }
  0x57   :  { %v10742_v26 = vld [vmem:[%s15278_s20 + $0x1ac] ss:$16 sps:$4 sm:$0xff]   ;;  %v10740_v27 = vld [vmem:[%s15278_s20 + $0x1a8] ss:$16 sps:$4 sm:$0xff]   ;;  %v887_v47 = vld [vmem:[%s15252_s4 + $0x1e0] sm:$0xff] }
  0x58   :  { %v10748_v29 = vld [vmem:[%s15278_s20 + $0x1cc] ss:$16 sps:$4 sm:$0xff]   ;;  %v10746_v30 = vld [vmem:[%s15278_s20 + $0x1c8] ss:$16 sps:$4 sm:$0xff]  }
  0x59   :  { %v10754_v33 = vld [vmem:[%s15278_s20 + $0x1ec] ss:$16 sps:$4 sm:$0xff]   ;;  %v10752_v34 = vld [vmem:[%s15278_s20 + $0x1e8] ss:$16 sps:$4 sm:$0xff]  }
  0x5a   :  { %v828_v38 = vld [vmem:[%s15252_s4 + $0x8] sm:$0xff] }
  0x5b   :  { %v832_v41 = vld [vmem:[%s15252_s4 + $0x28] sm:$0xff] }
  0x5c   :  { %v9318_v42 = vcombine.low %v828_v38, %v832_v41  ;;  %v9319_v43 = vcombine.high %v828_v38, %v832_v41  ;;  %v872_v31 = vld [vmem:[%s15252_s4 + $0x168] sm:$0xff] }
  0x5d   :  { %v876_v38 = vld [vmem:[%s15252_s4 + $0x188] sm:$0xff] }
  0xfe   :  { %v170_v57 = vpop.f32.mrb[0].mxu1 }
  0xff   :  { %v171_v58 = vadd.f32 %v9227_v56, %v170_v57  ;;  %v10488_v59 = vpop.f32.mrb[1].mxu1 }
 0x100   :  { %v173_v60 = vpop.f32.mrb[2].mxu1 }
 0x101   :  { %v176_v61 = vmax.f32 %v171_v58, 0.0  ;;  %v10489_v62 = vpop.f32.mrb[3].mxu1  ;;  %v835_v58 = vld [vmem:[%s15252_s4 + $0x40] sm:$0xff] }
 0x102   :  { %v839_v60 = vld [vmem:[%s15252_s4 + $0x60] sm:$0xff]  ;;  %v840_v62 = vld [vmem:[%s15252_s4 + $0x68] sm:$0xff] }
 0x103   :  { %v177_v0 = vpack.c.bf16 %v176_v61, %v176_v61  ;;  %v836_v61 = vld [vmem:[%s15252_s4 + $0x48] sm:$0xff] }
 0x105   :  { %319 = vmatmul.mubr.bf16.vlgmr.msra.gmra.mrb[4].mxu1 %v177_v0 }
 0x106   :  { %779 = vmatpush1.bf16.msra.mxu1 %v10662_v63 }
 0x107   :  { %780 = vmatprep.subr.bf16.mxu1 %v10670_v2  ;;  %v9325_v2 = vcombine.high %v835_v58, %v839_v60 }
 0x10a   :  { %781 = vmatpush1.bf16.msra.mxu1 %v10668_v3  ;;  %v9327_v3 = vcombine.high %v836_v61, %v840_v62 }
 0x10b   :  { %782 = vmatprep.subr.bf16.mxu1 %v10676_v4  ;;  %v843_v4 = vld [vmem:[%s15252_s4 + $0x80] sm:$0xff] }
 0x10e   :  { %783 = vmatpush1.bf16.msra.mxu1 %v10674_v5  ;;  %v847_v5 = vld [vmem:[%s15252_s4 + $0xa0] sm:$0xff] }
 0x10f   :  { %784 = vmatprep.subr.bf16.mxu1 %v10682_v6  ;;  %v844_v6 = vld [vmem:[%s15252_s4 + $0x88] sm:$0xff] }
 0x112   :  { %785 = vmatpush1.bf16.msra.mxu1 %v10680_v7  ;;  %v848_v7 = vld [vmem:[%s15252_s4 + $0xa8] sm:$0xff] }
 0x113   :  { %786 = vmatprep.subr.bf16.mxu1 %v10688_v8  ;;  %v9324_v8 = vcombine.low %v835_v58, %v839_v60  ;;  %v896_v58 = vld [vmem:[%s15252_s4 + $0x228] sm:$0xff] }
 0x116   :  { %787 = vmatpush1.bf16.msra.mxu1 %v10686_v9  ;;  %v9326_v9 = vcombine.low %v836_v61, %v840_v62 }
 0x117   :  { %788 = vmatprep.subr.bf16.mxu1 %v10694_v10  ;;  %v9333_v10 = vcombine.high %v843_v4, %v847_v5 }
 0x11a   :  { %789 = vmatpush1.bf16.msra.mxu1 %v10692_v11  ;;  %v9335_v11 = vcombine.high %v844_v6, %v848_v7 }
 0x11b   :  { %790 = vmatprep.subr.bf16.mxu1 %v10700_v12  ;;  %v851_v12 = vld [vmem:[%s15252_s4 + $0xc0] sm:$0xff] }
 0x11e   :  { %791 = vmatpush1.bf16.msra.mxu1 %v10698_v13  ;;  %v855_v13 = vld [vmem:[%s15252_s4 + $0xe0] sm:$0xff] }
 0x11f   :  { %792 = vmatprep.subr.bf16.mxu1 %v10706_v14  ;;  %v852_v14 = vld [vmem:[%s15252_s4 + $0xc8] sm:$0xff] }
 0x122   :  { %793 = vmatpush1.bf16.msra.mxu1 %v10704_v15  ;;  %v856_v15 = vld [vmem:[%s15252_s4 + $0xe8] sm:$0xff] }
 0x123   :  { %794 = vmatprep.subr.bf16.mxu1 %v10712_v16  ;;  %v9332_v16 = vcombine.low %v843_v4, %v847_v5 }
 0x126   :  { %795 = vmatpush1.bf16.msra.mxu1 %v10710_v17  ;;  %v9334_v17 = vcombine.low %v844_v6, %v848_v7 }
 0x127   :  { %796 = vmatprep.subr.bf16.mxu1 %v10718_v18  ;;  %v9341_v18 = vcombine.high %v851_v12, %v855_v13 }
 0x12a   :  { %797 = vmatpush1.bf16.msra.mxu1 %v10716_v19  ;;  %v9343_v19 = vcombine.high %v852_v14, %v856_v15 }
 0x12b   :  { %798 = vmatprep.subr.bf16.mxu1 %v10724_v20  ;;  %v859_v20 = vld [vmem:[%s15252_s4 + $0x100] sm:$0xff] }
 0x12e   :  { %799 = vmatpush1.bf16.msra.mxu1 %v10722_v21  ;;  %v863_v21 = vld [vmem:[%s15252_s4 + $0x120] sm:$0xff] }
 0x12f   :  { %800 = vmatprep.subr.bf16.mxu1 %v10730_v22  ;;  %v860_v22 = vld [vmem:[%s15252_s4 + $0x108] sm:$0xff]  ;;  %v9348_v32 = vcombine.low %v859_v20, %v863_v21 }
 0x132   :  { %801 = vmatpush1.bf16.msra.mxu1 %v10728_v23  ;;  %v864_v23 = vld [vmem:[%s15252_s4 + $0x128] sm:$0xff] }
 0x133   :  { %802 = vmatprep.subr.bf16.mxu1 %v10736_v24  ;;  %v9340_v24 = vcombine.low %v851_v12, %v855_v13 }
 0x136   :  { %803 = vmatpush1.bf16.msra.mxu1 %v10734_v25  ;;  %v9342_v25 = vcombine.low %v852_v14, %v856_v15 }
 0x137   :  { %804 = vmatprep.subr.bf16.mxu1 %v10742_v26  ;;  %v9349_v26 = vcombine.high %v859_v20, %v863_v21 }
 0x13a   :  { %805 = vmatpush1.bf16.msra.mxu1 %v10740_v27  ;;  %v9351_v27 = vcombine.high %v860_v22, %v864_v23 }
 0x13b   :  { %806 = vmatprep.subr.bf16.mxu1 %v10748_v29  ;;  %v871_v29 = vld [vmem:[%s15252_s4 + $0x160] sm:$0xff] }
 0x13c   :  { %v9356_v40 = vcombine.low %v867_v28, %v871_v29 }
 0x13e   :  { %807 = vmatpush1.bf16.msra.mxu1 %v10746_v30  ;;  %v868_v30 = vld [vmem:[%s15252_s4 + $0x148] sm:$0xff] }
 0x13f   :  { %808 = vmatprep.subr.bf16.mxu1 %v10754_v33  ;;  %v9350_v33 = vcombine.low %v860_v22, %v864_v23  ;;  %v9359_v35 = vcombine.high %v868_v30, %v872_v31  ;;  %v9358_v41 = vcombine.low %v868_v30, %v872_v31 }
 0x142   :  { %809 = vmatpush1.bf16.msra.mxu1 %v10752_v34  ;;  %v9357_v34 = vcombine.high %v867_v28, %v871_v29 }
 0x143   :  { %2487 = vmatprep.subr.bf16.mxu1 %v9319_v43 }
 0x1d8   :  { %v320_v51 = vpop.f32.mrb[4].mxu1 }
 0x1d9   :  { %v321_v52 = vadd.f32 %v320_v51, %v199_v49  ;;  %v322_v53 = vpop.f32.mrb[5].mxu1  ;;  %v884_v49 = vld [vmem:[%s15252_s4 + $0x1c8] sm:$0xff]  ;;  %v9364_v51 = vcombine.low %v875_v36, %v879_v37 }
 0x1da   :  { %v323_v54 = vadd.f32 %v322_v53, %v203_v50  ;;  %v324_v55 = vpop.f32.mrb[6].mxu1  ;;  %v888_v50 = vld [vmem:[%s15252_s4 + $0x1e8] sm:$0xff]  ;;  %v9373_v53 = vcombine.high %v883_v44, %v887_v47 }
 0x1db   :  { %v327_v56 = vmax.f32 %v321_v52, 0.0  ;;  %v325_v57 = vpop.f32.mrb[7].mxu1  ;;  %v891_v55 = vld [vmem:[%s15252_s4 + $0x200] sm:$0xff]  ;;  %v9374_v60 = vcombine.low %v884_v49, %v888_v50 }
 0x1dc   :  { %v328_v59 = vmax.f32 %v323_v54, 0.0  ;;  %v9375_v54 = vcombine.high %v884_v49, %v888_v50  ;;  %v892_v57 = vld [vmem:[%s15252_s4 + $0x208] sm:$0xff] }
 0x1dd   :  { %v329_v0 = vpack.c.bf16 %v327_v56, %v327_v56  ;;  %v895_v56 = vld [vmem:[%s15252_s4 + $0x220] sm:$0xff]  ;;  %v9383_v62 = vcombine.high %v892_v57, %v896_v58  ;;  %v9382_v5 = vcombine.low %v892_v57, %v896_v58  ;;  %v944_v49 = vld [vmem:[%s15252_s4 + $0x3a8] sm:$0xff] }
 0x1de   :  { %v330_v63 = vpack.c.bf16 %v328_v59, %v328_v59  ;;  %v9372_v59 = vcombine.low %v883_v44, %v887_v47  ;;  %v9381_v61 = vcombine.high %v891_v55, %v895_v56  ;;  %v9380_v4 = vcombine.low %v891_v55, %v895_v56  ;;  %v940_v44 = vld [vmem:[%s15252_s4 + $0x388] sm:$0xff] }
 0x1df   :  { %v948_v55 = vld [vmem:[%s15252_s4 + $0x3c8] sm:$0xff] }
 0x1e0   :  { %769 = vmatprep.mubr.bf16.mxu0 %v330_v63  ;;  %810 = vmatprep.mubr.bf16.mxu1 %v330_v63  ;;  %v899_v63 = vld [vmem:[%s15252_s4 + $0x240] sm:$0xff]  ;;  %v952_v57 = vld [vmem:[%s15252_s4 + $0x3e8] sm:$0xff] }
 0x1e1   :  { %770 = vmatmul.mubr.bf16.vlgmr.msra.gmra.mrb[0].mxu0 %v329_v0  ;;  %811 = vmatmul.mubr.bf16.vlgmr.msra.gmra.mrb[8].mxu1 %v329_v0  ;;  %v903_v0 = vld [vmem:[%s15252_s4 + $0x260] sm:$0xff] }
 0x1e2   :  { %2406 = vmatpush1.bf16.msra.mxu0 %v9316_v39  ;;  %2488 = vmatpush1.bf16.msra.mxu1 %v9318_v42  ;;  %v880_v39 = vld [vmem:[%s15252_s4 + $0x1a8] sm:$0xff]  ;;  %v9365_v42 = vcombine.high %v875_v36, %v879_v37  ;;  %v9389_v6 = vcombine.high %v899_v63, %v903_v0  ;;  %v9388_v12 = vcombine.low %v899_v63, %v903_v0 }
 0x1e3   :  { %2407 = vmatprep.subr.bf16.mxu0 %v9325_v2  ;;  %2489 = vmatprep.subr.bf16.mxu1 %v9327_v3  ;;  %v9367_v43 = vcombine.high %v876_v38, %v880_v39  ;;  %v9366_v52 = vcombine.low %v876_v38, %v880_v39  ;;  %v900_v2 = vld [vmem:[%s15252_s4 + $0x248] sm:$0xff] }
 0x1e4   :  { %v904_v3 = vld [vmem:[%s15252_s4 + $0x268] sm:$0xff] }
 0x1e5   :  { %v9391_v7 = vcombine.high %v900_v2, %v904_v3  ;;  %v9390_v13 = vcombine.low %v900_v2, %v904_v3  ;;  %v956_v63 = vld [vmem:[%s15252_s4 + $0x408] sm:$0xff] }
 0x1e6   :  { %2408 = vmatpush1.bf16.msra.mxu0 %v9324_v8  ;;  %2490 = vmatpush1.bf16.msra.mxu1 %v9326_v9  ;;  %v907_v8 = vld [vmem:[%s15252_s4 + $0x280] sm:$0xff]  ;;  %v960_v2 = vld [vmem:[%s15252_s4 + $0x428] sm:$0xff] }
 0x1e7   :  { %2409 = vmatprep.subr.bf16.mxu0 %v9333_v10  ;;  %2491 = vmatprep.subr.bf16.mxu1 %v9335_v11  ;;  %v911_v9 = vld [vmem:[%s15252_s4 + $0x2a0] sm:$0xff]  ;;  %v908_v10 = vld [vmem:[%s15252_s4 + $0x288] sm:$0xff] }
 0x1e8   :  { %v912_v11 = vld [vmem:[%s15252_s4 + $0x2a8] sm:$0xff]  ;;  %v9397_v14 = vcombine.high %v907_v8, %v911_v9  ;;  %v9396_v20 = vcombine.low %v907_v8, %v911_v9 }
 0x1e9   :  { %v9399_v15 = vcombine.high %v908_v10, %v912_v11  ;;  %v9398_v21 = vcombine.low %v908_v10, %v912_v11 }
 0x1ea   :  { %2410 = vmatpush1.bf16.msra.mxu0 %v9332_v16  ;;  %2492 = vmatpush1.bf16.msra.mxu1 %v9334_v17  ;;  %v915_v16 = vld [vmem:[%s15252_s4 + $0x2c0] sm:$0xff] }
 0x1eb   :  { %2411 = vmatprep.subr.bf16.mxu0 %v9341_v18  ;;  %2493 = vmatprep.subr.bf16.mxu1 %v9343_v19  ;;  %v919_v17 = vld [vmem:[%s15252_s4 + $0x2e0] sm:$0xff]  ;;  %v916_v18 = vld [vmem:[%s15252_s4 + $0x2c8] sm:$0xff] }
 0x1ec   :  { %v920_v19 = vld [vmem:[%s15252_s4 + $0x2e8] sm:$0xff]  ;;  %v9405_v22 = vcombine.high %v915_v16, %v919_v17  ;;  %v9404_v28 = vcombine.low %v915_v16, %v919_v17 }
 0x1ed   :  { %v9407_v23 = vcombine.high %v916_v18, %v920_v19  ;;  %v9406_v29 = vcombine.low %v916_v18, %v920_v19 }
 0x1ee   :  { %2412 = vmatpush1.bf16.msra.mxu0 %v9340_v24  ;;  %2494 = vmatpush1.bf16.msra.mxu1 %v9342_v25  ;;  %v923_v24 = vld [vmem:[%s15252_s4 + $0x300] sm:$0xff] }
 0x1ef   :  { %2413 = vmatprep.subr.bf16.mxu0 %v9349_v26  ;;  %2495 = vmatprep.subr.bf16.mxu1 %v9351_v27  ;;  %v927_v25 = vld [vmem:[%s15252_s4 + $0x320] sm:$0xff]  ;;  %v924_v26 = vld [vmem:[%s15252_s4 + $0x308] sm:$0xff] }
 0x1f0   :  { %v928_v27 = vld [vmem:[%s15252_s4 + $0x328] sm:$0xff]  ;;  %v9413_v30 = vcombine.high %v923_v24, %v927_v25  ;;  %v9412_v36 = vcombine.low %v923_v24, %v927_v25  ;;  %v963_v24 = vld [vmem:[%s15252_s4 + $0x440] sm:$0xff] }
 0x1f1   :  { %v9415_v31 = vcombine.high %v924_v26, %v928_v27  ;;  %v9414_v37 = vcombine.low %v924_v26, %v928_v27  ;;  %v967_v26 = vld [vmem:[%s15252_s4 + $0x460] sm:$0xff]  ;;  %v964_v27 = vld [vmem:[%s15252_s4 + $0x448] sm:$0xff] }
 0x1f2   :  { %2414 = vmatpush1.bf16.msra.mxu0 %v9348_v32  ;;  %2496 = vmatpush1.bf16.msra.mxu1 %v9350_v33  ;;  %v931_v32 = vld [vmem:[%s15252_s4 + $0x340] sm:$0xff] }
 0x1f3   :  { %2415 = vmatprep.subr.bf16.mxu0 %v9357_v34  ;;  %2497 = vmatprep.subr.bf16.mxu1 %v9359_v35  ;;  %v935_v33 = vld [vmem:[%s15252_s4 + $0x360] sm:$0xff]  ;;  %v932_v34 = vld [vmem:[%s15252_s4 + $0x348] sm:$0xff] }
 0x1f4   :  { %v936_v35 = vld [vmem:[%s15252_s4 + $0x368] sm:$0xff]  ;;  %v9421_v38 = vcombine.high %v931_v32, %v935_v33 }
 0x1f5   :  { %v9423_v39 = vcombine.high %v932_v34, %v936_v35 }
 0x1f6   :  { %2416 = vmatpush1.bf16.msra.mxu0 %v9356_v40  ;;  %2498 = vmatpush1.bf16.msra.mxu1 %v9358_v41  ;;  %v9420_v40 = vcombine.low %v931_v32, %v935_v33  ;;  %v9422_v41 = vcombine.low %v932_v34, %v936_v35  ;;  %v9453_v32 = vcombine.high %v963_v24, %v967_v26  ;;  %v975_v34 = vld [vmem:[%s15252_s4 + $0x4a0] sm:$0xff]  ;;  %v972_v35 = vld [vmem:[%s15252_s4 + $0x488] sm:$0xff] }
 0x1f7   :  { %2417 = vmatprep.subr.bf16.mxu0 %v9365_v42  ;;  %2499 = vmatprep.subr.bf16.mxu1 %v9367_v43  ;;  %v939_v42 = vld [vmem:[%s15252_s4 + $0x380] sm:$0xff] }
 0x1f8   :  { %v943_v43 = vld [vmem:[%s15252_s4 + $0x3a0] sm:$0xff] }
 0x1f9   :  { %v9429_v47 = vcombine.high %v939_v42, %v943_v43  ;;  %v9428_v50 = vcombine.low %v939_v42, %v943_v43  ;;  %v979_v42 = vld [vmem:[%s15252_s4 + $0x4c0] sm:$0xff] }
 0x1fa   :  { %2418 = vmatpush1.bf16.msra.mxu0 %v9364_v51  ;;  %2500 = vmatpush1.bf16.msra.mxu1 %v9366_v52  ;;  %v9430_v51 = vcombine.low %v940_v44, %v944_v49  ;;  %v9431_v52 = vcombine.high %v940_v44, %v944_v49  ;;  %v983_v43 = vld [vmem:[%s15252_s4 + $0x4e0] sm:$0xff]  ;;  %v980_v44 = vld [vmem:[%s15252_s4 + $0x4c8] sm:$0xff] }
 0x1fb   :  { %2419 = vmatprep.subr.bf16.mxu0 %v9373_v53  ;;  %2501 = vmatprep.subr.bf16.mxu1 %v9375_v54  ;;  %v947_v53 = vld [vmem:[%s15252_s4 + $0x3c0] sm:$0xff] }
 0x1fc   :  { %v951_v54 = vld [vmem:[%s15252_s4 + $0x3e0] sm:$0xff] }
 0x1fd   :  { %v9437_v56 = vcombine.high %v947_v53, %v951_v54  ;;  %v9436_v58 = vcombine.low %v947_v53, %v951_v54  ;;  %v987_v53 = vld [vmem:[%s15252_s4 + $0x500] sm:$0xff] }
 0x1fe   :  { %2420 = vmatpush1.bf16.msra.mxu0 %v9372_v59  ;;  %2502 = vmatpush1.bf16.msra.mxu1 %v9374_v60  ;;  %v9438_v59 = vcombine.low %v948_v55, %v952_v57  ;;  %v9439_v60 = vcombine.high %v948_v55, %v952_v57  ;;  %v991_v54 = vld [vmem:[%s15252_s4 + $0x520] sm:$0xff]  ;;  %v988_v55 = vld [vmem:[%s15252_s4 + $0x508] sm:$0xff]  ;;  %v9468_v57 = vcombine.low %v979_v42, %v983_v43 }
 0x1ff   :  { %2421 = vmatprep.subr.bf16.mxu0 %v9381_v61  ;;  %2503 = vmatprep.subr.bf16.mxu1 %v9383_v62  ;;  %v955_v61 = vld [vmem:[%s15252_s4 + $0x400] sm:$0xff] }
 0x200   :  { %v959_v62 = vld [vmem:[%s15252_s4 + $0x420] sm:$0xff] }
 0x201   :  { %v9445_v0 = vcombine.high %v955_v61, %v959_v62  ;;  %v9444_v3 = vcombine.low %v955_v61, %v959_v62  ;;  %v995_v61 = vld [vmem:[%s15252_s4 + $0x540] sm:$0xff] }
 0x202   :  { %2422 = vmatpush1.bf16.msra.mxu0 %v9380_v4  ;;  %2504 = vmatpush1.bf16.msra.mxu1 %v9382_v5  ;;  %v9446_v4 = vcombine.low %v956_v63, %v960_v2  ;;  %v9447_v5 = vcombine.high %v956_v63, %v960_v2  ;;  %v999_v62 = vld [vmem:[%s15252_s4 + $0x560] sm:$0xff]  ;;  %v996_v63 = vld [vmem:[%s15252_s4 + $0x548] sm:$0xff]  ;;  %v9476_v2 = vcombine.low %v987_v53, %v991_v54 }
 0x203   :  { %2423 = vmatprep.subr.bf16.mxu0 %v9389_v6  ;;  %2505 = vmatprep.subr.bf16.mxu1 %v9391_v7  ;;  %v11894_v6 = vld [vmem:[%s15260_s12] sm:$0xf]  ;;  %v11897_v7 = vsub.s32 3, %v11686_v45 }
 0x204   :  { %v400_v8 = vrot.slane %v11894_v6, %v11689_v46  ;;  %v404_v9 = vrot.slane %v11894_v6, %v11695_v48 }
 0x205   :  { %v412_v10 = vrot.slane %v11894_v6, %v11897_v7 }
 0x206   :  { %2424 = vmatpush1.bf16.msra.mxu0 %v9388_v12  ;;  %2506 = vmatpush1.bf16.msra.mxu1 %v9390_v13 }
 0x207   :  { %2425 = vmatprep.subr.bf16.mxu0 %v9397_v14  ;;  %2507 = vmatprep.subr.bf16.mxu1 %v9399_v15 }
 0x20a   :  { %2426 = vmatpush1.bf16.msra.mxu0 %v9396_v20  ;;  %2508 = vmatpush1.bf16.msra.mxu1 %v9398_v21 }
 0x20b   :  { %2427 = vmatprep.subr.bf16.mxu0 %v9405_v22  ;;  %2509 = vmatprep.subr.bf16.mxu1 %v9407_v23 }
 0x20e   :  { %2428 = vmatpush1.bf16.msra.mxu0 %v9404_v28  ;;  %2510 = vmatpush1.bf16.msra.mxu1 %v9406_v29  ;;  %v968_v28 = vld [vmem:[%s15252_s4 + $0x468] sm:$0xff] }
 0x20f   :  { %2429 = vmatprep.subr.bf16.mxu0 %v9413_v30  ;;  %2511 = vmatprep.subr.bf16.mxu1 %v9415_v31  ;;  %v971_v31 = vld [vmem:[%s15252_s4 + $0x480] sm:$0xff]  ;;  %v9455_v33 = vcombine.high %v964_v27, %v968_v28 }
 0x210   :  { %v9460_v49 = vcombine.low %v971_v31, %v975_v34 }
 0x212   :  { %2430 = vmatpush1.bf16.msra.mxu0 %v9412_v36  ;;  %2512 = vmatpush1.bf16.msra.mxu1 %v9414_v37  ;;  %v976_v36 = vld [vmem:[%s15252_s4 + $0x4a8] sm:$0xff] }
 0x213   :  { %2431 = vmatprep.subr.bf16.mxu0 %v9421_v38  ;;  %2513 = vmatprep.subr.bf16.mxu1 %v9423_v39  ;;  %v9452_v38 = vcombine.low %v963_v24, %v967_v26  ;;  %v9454_v39 = vcombine.low %v964_v27, %v968_v28  ;;  %v1023_v26 = vld [vmem:[%s15252_s4 + $0x620] sm:$0xff]  ;;  %v1020_v27 = vld [vmem:[%s15252_s4 + $0x608] sm:$0xff] }
 0x214   :  { %v1024_v28 = vld [vmem:[%s15252_s4 + $0x628] sm:$0xff] }
 0x216   :  { %2432 = vmatpush1.bf16.msra.mxu0 %v9420_v40  ;;  %2514 = vmatpush1.bf16.msra.mxu1 %v9422_v41  ;;  %v9461_v40 = vcombine.high %v971_v31, %v975_v34  ;;  %v9463_v41 = vcombine.high %v972_v35, %v976_v36  ;;  %v9511_v34 = vcombine.high %v1020_v27, %v1024_v28 }
 0x217   :  { %2433 = vmatprep.subr.bf16.mxu0 %v9429_v47  ;;  %2515 = vmatprep.subr.bf16.mxu1 %v9431_v52  ;;  %v984_v47 = vld [vmem:[%s15252_s4 + $0x4e8] sm:$0xff] }
 0x218   :  { %v9471_v52 = vcombine.high %v980_v44, %v984_v47 }
 0x21a   :  { %2434 = vmatpush1.bf16.msra.mxu0 %v9428_v50  ;;  %2516 = vmatpush1.bf16.msra.mxu1 %v9430_v51  ;;  %v9462_v50 = vcombine.low %v972_v35, %v976_v36  ;;  %v9469_v51 = vcombine.high %v979_v42, %v983_v43  ;;  %v1027_v35 = vld [vmem:[%s15252_s4 + $0x640] sm:$0xff] }
 0x21b   :  { %2435 = vmatprep.subr.bf16.mxu0 %v9437_v56  ;;  %2517 = vmatprep.subr.bf16.mxu1 %v9439_v60  ;;  %v992_v56 = vld [vmem:[%s15252_s4 + $0x528] sm:$0xff]  ;;  %v1031_v36 = vld [vmem:[%s15252_s4 + $0x660] sm:$0xff] }
 0x21c   :  { %v9479_v60 = vcombine.high %v988_v55, %v992_v56  ;;  %v9517_v42 = vcombine.high %v1027_v35, %v1031_v36 }
 0x21e   :  { %2436 = vmatpush1.bf16.msra.mxu0 %v9436_v58  ;;  %2518 = vmatpush1.bf16.msra.mxu1 %v9438_v59  ;;  %v9470_v58 = vcombine.low %v980_v44, %v984_v47  ;;  %v9477_v59 = vcombine.high %v987_v53, %v991_v54  ;;  %v1035_v44 = vld [vmem:[%s15252_s4 + $0x680] sm:$0xff] }
 0x21f   :  { %2446 = vmatprep.subr.bf16.mxu0 %v9445_v0  ;;  %2528 = vmatprep.subr.bf16.mxu1 %v9447_v5  ;;  %v1000_v0 = vld [vmem:[%s15252_s4 + $0x568] sm:$0xff]  ;;  %v1039_v47 = vld [vmem:[%s15252_s4 + $0x6a0] sm:$0xff] }
 0x220   :  { %v9487_v5 = vcombine.high %v996_v63, %v1000_v0  ;;  %v9525_v53 = vcombine.high %v1035_v44, %v1039_v47 }
 0x2b4   :  { %v771_v11 = vpop.f32.mrb[0].mxu0  ;;  %v11905_v12 = vpop.f32.mrb[8].mxu1 }
 0x2b5   :  { %v772_v13 = vadd.f32 %v771_v11, %v400_v8  ;;  %v773_v14 = vpop.f32.mrb[1].mxu0  ;;  %v814_v15 = vpop.f32.mrb[9].mxu1  ;;  %v1003_v8 = vld [vmem:[%s15252_s4 + $0x580] sm:$0xff]  ;;  %v1008_v11 = vld [vmem:[%s15252_s4 + $0x5a8] sm:$0xff] }
 0x2b6   :  { %v774_v16 = vadd.f32 %v773_v14, %v404_v9  ;;  %v815_v17 = vadd.f32 %v814_v15, %v412_v10  ;;  %v775_v18 = vpop.f32.mrb[2].mxu0  ;;  %v816_v19 = vpop.f32.mrb[10].mxu1  ;;  %v1007_v9 = vld [vmem:[%s15252_s4 + $0x5a0] sm:$0xff]  ;;  %v1004_v10 = vld [vmem:[%s15252_s4 + $0x588] sm:$0xff]  ;;  %v9486_v14 = vcombine.low %v996_v63, %v1000_v0 }
 0x2b7   :  { %v819_v20 = vmax.f32 %v772_v13, 0.0  ;;  %v776_v21 = vpop.f32.mrb[3].mxu0  ;;  %v817_v22 = vpop.f32.mrb[11].mxu1  ;;  %v9484_v13 = vcombine.low %v995_v61, %v999_v62  ;;  %v9493_v15 = vcombine.high %v1003_v8, %v1007_v9  ;;  %v1015_v18 = vld [vmem:[%s15252_s4 + $0x5e0] sm:$0xff]  ;;  %v1012_v19 = vld [vmem:[%s15252_s4 + $0x5c8] sm:$0xff] }
 0x2b8   :  { %v820_v23 = vmax.f32 %v774_v16, 0.0  ;;  %v822_v25 = vmax.f32 %v815_v17, 0.0  ;;  %v9495_v16 = vcombine.high %v1004_v10, %v1008_v11  ;;  %v1011_v17 = vld [vmem:[%s15252_s4 + $0x5c0] sm:$0xff]  ;;  %v9492_v21 = vcombine.low %v1003_v8, %v1007_v9 }
 0x2b9   :  { %v11921_v30 = vpack.c.bf16 %v819_v20, %v819_v20  ;;  %v1016_v20 = vld [vmem:[%s15252_s4 + $0x5e8] sm:$0xff]  ;;  %v9494_v22 = vcombine.low %v1004_v10, %v1008_v11  ;;  %v9500_v31 = vcombine.low %v1011_v17, %v1015_v18  ;;  %v1051_v63 = vld [vmem:[%s15252_s4 + $0x700] sm:$0xff] }
 0x2ba   :  { %v11919_v29 = vpack.c.bf16 %v820_v23, %v820_v23  ;;  %v11937_v37 = vpack.c.bf16 %v822_v25, %v822_v25  ;;  %v9501_v23 = vcombine.high %v1011_v17, %v1015_v18  ;;  %v9503_v24 = vcombine.high %v1012_v19, %v1016_v20  ;;  %v1019_v25 = vld [vmem:[%s15252_s4 + $0x600] sm:$0xff] }
 0x2bb   :  { %v1055_v0 = vld [vmem:[%s15252_s4 + $0x720] sm:$0xff]  ;;  %v12076_v17 = vsub.s32 2, %v11686_v45 }
 0x2bc   :  { %2437 = vmatprep.mubr.bf16.mxu0 %v11919_v29  ;;  %2519 = vmatprep.mubr.bf16.mxu1 %v11919_v29  ;;  %v9541_v8 = vcombine.high %v1051_v63, %v1055_v0  ;;  %v1059_v10 = vld [vmem:[%s15252_s4 + $0x740] sm:$0xff] }
 0x2bd   :  { %2438 = vmatmul.mubr.bf16.vlgmr.msra.gmra.mrb[4].mxu0 %v11921_v30  ;;  %2520 = vmatmul.mubr.bf16.vlgmr.msra.gmra.mrb[12].mxu1 %v11921_v30  ;;  %v1063_v11 = vld [vmem:[%s15252_s4 + $0x760] sm:$0xff] }
 0x2be   :  { %2447 = vmatpush1.bf16.msra.mxu0 %v9444_v3  ;;  %2529 = vmatpush1.bf16.msra.mxu1 %v9446_v4  ;;  %v9478_v3 = vcombine.low %v988_v55, %v992_v56  ;;  %v9485_v4 = vcombine.high %v995_v61, %v999_v62  ;;  %v1043_v55 = vld [vmem:[%s15252_s4 + $0x6c0] sm:$0xff]  ;;  %v9549_v18 = vcombine.high %v1059_v10, %v1063_v11 }
 0x2bf   :  { %2478 = vmatprep.mubr.bf16.mxu0 %v11937_v37  ;;  %2560 = vmatprep.mubr.bf16.mxu1 %v11937_v37  ;;  %v1047_v56 = vld [vmem:[%s15252_s4 + $0x6e0] sm:$0xff] }
 0x2c0   :  { %2448 = vmatprep.subr.bf16.mxu0 %v9453_v32  ;;  %2530 = vmatprep.subr.bf16.mxu1 %v9455_v33  ;;  %v9502_v32 = vcombine.low %v1012_v19, %v1016_v20  ;;  %v9509_v33 = vcombine.high %v1019_v25, %v1023_v26  ;;  %v9533_v61 = vcombine.high %v1043_v55, %v1047_v56  ;;  %v1067_v20 = vld [vmem:[%s15252_s4 + $0x780] sm:$0xff] }
 0x2c2   :  { %2449 = vmatpush1.bf16.msra.mxu0 %v9452_v38  ;;  %2531 = vmatpush1.bf16.msra.mxu1 %v9454_v39  ;;  %v1028_v38 = vld [vmem:[%s15252_s4 + $0x648] sm:$0xff] }
 0x2c3   :  { %2450 = vmatprep.subr.bf16.mxu0 %v9461_v40  ;;  %2532 = vmatprep.subr.bf16.mxu1 %v9463_v41  ;;  %v1032_v39 = vld [vmem:[%s15252_s4 + $0x668] sm:$0xff]  ;;  %v9508_v40 = vcombine.low %v1019_v25, %v1023_v26  ;;  %v9510_v41 = vcombine.low %v1020_v27, %v1024_v28  ;;  %v408_v26 = vrot.slane %v11894_v6, %v12076_v17 }
 0x2c4   :  { %v9519_v43 = vcombine.high %v1028_v38, %v1032_v39  ;;  %v1080_v6 = vld [vmem:[%s15252_s4 + $0x7e8] sm:$0xff] }
 0x2c6   :  { %2451 = vmatpush1.bf16.msra.mxu0 %v9460_v49  ;;  %2533 = vmatpush1.bf16.msra.mxu1 %v9462_v50  ;;  %v1036_v49 = vld [vmem:[%s15252_s4 + $0x688] sm:$0xff] }
 0x2c7   :  { %2452 = vmatprep.subr.bf16.mxu0 %v9469_v51  ;;  %2534 = vmatprep.subr.bf16.mxu1 %v9471_v52  ;;  %v1040_v50 = vld [vmem:[%s15252_s4 + $0x6a8] sm:$0xff]  ;;  %v9516_v51 = vcombine.low %v1027_v35, %v1031_v36  ;;  %v9518_v52 = vcombine.low %v1028_v38, %v1032_v39  ;;  %v813_v36 = vadd.f32 %v11905_v12, %v408_v26  ;;  %v834_v12 = vld [vmem:[%s15252_s4 + $0x38] sm:$0xff] }
 0x2c8   :  { %v9527_v54 = vcombine.high %v1036_v49, %v1040_v50  ;;  %v870_v26 = vld [vmem:[%s15252_s4 + $0x158] sm:$0xff] }
 0x2ca   :  { %2453 = vmatpush1.bf16.msra.mxu0 %v9468_v57  ;;  %2535 = vmatpush1.bf16.msra.mxu1 %v9470_v58  ;;  %v1044_v57 = vld [vmem:[%s15252_s4 + $0x6c8] sm:$0xff] }
 0x2cb   :  { %2454 = vmatprep.subr.bf16.mxu0 %v9477_v59  ;;  %2536 = vmatprep.subr.bf16.mxu1 %v9479_v60  ;;  %v1048_v58 = vld [vmem:[%s15252_s4 + $0x6e8] sm:$0xff]  ;;  %v9524_v59 = vcombine.low %v1035_v44, %v1039_v47  ;;  %v9526_v60 = vcombine.low %v1036_v49, %v1040_v50  ;;  %v821_v47 = vmax.f32 %v813_v36, 0.0  ;;  %v882_v36 = vld [vmem:[%s15252_s4 + $0x1b8] sm:$0xff] }
 0x2cc   :  { %v9535_v62 = vcombine.high %v1044_v57, %v1048_v58 }
 0x2ce   :  { %2455 = vmatpush1.bf16.msra.mxu0 %v9476_v2  ;;  %2537 = vmatpush1.bf16.msra.mxu1 %v9478_v3  ;;  %v1052_v2 = vld [vmem:[%s15252_s4 + $0x708] sm:$0xff] }
 0x2cf   :  { %2456 = vmatprep.subr.bf16.mxu0 %v9485_v4  ;;  %2538 = vmatprep.subr.bf16.mxu1 %v9487_v5  ;;  %v1056_v3 = vld [vmem:[%s15252_s4 + $0x728] sm:$0xff]  ;;  %v9532_v4 = vcombine.low %v1043_v55, %v1047_v56  ;;  %v9534_v5 = vcombine.low %v1044_v57, %v1048_v58  ;;  %v12129_v56 = vpack.c.bf16 %v821_v47, %v821_v47 }
 0x2d0   :  { %v9543_v9 = vcombine.high %v1052_v2, %v1056_v3 }
 0x2d2   :  { %2457 = vmatpush1.bf16.msra.mxu0 %v9484_v13  ;;  %2539 = vmatpush1.bf16.msra.mxu1 %v9486_v14  ;;  %v1060_v13 = vld [vmem:[%s15252_s4 + $0x748] sm:$0xff] }
 0x2d3   :  { %2458 = vmatprep.subr.bf16.mxu0 %v9493_v15  ;;  %2540 = vmatprep.subr.bf16.mxu1 %v9495_v16  ;;  %v1064_v14 = vld [vmem:[%s15252_s4 + $0x768] sm:$0xff]  ;;  %v9540_v15 = vcombine.low %v1051_v63, %v1055_v0  ;;  %v9542_v16 = vcombine.low %v1052_v2, %v1056_v3  ;;  %v850_v63 = vld [vmem:[%s15252_s4 + $0xb8] sm:$0xff] }
 0x2d4   :  { %v9551_v19 = vcombine.high %v1060_v13, %v1064_v14  ;;  %v9550_v25 = vcombine.low %v1060_v13, %v1064_v14 }
 0x2d6   :  { %2459 = vmatpush1.bf16.msra.mxu0 %v9492_v21  ;;  %2541 = vmatpush1.bf16.msra.mxu1 %v9494_v22  ;;  %v1071_v21 = vld [vmem:[%s15252_s4 + $0x7a0] sm:$0xff]  ;;  %v1068_v22 = vld [vmem:[%s15252_s4 + $0x788] sm:$0xff] }
 0x2d7   :  { %2460 = vmatprep.subr.bf16.mxu0 %v9501_v23  ;;  %2542 = vmatprep.subr.bf16.mxu1 %v9503_v24  ;;  %v1072_v23 = vld [vmem:[%s15252_s4 + $0x7a8] sm:$0xff]  ;;  %v9548_v24 = vcombine.low %v1059_v10, %v1063_v11  ;;  %v9557_v27 = vcombine.high %v1067_v20, %v1071_v21 }
 0x2d8   :  { %v9559_v28 = vcombine.high %v1068_v22, %v1072_v23  ;;  %v9558_v35 = vcombine.low %v1068_v22, %v1072_v23 }
 0x2da   :  { %2461 = vmatpush1.bf16.msra.mxu0 %v9500_v31  ;;  %2543 = vmatpush1.bf16.msra.mxu1 %v9502_v32  ;;  %v1075_v31 = vld [vmem:[%s15252_s4 + $0x7c0] sm:$0xff] }
 0x2db   :  { %2462 = vmatprep.subr.bf16.mxu0 %v9509_v33  ;;  %2544 = vmatprep.subr.bf16.mxu1 %v9511_v34  ;;  %v1079_v32 = vld [vmem:[%s15252_s4 + $0x7e0] sm:$0xff]  ;;  %v1076_v33 = vld [vmem:[%s15252_s4 + $0x7c8] sm:$0xff]  ;;  %v9556_v34 = vcombine.low %v1067_v20, %v1071_v21 }
 0x2dc   :  { %v9565_v38 = vcombine.high %v1075_v31, %v1079_v32  ;;  %v9567_v39 = vcombine.high %v1076_v33, %v1080_v6  ;;  %v9566_v44 = vcombine.low %v1076_v33, %v1080_v6  ;;  %v877_v6 = vld [vmem:[%s15252_s4 + $0x190] sm:$0xff] }
 0x2de   :  { %2463 = vmatpush1.bf16.msra.mxu0 %v9508_v40  ;;  %2545 = vmatpush1.bf16.msra.mxu1 %v9510_v41  ;;  %v829_v40 = vld [vmem:[%s15252_s4 + $0x10] sm:$0xff] }
 0x2df   :  { %2464 = vmatprep.subr.bf16.mxu0 %v9517_v42  ;;  %2546 = vmatprep.subr.bf16.mxu1 %v9519_v43  ;;  %v833_v41 = vld [vmem:[%s15252_s4 + $0x30] sm:$0xff]  ;;  %v830_v42 = vld [vmem:[%s15252_s4 + $0x18] sm:$0xff]  ;;  %v9564_v43 = vcombine.low %v1075_v31, %v1079_v32 }
 0x2e0   :  { %v9321_v49 = vcombine.high %v829_v40, %v833_v41  ;;  %v9323_v50 = vcombine.high %v830_v42, %v834_v12  ;;  %v9320_v55 = vcombine.low %v829_v40, %v833_v41  ;;  %v9322_v57 = vcombine.low %v830_v42, %v834_v12  ;;  %v885_v42 = vld [vmem:[%s15252_s4 + $0x1d0] sm:$0xff] }
 0x2e1   :  { %v889_v12 = vld [vmem:[%s15252_s4 + $0x1f0] sm:$0xff] }
 0x2e2   :  { %2465 = vmatpush1.bf16.msra.mxu0 %v9516_v51  ;;  %2547 = vmatpush1.bf16.msra.mxu1 %v9518_v52  ;;  %v837_v51 = vld [vmem:[%s15252_s4 + $0x50] sm:$0xff] }
 0x2e3   :  { %2466 = vmatprep.subr.bf16.mxu0 %v9525_v53  ;;  %2548 = vmatprep.subr.bf16.mxu1 %v9527_v54  ;;  %v841_v52 = vld [vmem:[%s15252_s4 + $0x70] sm:$0xff]  ;;  %v838_v53 = vld [vmem:[%s15252_s4 + $0x58] sm:$0xff] }
 0x2e4   :  { %v842_v54 = vld [vmem:[%s15252_s4 + $0x78] sm:$0xff]  ;;  %v9329_v58 = vcombine.high %v837_v51, %v841_v52  ;;  %v9328_v0 = vcombine.low %v837_v51, %v841_v52  ;;  %v893_v52 = vld [vmem:[%s15252_s4 + $0x210] sm:$0xff] }
 0x2e5   :  { %v9330_v2 = vcombine.low %v838_v53, %v842_v54 }
 0x2e6   :  { %2467 = vmatpush1.bf16.msra.mxu0 %v9524_v59  ;;  %2549 = vmatpush1.bf16.msra.mxu1 %v9526_v60  ;;  %v9331_v59 = vcombine.high %v838_v53, %v842_v54  ;;  %v845_v60 = vld [vmem:[%s15252_s4 + $0x90] sm:$0xff]  ;;  %v894_v54 = vld [vmem:[%s15252_s4 + $0x218] sm:$0xff] }
 0x2e7   :  { %2468 = vmatprep.subr.bf16.mxu0 %v9533_v61  ;;  %2550 = vmatprep.subr.bf16.mxu1 %v9535_v62  ;;  %v849_v61 = vld [vmem:[%s15252_s4 + $0xb0] sm:$0xff]  ;;  %v846_v62 = vld [vmem:[%s15252_s4 + $0x98] sm:$0xff] }
 0x2e8   :  { %v9337_v3 = vcombine.high %v845_v60, %v849_v61  ;;  %v9336_v10 = vcombine.low %v845_v60, %v849_v61  ;;  %v9338_v11 = vcombine.low %v846_v62, %v850_v63  ;;  %v897_v53 = vld [vmem:[%s15252_s4 + $0x230] sm:$0xff] }
 0x2e9   :  { %v901_v61 = vld [vmem:[%s15252_s4 + $0x250] sm:$0xff] }
 0x2ea   :  { %2469 = vmatpush1.bf16.msra.mxu0 %v9532_v4  ;;  %2551 = vmatpush1.bf16.msra.mxu1 %v9534_v5  ;;  %v9339_v4 = vcombine.high %v846_v62, %v850_v63  ;;  %v853_v5 = vld [vmem:[%s15252_s4 + $0xd0] sm:$0xff]  ;;  %v902_v63 = vld [vmem:[%s15252_s4 + $0x258] sm:$0xff] }
 0x2eb   :  { %2470 = vmatprep.subr.bf16.mxu0 %v9541_v8  ;;  %2552 = vmatprep.subr.bf16.mxu1 %v9543_v9  ;;  %v857_v8 = vld [vmem:[%s15252_s4 + $0xf0] sm:$0xff]  ;;  %v854_v9 = vld [vmem:[%s15252_s4 + $0xd8] sm:$0xff] }
 0x2ec   :  { %v9345_v13 = vcombine.high %v853_v5, %v857_v8  ;;  %v9344_v20 = vcombine.low %v853_v5, %v857_v8  ;;  %v905_v62 = vld [vmem:[%s15252_s4 + $0x270] sm:$0xff] }
 0x2ed   :  { %v909_v8 = vld [vmem:[%s15252_s4 + $0x290] sm:$0xff] }
 0x2ee   :  { %2471 = vmatpush1.bf16.msra.mxu0 %v9540_v15  ;;  %2553 = vmatpush1.bf16.msra.mxu1 %v9542_v16  ;;  %v861_v15 = vld [vmem:[%s15252_s4 + $0x110] sm:$0xff] }
 0x2ef   :  { %2472 = vmatprep.subr.bf16.mxu0 %v9549_v18  ;;  %2554 = vmatprep.subr.bf16.mxu1 %v9551_v19  ;;  %v865_v16 = vld [vmem:[%s15252_s4 + $0x130] sm:$0xff]  ;;  %v862_v18 = vld [vmem:[%s15252_s4 + $0x118] sm:$0xff] }
 0x2f0   :  { %v866_v19 = vld [vmem:[%s15252_s4 + $0x138] sm:$0xff]  ;;  %v9353_v22 = vcombine.high %v861_v15, %v865_v16 }
 0x2f1   :  { %v9355_v23 = vcombine.high %v862_v18, %v866_v19  ;;  %v9354_v31 = vcombine.low %v862_v18, %v866_v19  ;;  %v921_v18 = vld [vmem:[%s15252_s4 + $0x2f0] sm:$0xff]  ;;  %v918_v19 = vld [vmem:[%s15252_s4 + $0x2d8] sm:$0xff] }
 0x2f2   :  { %2473 = vmatpush1.bf16.msra.mxu0 %v9548_v24  ;;  %2555 = vmatpush1.bf16.msra.mxu1 %v9550_v25  ;;  %v869_v24 = vld [vmem:[%s15252_s4 + $0x150] sm:$0xff] }
 0x2f3   :  { %2474 = vmatprep.subr.bf16.mxu0 %v9557_v27  ;;  %2556 = vmatprep.subr.bf16.mxu1 %v9559_v28  ;;  %v873_v25 = vld [vmem:[%s15252_s4 + $0x170] sm:$0xff]  ;;  %v874_v27 = vld [vmem:[%s15252_s4 + $0x178] sm:$0xff]  ;;  %v9352_v28 = vcombine.low %v861_v15, %v865_v16 }
 0x2f4   :  { %v9361_v32 = vcombine.high %v869_v24, %v873_v25  ;;  %v9363_v33 = vcombine.high %v870_v26, %v874_v27  ;;  %v917_v16 = vld [vmem:[%s15252_s4 + $0x2d0] sm:$0xff] }
 0x2f6   :  { %2475 = vmatpush1.bf16.msra.mxu0 %v9556_v34  ;;  %2557 = vmatpush1.bf16.msra.mxu1 %v9558_v35  ;;  %v881_v34 = vld [vmem:[%s15252_s4 + $0x1b0] sm:$0xff]  ;;  %v878_v35 = vld [vmem:[%s15252_s4 + $0x198] sm:$0xff] }
 0x2f7   :  { %2476 = vmatprep.subr.bf16.mxu0 %v9565_v38  ;;  %2558 = vmatprep.subr.bf16.mxu1 %v9567_v39  ;;  %v9360_v38 = vcombine.low %v869_v24, %v873_v25  ;;  %v9362_v39 = vcombine.low %v870_v26, %v874_v27  ;;  %v9369_v40 = vcombine.high %v877_v6, %v881_v34  ;;  %v925_v25 = vld [vmem:[%s15252_s4 + $0x310] sm:$0xff]  ;;  %v926_v27 = vld [vmem:[%s15252_s4 + $0x318] sm:$0xff] }
 0x2f8   :  { %v9371_v41 = vcombine.high %v878_v35, %v882_v36  ;;  %v9368_v47 = vcombine.low %v877_v6, %v881_v34  ;;  %v929_v26 = vld [vmem:[%s15252_s4 + $0x330] sm:$0xff] }
 0x2f9   :  { %v933_v34 = vld [vmem:[%s15252_s4 + $0x350] sm:$0xff] }
 0x2fa   :  { %2477 = vmatpush1.bf16.msra.mxu0 %v9564_v43  ;;  %2559 = vmatpush1.bf16.msra.mxu1 %v9566_v44  ;;  %v886_v43 = vld [vmem:[%s15252_s4 + $0x1d8] sm:$0xff] }
 0x2fb   :  { %2569 = vmatprep.subr.bf16.mxu0 %v9321_v49  ;;  %2651 = vmatprep.subr.bf16.mxu1 %v9323_v50  ;;  %v890_v44 = vld [vmem:[%s15252_s4 + $0x1f8] sm:$0xff]  ;;  %v9370_v49 = vcombine.low %v878_v35, %v882_v36  ;;  %v9377_v50 = vcombine.high %v885_v42, %v889_v12  ;;  %v937_v35 = vld [vmem:[%s15252_s4 + $0x370] sm:$0xff] }
 0x2fc   :  { %v9379_v51 = vcombine.high %v886_v43, %v890_v44  ;;  %v934_v36 = vld [vmem:[%s15252_s4 + $0x358] sm:$0xff] }
 0x2fd   :  { %2479 = vmatmul.mubr.bf16.vlgmr.msra.gmra.mrb[4].mxu0 %v12129_v56  ;;  %2561 = vmatmul.mubr.bf16.vlgmr.msra.gmra.mrb[12].mxu1 %v12129_v56 }
 0x2fe   :  { %2570 = vmatpush1.bf16.msra.mxu0 %v9320_v55  ;;  %2601 = vmatprep.mubr.bf16.mxu0 %v11919_v29  ;;  %v898_v55 = vld [vmem:[%s15252_s4 + $0x238] sm:$0xff] }
 0x2ff   :  { %2652 = vmatpush1.bf16.msra.mxu1 %v9322_v57  ;;  %2683 = vmatprep.mubr.bf16.mxu1 %v11919_v29  ;;  %v858_v29 = vld [vmem:[%s15252_s4 + $0xf8] sm:$0xff]  ;;  %v9376_v57 = vcombine.low %v885_v42, %v889_v12  ;;  %v9387_v60 = vcombine.high %v894_v54, %v898_v55  ;;  %v941_v12 = vld [vmem:[%s15252_s4 + $0x390] sm:$0xff] }
 0x300   :  { %2571 = vmatprep.subr.bf16.mxu0 %v9329_v58  ;;  %2653 = vmatprep.subr.bf16.mxu1 %v9331_v59  ;;  %v9347_v14 = vcombine.high %v854_v9, %v858_v29  ;;  %v9346_v21 = vcombine.low %v854_v9, %v858_v29  ;;  %v9378_v58 = vcombine.low %v886_v43, %v890_v44  ;;  %v913_v9 = vld [vmem:[%s15252_s4 + $0x2b0] sm:$0xff]  ;;  %v910_v29 = vld [vmem:[%s15252_s4 + $0x298] sm:$0xff] }
 0x301   :  { %v9385_v59 = vcombine.high %v893_v52, %v897_v53  ;;  %v945_v43 = vld [vmem:[%s15252_s4 + $0x3b0] sm:$0xff]  ;;  %v942_v44 = vld [vmem:[%s15252_s4 + $0x398] sm:$0xff] }
 0x302   :  { %2572 = vmatpush1.bf16.msra.mxu0 %v9328_v0  ;;  %v906_v0 = vld [vmem:[%s15252_s4 + $0x278] sm:$0xff] }
 0x303   :  { %2654 = vmatpush1.bf16.msra.mxu1 %v9330_v2  ;;  %2573 = vmatprep.subr.bf16.mxu0 %v9337_v3  ;;  %v9384_v2 = vcombine.low %v893_v52, %v897_v53  ;;  %v9386_v3 = vcombine.low %v894_v54, %v898_v55  ;;  %v9395_v5 = vcombine.high %v902_v63, %v906_v0  ;;  %v949_v53 = vld [vmem:[%s15252_s4 + $0x3d0] sm:$0xff]  ;;  %v950_v55 = vld [vmem:[%s15252_s4 + $0x3d8] sm:$0xff] }
 0x304   :  { %2655 = vmatprep.subr.bf16.mxu1 %v9339_v4  ;;  %v9393_v4 = vcombine.high %v901_v61, %v905_v62  ;;  %v953_v54 = vld [vmem:[%s15252_s4 + $0x3f0] sm:$0xff] }
 0x306   :  { %2574 = vmatpush1.bf16.msra.mxu0 %v9336_v10  ;;  %v914_v10 = vld [vmem:[%s15252_s4 + $0x2b8] sm:$0xff] }
 0x307   :  { %2656 = vmatpush1.bf16.msra.mxu1 %v9338_v11  ;;  %2575 = vmatprep.subr.bf16.mxu0 %v9345_v13  ;;  %v9392_v11 = vcombine.low %v901_v61, %v905_v62  ;;  %v9394_v13 = vcombine.low %v902_v63, %v906_v0  ;;  %v9403_v15 = vcombine.high %v910_v29, %v914_v10  ;;  %v957_v62 = vld [vmem:[%s15252_s4 + $0x410] sm:$0xff]  ;;  %v958_v0 = vld [vmem:[%s15252_s4 + $0x418] sm:$0xff] }
 0x308   :  { %2657 = vmatprep.subr.bf16.mxu1 %v9347_v14  ;;  %v9401_v14 = vcombine.high %v909_v8, %v913_v9  ;;  %v961_v63 = vld [vmem:[%s15252_s4 + $0x430] sm:$0xff] }
 0x30a   :  { %2576 = vmatpush1.bf16.msra.mxu0 %v9344_v20  ;;  %v922_v20 = vld [vmem:[%s15252_s4 + $0x2f8] sm:$0xff] }
 0x30b   :  { %2658 = vmatpush1.bf16.msra.mxu1 %v9346_v21  ;;  %2577 = vmatprep.subr.bf16.mxu0 %v9353_v22  ;;  %v9400_v21 = vcombine.low %v909_v8, %v913_v9  ;;  %v9402_v22 = vcombine.low %v910_v29, %v914_v10  ;;  %v9411_v24 = vcombine.high %v918_v19, %v922_v20  ;;  %v965_v9 = vld [vmem:[%s15252_s4 + $0x450] sm:$0xff] }
 0x30c   :  { %2659 = vmatprep.subr.bf16.mxu1 %v9355_v23  ;;  %v9409_v23 = vcombine.high %v917_v16, %v921_v18  ;;  %v969_v29 = vld [vmem:[%s15252_s4 + $0x470] sm:$0xff]  ;;  %v9448_v10 = vcombine.low %v957_v62, %v961_v63 }
 0x30e   :  { %2578 = vmatpush1.bf16.msra.mxu0 %v9352_v28  ;;  %v930_v28 = vld [vmem:[%s15252_s4 + $0x338] sm:$0xff] }
 0x30f   :  { %2660 = vmatpush1.bf16.msra.mxu1 %v9354_v31  ;;  %2579 = vmatprep.subr.bf16.mxu0 %v9361_v32  ;;  %v9408_v31 = vcombine.low %v917_v16, %v921_v18  ;;  %v9410_v32 = vcombine.low %v918_v19, %v922_v20  ;;  %v9419_v6 = vcombine.high %v926_v27, %v930_v28  ;;  %v973_v16 = vld [vmem:[%s15252_s4 + $0x490] sm:$0xff]  ;;  %v974_v20 = vld [vmem:[%s15252_s4 + $0x498] sm:$0xff] }
 0x310   :  { %2661 = vmatprep.subr.bf16.mxu1 %v9363_v33  ;;  %v9417_v33 = vcombine.high %v925_v25, %v929_v26  ;;  %v977_v18 = vld [vmem:[%s15252_s4 + $0x4b0] sm:$0xff] }
 0x312   :  { %2580 = vmatpush1.bf16.msra.mxu0 %v9360_v38  ;;  %v938_v38 = vld [vmem:[%s15252_s4 + $0x378] sm:$0xff] }
 0x313   :  { %2662 = vmatpush1.bf16.msra.mxu1 %v9362_v39  ;;  %2581 = vmatprep.subr.bf16.mxu0 %v9369_v40  ;;  %v9416_v39 = vcombine.low %v925_v25, %v929_v26  ;;  %v9418_v40 = vcombine.low %v926_v27, %v930_v28  ;;  %v9427_v42 = vcombine.high %v934_v36, %v938_v38  ;;  %v981_v26 = vld [vmem:[%s15252_s4 + $0x4d0] sm:$0xff]  ;;  %v986_v28 = vld [vmem:[%s15252_s4 + $0x4f8] sm:$0xff] }
 0x314   :  { %2663 = vmatprep.subr.bf16.mxu1 %v9371_v41  ;;  %v9425_v41 = vcombine.high %v933_v34, %v937_v35  ;;  %v985_v27 = vld [vmem:[%s15252_s4 + $0x4f0] sm:$0xff] }
 0x316   :  { %2582 = vmatpush1.bf16.msra.mxu0 %v9368_v47  ;;  %v946_v47 = vld [vmem:[%s15252_s4 + $0x3b8] sm:$0xff] }
 0x317   :  { %2664 = vmatpush1.bf16.msra.mxu1 %v9370_v49  ;;  %2583 = vmatprep.subr.bf16.mxu0 %v9377_v50  ;;  %v9424_v49 = vcombine.low %v933_v34, %v937_v35  ;;  %v9426_v50 = vcombine.low %v934_v36, %v938_v38  ;;  %v9435_v52 = vcombine.high %v942_v44, %v946_v47  ;;  %v993_v34 = vld [vmem:[%s15252_s4 + $0x530] sm:$0xff]  ;;  %v990_v35 = vld [vmem:[%s15252_s4 + $0x518] sm:$0xff] }
 0x318   :  { %2665 = vmatprep.subr.bf16.mxu1 %v9379_v51  ;;  %v9433_v51 = vcombine.high %v941_v12, %v945_v43  ;;  %v994_v36 = vld [vmem:[%s15252_s4 + $0x538] sm:$0xff]  ;;  %v9472_v38 = vcombine.low %v981_v26, %v985_v27 }
 0x31a   :  { %2584 = vmatpush1.bf16.msra.mxu0 %v9376_v57  ;;  %v954_v57 = vld [vmem:[%s15252_s4 + $0x3f8] sm:$0xff] }
 0x31b   :  { %2666 = vmatpush1.bf16.msra.mxu1 %v9378_v58  ;;  %2585 = vmatprep.subr.bf16.mxu0 %v9385_v59  ;;  %v9432_v58 = vcombine.low %v941_v12, %v945_v43  ;;  %v9434_v59 = vcombine.low %v942_v44, %v946_v47  ;;  %v9443_v61 = vcombine.high %v950_v55, %v954_v57  ;;  %v1001_v12 = vld [vmem:[%s15252_s4 + $0x570] sm:$0xff]  ;;  %v998_v43 = vld [vmem:[%s15252_s4 + $0x558] sm:$0xff] }
 0x31c   :  { %2667 = vmatprep.subr.bf16.mxu1 %v9387_v60  ;;  %v9441_v60 = vcombine.high %v949_v53, %v953_v54  ;;  %v1002_v44 = vld [vmem:[%s15252_s4 + $0x578] sm:$0xff] }
 0x31e   :  { %2586 = vmatpush1.bf16.msra.mxu0 %v9384_v2  ;;  %v962_v2 = vld [vmem:[%s15252_s4 + $0x438] sm:$0xff] }
 0x31f   :  { %2668 = vmatpush1.bf16.msra.mxu1 %v9386_v3  ;;  %2587 = vmatprep.subr.bf16.mxu0 %v9393_v4  ;;  %v9440_v3 = vcombine.low %v949_v53, %v953_v54  ;;  %v9442_v4 = vcombine.low %v950_v55, %v954_v57  ;;  %v9451_v8 = vcombine.high %v958_v0, %v962_v2  ;;  %v1009_v53 = vld [vmem:[%s15252_s4 + $0x5b0] sm:$0xff]  ;;  %v1006_v54 = vld [vmem:[%s15252_s4 + $0x598] sm:$0xff] }
 0x320   :  { %2669 = vmatprep.subr.bf16.mxu1 %v9395_v5  ;;  %v9449_v5 = vcombine.high %v957_v62, %v961_v63  ;;  %v1010_v55 = vld [vmem:[%s15252_s4 + $0x5b8] sm:$0xff]  ;;  %v1017_v62 = vld [vmem:[%s15252_s4 + $0x5f0] sm:$0xff] }
 0x321   :  { %v1014_v63 = vld [vmem:[%s15252_s4 + $0x5d8] sm:$0xff] }
 0x322   :  { %2588 = vmatpush1.bf16.msra.mxu0 %v9392_v11  ;;  %v966_v11 = vld [vmem:[%s15252_s4 + $0x458] sm:$0xff] }
 0x323   :  { %2670 = vmatpush1.bf16.msra.mxu1 %v9394_v13  ;;  %2589 = vmatprep.subr.bf16.mxu0 %v9401_v14  ;;  %v970_v13 = vld [vmem:[%s15252_s4 + $0x478] sm:$0xff]  ;;  %v9450_v14 = vcombine.low %v958_v0, %v962_v2 }
 0x324   :  { %2671 = vmatprep.subr.bf16.mxu1 %v9403_v15  ;;  %v9457_v15 = vcombine.high %v965_v9, %v969_v29  ;;  %v9459_v19 = vcombine.high %v966_v11, %v970_v13  ;;  %v1018_v0 = vld [vmem:[%s15252_s4 + $0x5f8] sm:$0xff] }
 0x326   :  { %2590 = vmatpush1.bf16.msra.mxu0 %v9400_v21  ;;  %v978_v21 = vld [vmem:[%s15252_s4 + $0x4b8] sm:$0xff] }
 0x327   :  { %2672 = vmatpush1.bf16.msra.mxu1 %v9402_v22  ;;  %2591 = vmatprep.subr.bf16.mxu0 %v9409_v23  ;;  %v9456_v22 = vcombine.low %v965_v9, %v969_v29  ;;  %v9458_v23 = vcombine.low %v966_v11, %v970_v13  ;;  %v9467_v25 = vcombine.high %v974_v20, %v978_v21  ;;  %v1025_v9 = vld [vmem:[%s15252_s4 + $0x630] sm:$0xff]  ;;  %v1022_v29 = vld [vmem:[%s15252_s4 + $0x618] sm:$0xff] }
 0x328   :  { %2673 = vmatprep.subr.bf16.mxu1 %v9411_v24  ;;  %v9465_v24 = vcombine.high %v973_v16, %v977_v18  ;;  %v9506_v13 = vcombine.low %v1014_v63, %v1018_v0 }
 0x32a   :  { %2592 = vmatpush1.bf16.msra.mxu0 %v9408_v31  ;;  %v9466_v31 = vcombine.low %v974_v20, %v978_v21  ;;  %v1034_v20 = vld [vmem:[%s15252_s4 + $0x678] sm:$0xff] }
 0x32b   :  { %2674 = vmatpush1.bf16.msra.mxu1 %v9410_v32  ;;  %2593 = vmatprep.subr.bf16.mxu0 %v9417_v33  ;;  %v9473_v32 = vcombine.high %v981_v26, %v985_v27  ;;  %v1041_v26 = vld [vmem:[%s15252_s4 + $0x6b0] sm:$0xff]  ;;  %v1038_v27 = vld [vmem:[%s15252_s4 + $0x698] sm:$0xff] }
 0x32c   :  { %2675 = vmatprep.subr.bf16.mxu1 %v9419_v6  ;;  %v989_v6 = vld [vmem:[%s15252_s4 + $0x510] sm:$0xff] }
 0x32d   :  { %v9480_v47 = vcombine.low %v989_v6, %v993_v34 }
 0x32e   :  { %2594 = vmatpush1.bf16.msra.mxu0 %v9416_v39 }
 0x32f   :  { %2676 = vmatpush1.bf16.msra.mxu1 %v9418_v40  ;;  %2595 = vmatprep.subr.bf16.mxu0 %v9425_v41  ;;  %v9481_v40 = vcombine.high %v989_v6, %v993_v34  ;;  %v9483_v41 = vcombine.high %v990_v35, %v994_v36  ;;  %v1049_v6 = vld [vmem:[%s15252_s4 + $0x6f0] sm:$0xff]  ;;  %v1046_v34 = vld [vmem:[%s15252_s4 + $0x6d8] sm:$0xff] }
 0x330   :  { %2677 = vmatprep.subr.bf16.mxu1 %v9427_v42  ;;  %v997_v42 = vld [vmem:[%s15252_s4 + $0x550] sm:$0xff] }
 0x331   :  { %v9488_v57 = vcombine.low %v997_v42, %v1001_v12 }
 0x332   :  { %2596 = vmatpush1.bf16.msra.mxu0 %v9424_v49  ;;  %v9482_v49 = vcombine.low %v990_v35, %v994_v36  ;;  %v1050_v35 = vld [vmem:[%s15252_s4 + $0x6f8] sm:$0xff] }
 0x333   :  { %2678 = vmatpush1.bf16.msra.mxu1 %v9426_v50  ;;  %2597 = vmatprep.subr.bf16.mxu0 %v9433_v51  ;;  %v9489_v50 = vcombine.high %v997_v42, %v1001_v12  ;;  %v9491_v51 = vcombine.high %v998_v43, %v1002_v44  ;;  %v1057_v42 = vld [vmem:[%s15252_s4 + $0x730] sm:$0xff]  ;;  %v1054_v12 = vld [vmem:[%s15252_s4 + $0x718] sm:$0xff] }
 0x334   :  { %2679 = vmatprep.subr.bf16.mxu1 %v9435_v52  ;;  %v1005_v52 = vld [vmem:[%s15252_s4 + $0x590] sm:$0xff] }
 0x335   :  { %v9496_v2 = vcombine.low %v1005_v52, %v1009_v53 }
 0x336   :  { %2598 = vmatpush1.bf16.msra.mxu0 %v9432_v58  ;;  %v9490_v58 = vcombine.low %v998_v43, %v1002_v44  ;;  %v1058_v43 = vld [vmem:[%s15252_s4 + $0x738] sm:$0xff] }
 0x337   :  { %2680 = vmatpush1.bf16.msra.mxu1 %v9434_v59  ;;  %2599 = vmatprep.subr.bf16.mxu0 %v9441_v60  ;;  %v9497_v59 = vcombine.high %v1005_v52, %v1009_v53  ;;  %v9499_v60 = vcombine.high %v1006_v54, %v1010_v55  ;;  %v1065_v52 = vld [vmem:[%s15252_s4 + $0x770] sm:$0xff]  ;;  %v1062_v53 = vld [vmem:[%s15252_s4 + $0x758] sm:$0xff] }
 0x338   :  { %2681 = vmatprep.subr.bf16.mxu1 %v9443_v61  ;;  %v1013_v61 = vld [vmem:[%s15252_s4 + $0x5d0] sm:$0xff] }
 0x339   :  { %v9504_v11 = vcombine.low %v1013_v61, %v1017_v62 }
 0x33a   :  { %2600 = vmatpush1.bf16.msra.mxu0 %v9440_v3  ;;  %v9498_v3 = vcombine.low %v1006_v54, %v1010_v55  ;;  %v1066_v54 = vld [vmem:[%s15252_s4 + $0x778] sm:$0xff] }
 0x33b   :  { %2682 = vmatpush1.bf16.msra.mxu1 %v9442_v4  ;;  %2610 = vmatprep.subr.bf16.mxu0 %v9449_v5  ;;  %v9505_v4 = vcombine.high %v1013_v61, %v1017_v62  ;;  %v9507_v5 = vcombine.high %v1014_v63, %v1018_v0  ;;  %v1073_v61 = vld [vmem:[%s15252_s4 + $0x7b0] sm:$0xff]  ;;  %v1070_v62 = vld [vmem:[%s15252_s4 + $0x798] sm:$0xff] }
 0x33c   :  { %2692 = vmatprep.subr.bf16.mxu1 %v9451_v8  ;;  %v1021_v8 = vld [vmem:[%s15252_s4 + $0x610] sm:$0xff]  ;;  %v1074_v63 = vld [vmem:[%s15252_s4 + $0x7b8] sm:$0xff] }
 0x33d   :  { %2602 = vmatmul.mubr.bf16.vlgmr.msra.gmra.mrb[8].mxu0 %v11921_v30  ;;  %v9512_v21 = vcombine.low %v1021_v8, %v1025_v9 }
 0x33e   :  { %2684 = vmatmul.mubr.bf16.vlgmr.msra.gmra.mrb[16].mxu1 %v11921_v30  ;;  %2611 = vmatpush1.bf16.msra.mxu0 %v9448_v10  ;;  %v982_v30 = vld [vmem:[%s15252_s4 + $0x4d8] sm:$0xff] }
 0x33f   :  { %2642 = vmatprep.mubr.bf16.mxu0 %v11937_v37  ;;  %2693 = vmatpush1.bf16.msra.mxu1 %v9450_v14  ;;  %v9475_v33 = vcombine.high %v982_v30, %v986_v28  ;;  %v9474_v39 = vcombine.low %v982_v30, %v986_v28  ;;  %v1026_v10 = vld [vmem:[%s15252_s4 + $0x638] sm:$0xff]  ;;  %v9513_v14 = vcombine.high %v1021_v8, %v1025_v9  ;;  %v1081_v8 = vld [vmem:[%s15252_s4 + $0x7f0] sm:$0xff] }
 0x340   :  { %2724 = vmatprep.mubr.bf16.mxu1 %v11937_v37  ;;  %2612 = vmatprep.subr.bf16.mxu0 %v9457_v15  ;;  %v9464_v37 = vcombine.low %v973_v16, %v977_v18  ;;  %v9515_v15 = vcombine.high %v1022_v29, %v1026_v10  ;;  %v1029_v16 = vld [vmem:[%s15252_s4 + $0x650] sm:$0xff]  ;;  %v1042_v30 = vld [vmem:[%s15252_s4 + $0x6b8] sm:$0xff] }
 0x341   :  { %2694 = vmatprep.subr.bf16.mxu1 %v9459_v19  ;;  %v1033_v18 = vld [vmem:[%s15252_s4 + $0x670] sm:$0xff]  ;;  %v1030_v19 = vld [vmem:[%s15252_s4 + $0x658] sm:$0xff] }
 0x342   :  { %2613 = vmatpush1.bf16.msra.mxu0 %v9456_v22  ;;  %v9514_v22 = vcombine.low %v1022_v29, %v1026_v10  ;;  %v9520_v28 = vcombine.low %v1029_v16, %v1033_v18  ;;  %v1078_v9 = vld [vmem:[%s15252_s4 + $0x7d8] sm:$0xff] }
 0x343   :  { %2695 = vmatpush1.bf16.msra.mxu1 %v9458_v23  ;;  %2614 = vmatprep.subr.bf16.mxu0 %v9465_v24  ;;  %v9521_v23 = vcombine.high %v1029_v16, %v1033_v18  ;;  %v9523_v24 = vcombine.high %v1030_v19, %v1034_v20  ;;  %v1082_v29 = vld [vmem:[%s15252_s4 + $0x7f8] sm:$0xff]  ;;  %v2753_v16 = vld [vmem:[%s15253_s5 + $0x20] sm:$0xff]  ;;  %v2750_v18 = vld [vmem:[%s15253_s5 + $0x8] sm:$0xff] }
 0x344   :  { %2696 = vmatprep.subr.bf16.mxu1 %v9467_v25  ;;  %v1037_v25 = vld [vmem:[%s15252_s4 + $0x690] sm:$0xff] }
 0x345   :  { %v9528_v36 = vcombine.low %v1037_v25, %v1041_v26 }
 0x346   :  { %2615 = vmatpush1.bf16.msra.mxu0 %v9464_v37  ;;  %v9522_v37 = vcombine.low %v1030_v19, %v1034_v20  ;;  %v2754_v19 = vld [vmem:[%s15253_s5 + $0x28] sm:$0xff] }
 0x347   :  { %2697 = vmatpush1.bf16.msra.mxu1 %v9466_v31  ;;  %2616 = vmatprep.subr.bf16.mxu0 %v9473_v32  ;;  %v9529_v31 = vcombine.high %v1037_v25, %v1041_v26  ;;  %v9531_v32 = vcombine.high %v1038_v27, %v1042_v30  ;;  %v2761_v25 = vld [vmem:[%s15253_s5 + $0x60] sm:$0xff]  ;;  %v2758_v26 = vld [vmem:[%s15253_s5 + $0x48] sm:$0xff] }
 0x348   :  { %2698 = vmatprep.subr.bf16.mxu1 %v9475_v33  ;;  %v1045_v33 = vld [vmem:[%s15252_s4 + $0x6d0] sm:$0xff] }
 0x349   :  { %v9536_v44 = vcombine.low %v1045_v33, %v1049_v6 }
 0x34a   :  { %2617 = vmatpush1.bf16.msra.mxu0 %v9472_v38  ;;  %v9530_v38 = vcombine.low %v1038_v27, %v1042_v30  ;;  %v2762_v27 = vld [vmem:[%s15253_s5 + $0x68] sm:$0xff] }
 0x34b   :  { %2699 = vmatpush1.bf16.msra.mxu1 %v9474_v39  ;;  %2618 = vmatprep.subr.bf16.mxu0 %v9481_v40  ;;  %v9537_v39 = vcombine.high %v1045_v33, %v1049_v6  ;;  %v9539_v40 = vcombine.high %v1046_v34, %v1050_v35  ;;  %v2769_v33 = vld [vmem:[%s15253_s5 + $0xa0] sm:$0xff]  ;;  %v2766_v6 = vld [vmem:[%s15253_s5 + $0x88] sm:$0xff] }
 0x34c   :  { %2700 = vmatprep.subr.bf16.mxu1 %v9483_v41  ;;  %v1053_v41 = vld [vmem:[%s15252_s4 + $0x710] sm:$0xff] }
 0x34d   :  { %v9544_v55 = vcombine.low %v1053_v41, %v1057_v42 }
 0x34e   :  { %2619 = vmatpush1.bf16.msra.mxu0 %v9480_v47  ;;  %v9538_v47 = vcombine.low %v1046_v34, %v1050_v35  ;;  %v2770_v34 = vld [vmem:[%s15253_s5 + $0xa8] sm:$0xff] }
 0x34f   :  { %2701 = vmatpush1.bf16.msra.mxu1 %v9482_v49  ;;  %2620 = vmatprep.subr.bf16.mxu0 %v9489_v50  ;;  %v9545_v49 = vcombine.high %v1053_v41, %v1057_v42  ;;  %v9547_v50 = vcombine.high %v1054_v12, %v1058_v43  ;;  %v2777_v41 = vld [vmem:[%s15253_s5 + $0xe0] sm:$0xff]  ;;  %v2778_v42 = vld [vmem:[%s15253_s5 + $0xe8] sm:$0xff] }
 0x350   :  { %2702 = vmatprep.subr.bf16.mxu1 %v9491_v51  ;;  %v1061_v51 = vld [vmem:[%s15252_s4 + $0x750] sm:$0xff] }
 0x351   :  { %v9552_v0 = vcombine.low %v1061_v51, %v1065_v52 }
 0x352   :  { %2621 = vmatpush1.bf16.msra.mxu0 %v9488_v57  ;;  %v9546_v57 = vcombine.low %v1054_v12, %v1058_v43  ;;  %v9590_v43 = vcombine.low %v2766_v6, %v2770_v34 }
 0x353   :  { %2703 = vmatpush1.bf16.msra.mxu1 %v9490_v58  ;;  %2622 = vmatprep.subr.bf16.mxu0 %v9497_v59  ;;  %v9553_v58 = vcombine.high %v1061_v51, %v1065_v52  ;;  %v9555_v59 = vcombine.high %v1062_v53, %v1066_v54  ;;  %v2782_v51 = vld [vmem:[%s15253_s5 + $0x108] sm:$0xff] }
 0x354   :  { %2704 = vmatprep.subr.bf16.mxu1 %v9499_v60  ;;  %v1069_v60 = vld [vmem:[%s15252_s4 + $0x790] sm:$0xff]  ;;  %v2786_v52 = vld [vmem:[%s15253_s5 + $0x128] sm:$0xff] }
 0x355   :  { %v9560_v10 = vcombine.low %v1069_v60, %v1073_v61 }
 0x356   :  { %2623 = vmatpush1.bf16.msra.mxu0 %v9496_v2  ;;  %v9554_v2 = vcombine.low %v1062_v53, %v1066_v54 }
 0x357   :  { %2705 = vmatpush1.bf16.msra.mxu1 %v9498_v3  ;;  %2624 = vmatprep.subr.bf16.mxu0 %v9505_v4  ;;  %v9561_v3 = vcombine.high %v1069_v60, %v1073_v61  ;;  %v9563_v4 = vcombine.high %v1070_v62, %v1074_v63  ;;  %v2790_v60 = vld [vmem:[%s15253_s5 + $0x148] sm:$0xff] }
 0x358   :  { %2706 = vmatprep.subr.bf16.mxu1 %v9507_v5  ;;  %v1077_v5 = vld [vmem:[%s15252_s4 + $0x7d0] sm:$0xff]  ;;  %v2794_v61 = vld [vmem:[%s15253_s5 + $0x168] sm:$0xff] }
 0x359   :  { %v9568_v20 = vcombine.low %v1077_v5, %v1081_v8 }
 0x35a   :  { %2625 = vmatpush1.bf16.msra.mxu0 %v9504_v11  ;;  %v9562_v11 = vcombine.low %v1070_v62, %v1074_v63  ;;  %v9606_v63 = vcombine.low %v2782_v51, %v2786_v52 }
 0x35b   :  { %2707 = vmatpush1.bf16.msra.mxu1 %v9506_v13  ;;  %2626 = vmatprep.subr.bf16.mxu0 %v9513_v14  ;;  %v9569_v13 = vcombine.high %v1077_v5, %v1081_v8  ;;  %v9571_v14 = vcombine.high %v1078_v9, %v1082_v29  ;;  %v2798_v5 = vld [vmem:[%s15253_s5 + $0x188] sm:$0xff] }
 0x35c   :  { %2708 = vmatprep.subr.bf16.mxu1 %v9515_v15  ;;  %v2749_v15 = vld [vmem:[%s15253_s5] sm:$0xff]  ;;  %v2802_v8 = vld [vmem:[%s15253_s5 + $0x1a8] sm:$0xff] }
 0x35d   :  { %v9572_v30 = vcombine.low %v2749_v15, %v2753_v16 }
 0x35e   :  { %2627 = vmatpush1.bf16.msra.mxu0 %v9512_v21  ;;  %v9570_v21 = vcombine.low %v1078_v9, %v1082_v29  ;;  %v9614_v29 = vcombine.low %v2790_v60, %v2794_v61 }
 0x35f   :  { %2709 = vmatpush1.bf16.msra.mxu1 %v9514_v22  ;;  %2628 = vmatprep.subr.bf16.mxu0 %v9521_v23  ;;  %v9573_v22 = vcombine.high %v2749_v15, %v2753_v16  ;;  %v9575_v23 = vcombine.high %v2750_v18, %v2754_v19  ;;  %v2806_v15 = vld [vmem:[%s15253_s5 + $0x1c8] sm:$0xff] }
 0x360   :  { %2710 = vmatprep.subr.bf16.mxu1 %v9523_v24  ;;  %v2757_v24 = vld [vmem:[%s15253_s5 + $0x40] sm:$0xff]  ;;  %v2810_v16 = vld [vmem:[%s15253_s5 + $0x1e8] sm:$0xff] }
 0x361   :  { %v9580_v35 = vcombine.low %v2757_v24, %v2761_v25 }
 0x362   :  { %2629 = vmatpush1.bf16.msra.mxu0 %v9520_v28  ;;  %v9574_v28 = vcombine.low %v2750_v18, %v2754_v19  ;;  %v9622_v19 = vcombine.low %v2798_v5, %v2802_v8 }
 0x363   :  { %2711 = vmatpush1.bf16.msra.mxu1 %v9522_v37  ;;  %2630 = vmatprep.subr.bf16.mxu0 %v9529_v31  ;;  %v9581_v37 = vcombine.high %v2757_v24, %v2761_v25  ;;  %v9583_v31 = vcombine.high %v2758_v26, %v2762_v27  ;;  %v2814_v24 = vld [vmem:[%s15253_s5 + $0x208] sm:$0xff] }
 0x364   :  { %2712 = vmatprep.subr.bf16.mxu1 %v9531_v32  ;;  %v2765_v32 = vld [vmem:[%s15253_s5 + $0x80] sm:$0xff]  ;;  %v2818_v25 = vld [vmem:[%s15253_s5 + $0x228] sm:$0xff] }
 0x365   :  { %v9588_v12 = vcombine.low %v2765_v32, %v2769_v33 }
 0x366   :  { %2631 = vmatpush1.bf16.msra.mxu0 %v9528_v36  ;;  %v9582_v36 = vcombine.low %v2758_v26, %v2762_v27  ;;  %v9630_v27 = vcombine.low %v2806_v15, %v2810_v16 }
 0x367   :  { %2713 = vmatpush1.bf16.msra.mxu1 %v9530_v38  ;;  %2632 = vmatprep.subr.bf16.mxu0 %v9537_v39  ;;  %v9589_v38 = vcombine.high %v2765_v32, %v2769_v33  ;;  %v9591_v39 = vcombine.high %v2766_v6, %v2770_v34  ;;  %v2822_v32 = vld [vmem:[%s15253_s5 + $0x248] sm:$0xff]  ;;  %v9638_v34 = vcombine.low %v2814_v24, %v2818_v25 }
 0x368   :  { %2714 = vmatprep.subr.bf16.mxu1 %v9539_v40  ;;  %v2773_v40 = vld [vmem:[%s15253_s5 + $0xc0] sm:$0xff]  ;;  %v2826_v33 = vld [vmem:[%s15253_s5 + $0x268] sm:$0xff] }
 0x369   :  { %v9596_v53 = vcombine.low %v2773_v40, %v2777_v41 }
 0x36a   :  { %2633 = vmatpush1.bf16.msra.mxu0 %v9536_v44  ;;  %v9597_v44 = vcombine.high %v2773_v40, %v2777_v41  ;;  %v2830_v40 = vld [vmem:[%s15253_s5 + $0x288] sm:$0xff] }
 0x36b   :  { %2715 = vmatpush1.bf16.msra.mxu1 %v9538_v47  ;;  %2634 = vmatprep.subr.bf16.mxu0 %v9545_v49  ;;  %v2781_v49 = vld [vmem:[%s15253_s5 + $0x100] sm:$0xff]  ;;  %v2834_v41 = vld [vmem:[%s15253_s5 + $0x2a8] sm:$0xff] }
 0x36c   :  { %2716 = vmatprep.subr.bf16.mxu1 %v9547_v50  ;;  %v2785_v50 = vld [vmem:[%s15253_s5 + $0x120] sm:$0xff] }
 0x36d   :  { %v9604_v62 = vcombine.low %v2781_v49, %v2785_v50 }
 0x36e   :  { %2635 = vmatpush1.bf16.msra.mxu0 %v9544_v55  ;;  %v9605_v55 = vcombine.high %v2781_v49, %v2785_v50  ;;  %v2838_v49 = vld [vmem:[%s15253_s5 + $0x2c8] sm:$0xff] }
 0x36f   :  { %2717 = vmatpush1.bf16.msra.mxu1 %v9546_v57  ;;  %2636 = vmatprep.subr.bf16.mxu0 %v9553_v58  ;;  %v9607_v57 = vcombine.high %v2782_v51, %v2786_v52  ;;  %v2789_v58 = vld [vmem:[%s15253_s5 + $0x140] sm:$0xff]  ;;  %v2842_v50 = vld [vmem:[%s15253_s5 + $0x2e8] sm:$0xff]  ;;  %v9654_v52 = vcombine.low %v2830_v40, %v2834_v41 }
 0x370   :  { %2718 = vmatprep.subr.bf16.mxu1 %v9555_v59  ;;  %v2793_v59 = vld [vmem:[%s15253_s5 + $0x160] sm:$0xff] }
 0x371   :  { %v9612_v9 = vcombine.low %v2789_v58, %v2793_v59 }
 0x372   :  { %2637 = vmatpush1.bf16.msra.mxu0 %v9552_v0  ;;  %v9613_v0 = vcombine.high %v2789_v58, %v2793_v59  ;;  %v2846_v58 = vld [vmem:[%s15253_s5 + $0x308] sm:$0xff] }
 0x373   :  { %2719 = vmatpush1.bf16.msra.mxu1 %v9554_v2  ;;  %2638 = vmatprep.subr.bf16.mxu0 %v9561_v3  ;;  %v9615_v2 = vcombine.high %v2790_v60, %v2794_v61  ;;  %v2797_v3 = vld [vmem:[%s15253_s5 + $0x180] sm:$0xff]  ;;  %v2850_v59 = vld [vmem:[%s15253_s5 + $0x328] sm:$0xff]  ;;  %v9662_v61 = vcombine.low %v2838_v49, %v2842_v50 }
 0x374   :  { %2720 = vmatprep.subr.bf16.mxu1 %v9563_v4  ;;  %v2801_v4 = vld [vmem:[%s15253_s5 + $0x1a0] sm:$0xff] }
 0x375   :  { %v9620_v18 = vcombine.low %v2797_v3, %v2801_v4 }
 0x376   :  { %2639 = vmatpush1.bf16.msra.mxu0 %v9560_v10  ;;  %v9621_v10 = vcombine.high %v2797_v3, %v2801_v4  ;;  %v2854_v3 = vld [vmem:[%s15253_s5 + $0x348] sm:$0xff] }
 0x377   :  { %2721 = vmatpush1.bf16.msra.mxu1 %v9562_v11  ;;  %2640 = vmatprep.subr.bf16.mxu0 %v9569_v13  ;;  %v9623_v11 = vcombine.high %v2798_v5, %v2802_v8  ;;  %v2805_v13 = vld [vmem:[%s15253_s5 + $0x1c0] sm:$0xff]  ;;  %v2858_v4 = vld [vmem:[%s15253_s5 + $0x368] sm:$0xff]  ;;  %v9670_v8 = vcombine.low %v2846_v58, %v2850_v59 }
 0x378   :  { %2722 = vmatprep.subr.bf16.mxu1 %v9571_v14  ;;  %v2809_v14 = vld [vmem:[%s15253_s5 + $0x1e0] sm:$0xff] }
 0x379   :  { %v9628_v26 = vcombine.low %v2805_v13, %v2809_v14 }
 0x37a   :  { %2641 = vmatpush1.bf16.msra.mxu0 %v9568_v20  ;;  %v9629_v20 = vcombine.high %v2805_v13, %v2809_v14  ;;  %v2862_v13 = vld [vmem:[%s15253_s5 + $0x388] sm:$0xff] }
 0x37b   :  { %2723 = vmatpush1.bf16.msra.mxu1 %v9570_v21  ;;  %5863 = vmatprep.subr.bf16.mxu0 %v9573_v22  ;;  %v9631_v21 = vcombine.high %v2806_v15, %v2810_v16  ;;  %v2813_v22 = vld [vmem:[%s15253_s5 + $0x200] sm:$0xff]  ;;  %v2866_v14 = vld [vmem:[%s15253_s5 + $0x3a8] sm:$0xff]  ;;  %v9678_v16 = vcombine.low %v2854_v3, %v2858_v4 }
 0x37c   :  { %6027 = vmatprep.subr.bf16.mxu1 %v9575_v23  ;;  %v2817_v23 = vld [vmem:[%s15253_s5 + $0x220] sm:$0xff] }
 0x37d   :  { %2643 = vmatmul.mubr.bf16.vlgmr.msra.gmra.mrb[8].mxu0 %v12129_v56  ;;  %v9636_v6 = vcombine.low %v2813_v22, %v2817_v23 }
 0x37e   :  { %2725 = vmatmul.mubr.bf16.vlgmr.msra.gmra.mrb[16].mxu1 %v12129_v56  ;;  %5864 = vmatpush1.bf16.msra.mxu0 %v9572_v30  ;;  %v2774_v56 = vld [vmem:[%s15253_s5 + $0xc8] sm:$0xff]  ;;  %v9637_v30 = vcombine.high %v2813_v22, %v2817_v23 }
 0x37f   :  { %6028 = vmatpush1.bf16.msra.mxu1 %v9574_v28  ;;  %5865 = vmatprep.subr.bf16.mxu0 %v9581_v37  ;;  %v9599_v47 = vcombine.high %v2774_v56, %v2778_v42  ;;  %v9598_v54 = vcombine.low %v2774_v56, %v2778_v42  ;;  %v9639_v28 = vcombine.high %v2814_v24, %v2818_v25  ;;  %v2821_v37 = vld [vmem:[%s15253_s5 + $0x240] sm:$0xff]  ;;  %v2870_v22 = vld [vmem:[%s15253_s5 + $0x3c8] sm:$0xff] }
 0x380   :  { %6029 = vmatprep.subr.bf16.mxu1 %v9583_v31  ;;  %v2825_v31 = vld [vmem:[%s15253_s5 + $0x260] sm:$0xff]  ;;  %v9646_v42 = vcombine.low %v2822_v32, %v2826_v33  ;;  %v2874_v23 = vld [vmem:[%s15253_s5 + $0x3e8] sm:$0xff]  ;;  %v9686_v25 = vcombine.low %v2862_v13, %v2866_v14 }
 0x381   :  { %v9644_v56 = vcombine.low %v2821_v37, %v2825_v31 }
 0x382   :  { %5866 = vmatpush1.bf16.msra.mxu0 %v9580_v35  ;;  %v9645_v35 = vcombine.high %v2821_v37, %v2825_v31  ;;  %v2878_v37 = vld [vmem:[%s15253_s5 + $0x408] sm:$0xff] }
 0x383   :  { %6030 = vmatpush1.bf16.msra.mxu1 %v9582_v36  ;;  %5867 = vmatprep.subr.bf16.mxu0 %v9589_v38  ;;  %v9647_v36 = vcombine.high %v2822_v32, %v2826_v33  ;;  %v2829_v38 = vld [vmem:[%s15253_s5 + $0x280] sm:$0xff]  ;;  %v2882_v31 = vld [vmem:[%s15253_s5 + $0x428] sm:$0xff]  ;;  %v9694_v33 = vcombine.low %v2870_v22, %v2874_v23 }
 0x384   :  { %6031 = vmatprep.subr.bf16.mxu1 %v9591_v39  ;;  %v2833_v39 = vld [vmem:[%s15253_s5 + $0x2a0] sm:$0xff] }
 0x385   :  { %v9652_v51 = vcombine.low %v2829_v38, %v2833_v39 }
 0x386   :  { %5868 = vmatpush1.bf16.msra.mxu0 %v9588_v12  ;;  %v9653_v12 = vcombine.high %v2829_v38, %v2833_v39 }
 0x387   :  { %6032 = vmatpush1.bf16.msra.mxu1 %v9590_v43  ;;  %5869 = vmatprep.subr.bf16.mxu0 %v9597_v44  ;;  %v9655_v43 = vcombine.high %v2830_v40, %v2834_v41  ;;  %v2837_v44 = vld [vmem:[%s15253_s5 + $0x2c0] sm:$0xff] }
 0x388   :  { %6033 = vmatprep.subr.bf16.mxu1 %v9599_v47  ;;  %v2841_v47 = vld [vmem:[%s15253_s5 + $0x2e0] sm:$0xff] }
 0x389   :  { %v9660_v60 = vcombine.low %v2837_v44, %v2841_v47 }
 0x38a   :  { %5870 = vmatpush1.bf16.msra.mxu0 %v9596_v53  ;;  %v9661_v53 = vcombine.high %v2837_v44, %v2841_v47 }
 0x38b   :  { %6034 = vmatpush1.bf16.msra.mxu1 %v9598_v54  ;;  %5871 = vmatprep.subr.bf16.mxu0 %v9605_v55  ;;  %v9663_v54 = vcombine.high %v2838_v49, %v2842_v50  ;;  %v2845_v55 = vld [vmem:[%s15253_s5 + $0x300] sm:$0xff] }
 0x38c   :  { %6035 = vmatprep.subr.bf16.mxu1 %v9607_v57  ;;  %v2849_v57 = vld [vmem:[%s15253_s5 + $0x320] sm:$0xff] }
 0x38d   :  { %v9668_v5 = vcombine.low %v2845_v55, %v2849_v57 }
 0x38e   :  { %5872 = vmatpush1.bf16.msra.mxu0 %v9604_v62  ;;  %v9669_v62 = vcombine.high %v2845_v55, %v2849_v57  ;;  %v2889_v57 = vld [vmem:[%s15253_s5 + $0x460] sm:$0xff] }
 0x38f   :  { %6036 = vmatpush1.bf16.msra.mxu1 %v9606_v63  ;;  %5873 = vmatprep.subr.bf16.mxu0 %v9613_v0  ;;  %v9671_v63 = vcombine.high %v2846_v58, %v2850_v59  ;;  %v2853_v0 = vld [vmem:[%s15253_s5 + $0x340] sm:$0xff]  ;;  %v2886_v58 = vld [vmem:[%s15253_s5 + $0x448] sm:$0xff] }
 0x390   :  { %6037 = vmatprep.subr.bf16.mxu1 %v9615_v2  ;;  %v2857_v2 = vld [vmem:[%s15253_s5 + $0x360] sm:$0xff]  ;;  %v2890_v59 = vld [vmem:[%s15253_s5 + $0x468] sm:$0xff] }
 0x391   :  { %v9676_v15 = vcombine.low %v2853_v0, %v2857_v2 }
 0x392   :  { %5874 = vmatpush1.bf16.msra.mxu0 %v9612_v9  ;;  %v9677_v9 = vcombine.high %v2853_v0, %v2857_v2  ;;  %v2893_v0 = vld [vmem:[%s15253_s5 + $0x480] sm:$0xff] }
 0x393   :  { %6038 = vmatpush1.bf16.msra.mxu1 %v9614_v29  ;;  %5875 = vmatprep.subr.bf16.mxu0 %v9621_v10  ;;  %v9679_v29 = vcombine.high %v2854_v3, %v2858_v4  ;;  %v2861_v10 = vld [vmem:[%s15253_s5 + $0x380] sm:$0xff]  ;;  %v9711_v3 = vcombine.high %v2886_v58, %v2890_v59 }
 0x394   :  { %6039 = vmatprep.subr.bf16.mxu1 %v9623_v11  ;;  %v2865_v11 = vld [vmem:[%s15253_s5 + $0x3a0] sm:$0xff] }
 0x395   :  { %v9684_v24 = vcombine.low %v2861_v10, %v2865_v11  ;;  %v2897_v4 = vld [vmem:[%s15253_s5 + $0x4a0] sm:$0xff] }
 0x396   :  { %5876 = vmatpush1.bf16.msra.mxu0 %v9620_v18  ;;  %v9685_v18 = vcombine.high %v2861_v10, %v2865_v11  ;;  %v9710_v10 = vcombine.low %v2886_v58, %v2890_v59  ;;  %v9717_v11 = vcombine.high %v2893_v0, %v2897_v4  ;;  %v2941_v59 = vld [vmem:[%s15253_s5 + $0x600] sm:$0xff] }
 0x397   :  { %6040 = vmatpush1.bf16.msra.mxu1 %v9622_v19  ;;  %5877 = vmatprep.subr.bf16.mxu0 %v9629_v20  ;;  %v9687_v19 = vcombine.high %v2862_v13, %v2866_v14  ;;  %v2869_v20 = vld [vmem:[%s15253_s5 + $0x3c0] sm:$0xff] }
 0x398   :  { %6041 = vmatprep.subr.bf16.mxu1 %v9631_v21  ;;  %v2873_v21 = vld [vmem:[%s15253_s5 + $0x3e0] sm:$0xff] }
 0x399   :  { %v9692_v32 = vcombine.low %v2869_v20, %v2873_v21  ;;  %v2901_v14 = vld [vmem:[%s15253_s5 + $0x4c0] sm:$0xff] }
 0x39a   :  { %5878 = vmatpush1.bf16.msra.mxu0 %v9628_v26  ;;  %v9693_v26 = vcombine.high %v2869_v20, %v2873_v21 }
 0x39b   :  { %6042 = vmatpush1.bf16.msra.mxu1 %v9630_v27  ;;  %5879 = vmatprep.subr.bf16.mxu0 %v9637_v30  ;;  %v9695_v27 = vcombine.high %v2870_v22, %v2874_v23  ;;  %v2877_v30 = vld [vmem:[%s15253_s5 + $0x400] sm:$0xff] }
 0x39c   :  { %6043 = vmatprep.subr.bf16.mxu1 %v9639_v28  ;;  %v2881_v28 = vld [vmem:[%s15253_s5 + $0x420] sm:$0xff] }
 0x39d   :  { %v2909_v23 = vld [vmem:[%s15253_s5 + $0x500] sm:$0xff] }
 0x39e   :  { %5880 = vmatpush1.bf16.msra.mxu0 %v9636_v6  ;;  %v9701_v6 = vcombine.high %v2877_v30, %v2881_v28 }
 0x39f   :  { %6044 = vmatpush1.bf16.msra.mxu1 %v9638_v34  ;;  %5881 = vmatprep.subr.bf16.mxu0 %v9645_v35  ;;  %v9703_v34 = vcombine.high %v2878_v37, %v2882_v31  ;;  %v12708_v35 = vld [vmem:[%s15261_s13] sm:$0xff] }
 0x3a0   :  { %6045 = vmatprep.subr.bf16.mxu1 %v9647_v36  ;;  %v1088_v36 = vrot.slane %v12708_v35, %v11689_v46  ;;  %v1092_v38 = vrot.slane %v12708_v35, %v11695_v48  ;;  %v1100_v39 = vrot.slane %v12708_v35, %v11897_v7 }
 0x3a2   :  { %5882 = vmatpush1.bf16.msra.mxu0 %v9644_v56 }
 0x3a3   :  { %6046 = vmatpush1.bf16.msra.mxu1 %v9646_v42  ;;  %5883 = vmatprep.subr.bf16.mxu0 %v9653_v12 }
 0x3a4   :  { %6047 = vmatprep.subr.bf16.mxu1 %v9655_v43 }
 0x3a6   :  { %5884 = vmatpush1.bf16.msra.mxu0 %v9652_v51 }
 0x3a7   :  { %6048 = vmatpush1.bf16.msra.mxu1 %v9654_v52  ;;  %5885 = vmatprep.subr.bf16.mxu0 %v9661_v53 }
 0x3a8   :  { %6049 = vmatprep.subr.bf16.mxu1 %v9663_v54  ;;  %v2885_v54 = vld [vmem:[%s15253_s5 + $0x440] sm:$0xff] }
 0x3a9   :  { %v9709_v2 = vcombine.high %v2885_v54, %v2889_v57 }
 0x3aa   :  { %5886 = vmatpush1.bf16.msra.mxu0 %v9660_v60 }
 0x3ab   :  { %6050 = vmatpush1.bf16.msra.mxu1 %v9662_v61  ;;  %5887 = vmatprep.subr.bf16.mxu0 %v9669_v62  ;;  %v9700_v61 = vcombine.low %v2877_v30, %v2881_v28  ;;  %v9702_v62 = vcombine.low %v2878_v37, %v2882_v31  ;;  %v2917_v31 = vld [vmem:[%s15253_s5 + $0x540] sm:$0xff] }
 0x3ac   :  { %6051 = vmatprep.subr.bf16.mxu1 %v9671_v63 }
 0x3ae   :  { %5888 = vmatpush1.bf16.msra.mxu0 %v9668_v5  ;;  %v2894_v5 = vld [vmem:[%s15253_s5 + $0x488] sm:$0xff] }
 0x3af   :  { %6052 = vmatpush1.bf16.msra.mxu1 %v9670_v8  ;;  %5889 = vmatprep.subr.bf16.mxu0 %v9677_v9  ;;  %v2898_v8 = vld [vmem:[%s15253_s5 + $0x4a8] sm:$0xff] }
 0x3b0   :  { %6053 = vmatprep.subr.bf16.mxu1 %v9679_v29  ;;  %v9708_v29 = vcombine.low %v2885_v54, %v2889_v57  ;;  %v9719_v13 = vcombine.high %v2894_v5, %v2898_v8  ;;  %v9718_v20 = vcombine.low %v2894_v5, %v2898_v8  ;;  %v2949_v8 = vld [vmem:[%s15253_s5 + $0x640] sm:$0xff] }
 0x3b2   :  { %5890 = vmatpush1.bf16.msra.mxu0 %v9676_v15  ;;  %v2905_v15 = vld [vmem:[%s15253_s5 + $0x4e0] sm:$0xff] }
 0x3b3   :  { %6054 = vmatpush1.bf16.msra.mxu1 %v9678_v16  ;;  %5891 = vmatprep.subr.bf16.mxu0 %v9685_v18  ;;  %v2902_v16 = vld [vmem:[%s15253_s5 + $0x4c8] sm:$0xff]  ;;  %v9725_v21 = vcombine.high %v2901_v14, %v2905_v15 }
 0x3b4   :  { %6055 = vmatprep.subr.bf16.mxu1 %v9687_v19  ;;  %v2906_v18 = vld [vmem:[%s15253_s5 + $0x4e8] sm:$0xff]  ;;  %v9716_v19 = vcombine.low %v2893_v0, %v2897_v4 }
 0x3b5   :  { %v9727_v22 = vcombine.high %v2902_v16, %v2906_v18  ;;  %v9726_v30 = vcombine.low %v2902_v16, %v2906_v18  ;;  %v2946_v0 = vld [vmem:[%s15253_s5 + $0x628] sm:$0xff]  ;;  %v2957_v18 = vld [vmem:[%s15253_s5 + $0x680] sm:$0xff] }
 0x3b6   :  { %5892 = vmatpush1.bf16.msra.mxu0 %v9684_v24  ;;  %v2913_v24 = vld [vmem:[%s15253_s5 + $0x520] sm:$0xff] }
 0x3b7   :  { %6056 = vmatpush1.bf16.msra.mxu1 %v9686_v25  ;;  %5893 = vmatprep.subr.bf16.mxu0 %v9693_v26  ;;  %v2910_v25 = vld [vmem:[%s15253_s5 + $0x508] sm:$0xff]  ;;  %v9733_v28 = vcombine.high %v2909_v23, %v2913_v24 }
 0x3b8   :  { %6057 = vmatprep.subr.bf16.mxu1 %v9695_v27  ;;  %v2914_v26 = vld [vmem:[%s15253_s5 + $0x528] sm:$0xff]  ;;  %v9724_v27 = vcombine.low %v2901_v14, %v2905_v15 }
 0x3b9   :  { %v9735_v37 = vcombine.high %v2910_v25, %v2914_v26 }
 0x3ba   :  { %5894 = vmatpush1.bf16.msra.mxu0 %v9692_v32  ;;  %v2921_v32 = vld [vmem:[%s15253_s5 + $0x560] sm:$0xff] }
 0x3bb   :  { %6058 = vmatpush1.bf16.msra.mxu1 %v9694_v33  ;;  %5904 = vmatprep.subr.bf16.mxu0 %v9701_v6  ;;  %v2918_v33 = vld [vmem:[%s15253_s5 + $0x548] sm:$0xff] }
 0x3bc   :  { %6068 = vmatprep.subr.bf16.mxu1 %v9703_v34  ;;  %v2922_v6 = vld [vmem:[%s15253_s5 + $0x568] sm:$0xff]  ;;  %v9732_v34 = vcombine.low %v2909_v23, %v2913_v24 }
 0x3d0   :  { %v2480_v40 = vpop.f32.mrb[4].mxu0  ;;  %v12716_v41 = vpop.f32.mrb[12].mxu1 }
 0x3d1   :  { %v10510_v56 = vadd.f32 %v2480_v40, %v1088_v36  ;;  %v2482_v42 = vpop.f32.mrb[5].mxu0  ;;  %v2564_v12 = vpop.f32.mrb[13].mxu1  ;;  %v9734_v36 = vcombine.low %v2910_v25, %v2914_v26  ;;  %v2925_v40 = vld [vmem:[%s15253_s5 + $0x580] sm:$0xff] }
 0x3d2   :  { %v10511_v43 = vadd.f32 %v2482_v42, %v1092_v38  ;;  %v10513_v44 = vadd.f32 %v2564_v12, %v1100_v39  ;;  %v2484_v47 = vpop.f32.mrb[6].mxu0  ;;  %v2566_v49 = vpop.f32.mrb[14].mxu1  ;;  %v9741_v38 = vcombine.high %v2917_v31, %v2921_v32  ;;  %v9743_v39 = vcombine.high %v2918_v33, %v2922_v6  ;;  %v2926_v42 = vld [vmem:[%s15253_s5 + $0x588] sm:$0xff]  ;;  %v2965_v26 = vld [vmem:[%s15253_s5 + $0x6c0] sm:$0xff] }
 0x3d3   :  { %v2733_v50 = vmax.f32 %v10510_v56, 0.0  ;;  %v2485_v51 = vpop.f32.mrb[7].mxu0  ;;  %v2567_v52 = vpop.f32.mrb[15].mxu1  ;;  %v2929_v56 = vld [vmem:[%s15253_s5 + $0x5a0] sm:$0xff]  ;;  %v2930_v12 = vld [vmem:[%s15253_s5 + $0x5a8] sm:$0xff] }
 0x3d4   :  { %v2734_v53 = vmax.f32 %v10511_v43, 0.0  ;;  %v2736_v55 = vmax.f32 %v10513_v44, 0.0  ;;  %v9740_v43 = vcombine.low %v2917_v31, %v2921_v32  ;;  %v9742_v44 = vcombine.low %v2918_v33, %v2922_v6  ;;  %v2937_v51 = vld [vmem:[%s15253_s5 + $0x5e0] sm:$0xff]  ;;  %v2934_v52 = vld [vmem:[%s15253_s5 + $0x5c8] sm:$0xff] }
 0x3d5   :  { %v12732_v63 = vpack.c.bf16 %v2733_v50, %v2733_v50  ;;  %v9749_v47 = vcombine.high %v2925_v40, %v2929_v56  ;;  %v9751_v49 = vcombine.high %v2926_v42, %v2930_v12  ;;  %v2933_v50 = vld [vmem:[%s15253_s5 + $0x5c0] sm:$0xff]  ;;  %v9748_v54 = vcombine.low %v2925_v40, %v2929_v56 }
 0x3d6   :  { %v12730_v60 = vpack.c.bf16 %v2734_v53, %v2734_v53  ;;  %v12748_v9 = vpack.c.bf16 %v2736_v55, %v2736_v55  ;;  %v2938_v53 = vld [vmem:[%s15253_s5 + $0x5e8] sm:$0xff]  ;;  %v9750_v55 = vcombine.low %v2926_v42, %v2930_v12  ;;  %v9757_v57 = vcombine.high %v2933_v50, %v2937_v51  ;;  %v2973_v6 = vld [vmem:[%s15253_s5 + $0x700] sm:$0xff] }
 0x3d7   :  { %v9759_v58 = vcombine.high %v2934_v52, %v2938_v53  ;;  %v2981_v12 = vld [vmem:[%s15253_s5 + $0x740] sm:$0xff] }
 0x3d8   :  { %5895 = vmatprep.mubr.bf16.mxu0 %v12730_v60  ;;  %6059 = vmatprep.mubr.bf16.mxu1 %v12730_v60 }
 0x3d9   :  { %5896 = vmatmul.mubr.bf16.vlgmr.msra.gmra.mrb[12].mxu0 %v12732_v63  ;;  %6060 = vmatmul.mubr.bf16.vlgmr.msra.gmra.mrb[20].mxu1 %v12732_v63 }
 0x3da   :  { %5905 = vmatpush1.bf16.msra.mxu0 %v9700_v61  ;;  %6069 = vmatpush1.bf16.msra.mxu1 %v9702_v62  ;;  %v2945_v61 = vld [vmem:[%s15253_s5 + $0x620] sm:$0xff]  ;;  %v2942_v62 = vld [vmem:[%s15253_s5 + $0x608] sm:$0xff] }
 0x3db   :  { %5936 = vmatprep.mubr.bf16.mxu0 %v12748_v9  ;;  %6100 = vmatprep.mubr.bf16.mxu1 %v12748_v9  ;;  %v9765_v4 = vcombine.high %v2941_v59, %v2945_v61  ;;  %v9767_v5 = vcombine.high %v2942_v62, %v2946_v0  ;;  %v9766_v14 = vcombine.low %v2942_v62, %v2946_v0 }
 0x3dc   :  { %5906 = vmatprep.subr.bf16.mxu0 %v9709_v2  ;;  %6070 = vmatprep.subr.bf16.mxu1 %v9711_v3  ;;  %v9756_v2 = vcombine.low %v2933_v50, %v2937_v51  ;;  %v9758_v3 = vcombine.low %v2934_v52, %v2938_v53  ;;  %v2989_v53 = vld [vmem:[%s15253_s5 + $0x780] sm:$0xff] }
 0x3de   :  { %5907 = vmatpush1.bf16.msra.mxu0 %v9708_v29  ;;  %6071 = vmatpush1.bf16.msra.mxu1 %v9710_v10  ;;  %v2953_v29 = vld [vmem:[%s15253_s5 + $0x660] sm:$0xff]  ;;  %v2950_v10 = vld [vmem:[%s15253_s5 + $0x648] sm:$0xff] }
 0x3df   :  { %5908 = vmatprep.subr.bf16.mxu0 %v9717_v11  ;;  %6072 = vmatprep.subr.bf16.mxu1 %v9719_v13  ;;  %v2954_v11 = vld [vmem:[%s15253_s5 + $0x668] sm:$0xff]  ;;  %v9764_v13 = vcombine.low %v2941_v59, %v2945_v61  ;;  %v9773_v15 = vcombine.high %v2949_v8, %v2953_v29  ;;  %v1096_v61 = vrot.slane %v12708_v35, %v12076_v17 }
 0x3e0   :  { %v9775_v16 = vcombine.high %v2950_v10, %v2954_v11  ;;  %v9774_v23 = vcombine.low %v2950_v10, %v2954_v11 }
 0x3e1   :  { %v10512_v10 = vadd.f32 %v12716_v41, %v1096_v61  ;;  %v3010_v41 = vld [vmem:[%s15253_s5 + $0x828] sm:$0xff]  ;;  %v3045_v61 = vld [vmem:[%s15253_s5 + $0x940] sm:$0xff] }
 0x3e2   :  { %5909 = vmatpush1.bf16.msra.mxu0 %v9716_v19  ;;  %6073 = vmatpush1.bf16.msra.mxu1 %v9718_v20  ;;  %v2961_v19 = vld [vmem:[%s15253_s5 + $0x6a0] sm:$0xff]  ;;  %v2958_v20 = vld [vmem:[%s15253_s5 + $0x688] sm:$0xff] }
 0x3e3   :  { %5910 = vmatprep.subr.bf16.mxu0 %v9725_v21  ;;  %6074 = vmatprep.subr.bf16.mxu1 %v9727_v22  ;;  %v2962_v21 = vld [vmem:[%s15253_s5 + $0x6a8] sm:$0xff]  ;;  %v9772_v22 = vcombine.low %v2949_v8, %v2953_v29  ;;  %v9781_v24 = vcombine.high %v2957_v18, %v2961_v19 }
 0x3e4   :  { %v9783_v25 = vcombine.high %v2958_v20, %v2962_v21  ;;  %v9782_v31 = vcombine.low %v2958_v20, %v2962_v21  ;;  %v2735_v20 = vmax.f32 %v10512_v10, 0.0  ;;  %v3057_v10 = vld [vmem:[%s15253_s5 + $0x9a0] sm:$0xff] }
 0x3e6   :  { %5911 = vmatpush1.bf16.msra.mxu0 %v9724_v27  ;;  %6075 = vmatpush1.bf16.msra.mxu1 %v9726_v30  ;;  %v2969_v27 = vld [vmem:[%s15253_s5 + $0x6e0] sm:$0xff]  ;;  %v2966_v30 = vld [vmem:[%s15253_s5 + $0x6c8] sm:$0xff] }
 0x3e7   :  { %5912 = vmatprep.subr.bf16.mxu0 %v9733_v28  ;;  %6076 = vmatprep.subr.bf16.mxu1 %v9735_v37  ;;  %v2970_v28 = vld [vmem:[%s15253_s5 + $0x6e8] sm:$0xff]  ;;  %v9780_v37 = vcombine.low %v2957_v18, %v2961_v19  ;;  %v9789_v32 = vcombine.high %v2965_v26, %v2969_v27 }
 0x3e8   :  { %v9791_v33 = vcombine.high %v2966_v30, %v2970_v28  ;;  %v9790_v40 = vcombine.low %v2966_v30, %v2970_v28  ;;  %v12937_v28 = vpack.c.bf16 %v2735_v20, %v2735_v20  ;;  %v3062_v20 = vld [vmem:[%s15253_s5 + $0x9c8] sm:$0xff] }
 0x3ea   :  { %5913 = vmatpush1.bf16.msra.mxu0 %v9732_v34  ;;  %6077 = vmatpush1.bf16.msra.mxu1 %v9734_v36  ;;  %v2977_v34 = vld [vmem:[%s15253_s5 + $0x720] sm:$0xff]  ;;  %v2974_v36 = vld [vmem:[%s15253_s5 + $0x708] sm:$0xff] }
 0x3eb   :  { %5914 = vmatprep.subr.bf16.mxu0 %v9741_v38  ;;  %6078 = vmatprep.subr.bf16.mxu1 %v9743_v39  ;;  %v2978_v38 = vld [vmem:[%s15253_s5 + $0x728] sm:$0xff]  ;;  %v9788_v39 = vcombine.low %v2965_v26, %v2969_v27  ;;  %v9797_v56 = vcombine.high %v2973_v6, %v2977_v34 }
 0x3ec   :  { %v9799_v42 = vcombine.high %v2974_v36, %v2978_v38  ;;  %v9798_v50 = vcombine.low %v2974_v36, %v2978_v38  ;;  %v3018_v26 = vld [vmem:[%s15253_s5 + $0x868] sm:$0xff] }
 0x3ee   :  { %5915 = vmatpush1.bf16.msra.mxu0 %v9740_v43  ;;  %6079 = vmatpush1.bf16.msra.mxu1 %v9742_v44  ;;  %v2985_v43 = vld [vmem:[%s15253_s5 + $0x760] sm:$0xff]  ;;  %v2982_v44 = vld [vmem:[%s15253_s5 + $0x748] sm:$0xff] }
 0x3ef   :  { %5916 = vmatprep.subr.bf16.mxu0 %v9749_v47  ;;  %6080 = vmatprep.subr.bf16.mxu1 %v9751_v49  ;;  %v2986_v47 = vld [vmem:[%s15253_s5 + $0x768] sm:$0xff]  ;;  %v9796_v49 = vcombine.low %v2973_v6, %v2977_v34  ;;  %v9805_v51 = vcombine.high %v2981_v12, %v2985_v43 }
 0x3f0   :  { %v9807_v52 = vcombine.high %v2982_v44, %v2986_v47  ;;  %v9806_v59 = vcombine.low %v2982_v44, %v2986_v47  ;;  %v3022_v6 = vld [vmem:[%s15253_s5 + $0x888] sm:$0xff] }
 0x3f1   :  { %v3026_v34 = vld [vmem:[%s15253_s5 + $0x8a8] sm:$0xff] }
 0x3f2   :  { %5917 = vmatpush1.bf16.msra.mxu0 %v9748_v54  ;;  %6081 = vmatpush1.bf16.msra.mxu1 %v9750_v55  ;;  %v2993_v54 = vld [vmem:[%s15253_s5 + $0x7a0] sm:$0xff]  ;;  %v2990_v55 = vld [vmem:[%s15253_s5 + $0x788] sm:$0xff]  ;;  %v9846_v47 = vcombine.low %v3022_v6, %v3026_v34 }
 0x3f3   :  { %5918 = vmatprep.subr.bf16.mxu0 %v9757_v57  ;;  %6082 = vmatprep.subr.bf16.mxu1 %v9759_v58  ;;  %v2994_v57 = vld [vmem:[%s15253_s5 + $0x7a8] sm:$0xff]  ;;  %v9804_v58 = vcombine.low %v2981_v12, %v2985_v43  ;;  %v9813_v62 = vcombine.high %v2989_v53, %v2993_v54  ;;  %v9812_v8 = vcombine.low %v2989_v53, %v2993_v54 }
 0x3f4   :  { %v9815_v0 = vcombine.high %v2990_v55, %v2994_v57  ;;  %v9814_v29 = vcombine.low %v2990_v55, %v2994_v57  ;;  %v3030_v12 = vld [vmem:[%s15253_s5 + $0x8c8] sm:$0xff] }
 0x3f5   :  { %v3034_v43 = vld [vmem:[%s15253_s5 + $0x8e8] sm:$0xff] }
 0x3f6   :  { %5919 = vmatpush1.bf16.msra.mxu0 %v9756_v2  ;;  %6083 = vmatpush1.bf16.msra.mxu1 %v9758_v3  ;;  %v2997_v2 = vld [vmem:[%s15253_s5 + $0x7c0] sm:$0xff]  ;;  %v3038_v53 = vld [vmem:[%s15253_s5 + $0x908] sm:$0xff]  ;;  %v9854_v57 = vcombine.low %v3030_v12, %v3034_v43 }
 0x3f7   :  { %5920 = vmatprep.subr.bf16.mxu0 %v9765_v4  ;;  %6084 = vmatprep.subr.bf16.mxu1 %v9767_v5  ;;  %v3001_v3 = vld [vmem:[%s15253_s5 + $0x7e0] sm:$0xff]  ;;  %v2998_v4 = vld [vmem:[%s15253_s5 + $0x7c8] sm:$0xff] }
 0x3f8   :  { %v3002_v5 = vld [vmem:[%s15253_s5 + $0x7e8] sm:$0xff]  ;;  %v9821_v11 = vcombine.high %v2997_v2, %v3001_v3  ;;  %v9820_v18 = vcombine.low %v2997_v2, %v3001_v3 }
 0x3f9   :  { %v9822_v19 = vcombine.low %v2998_v4, %v3002_v5  ;;  %v3042_v54 = vld [vmem:[%s15253_s5 + $0x928] sm:$0xff] }
 0x3fa   :  { %5921 = vmatpush1.bf16.msra.mxu0 %v9764_v13  ;;  %6085 = vmatpush1.bf16.msra.mxu1 %v9766_v14  ;;  %v9823_v13 = vcombine.high %v2998_v4, %v3002_v5  ;;  %v3005_v14 = vld [vmem:[%s15253_s5 + $0x800] sm:$0xff]  ;;  %v3050_v2 = vld [vmem:[%s15253_s5 + $0x968] sm:$0xff]  ;;  %v9862_v4 = vcombine.low %v3038_v53, %v3042_v54 }
 0x3fb   :  { %5922 = vmatprep.subr.bf16.mxu0 %v9773_v15  ;;  %6086 = vmatprep.subr.bf16.mxu1 %v9775_v16  ;;  %v3009_v15 = vld [vmem:[%s15253_s5 + $0x820] sm:$0xff]  ;;  %v3006_v16 = vld [vmem:[%s15253_s5 + $0x808] sm:$0xff] }
 0x3fc   :  { %v9829_v21 = vcombine.high %v3005_v14, %v3009_v15  ;;  %v9828_v27 = vcombine.low %v3005_v14, %v3009_v15  ;;  %v9830_v30 = vcombine.low %v3006_v16, %v3010_v41 }
 0x3fe   :  { %5923 = vmatpush1.bf16.msra.mxu0 %v9772_v22  ;;  %6087 = vmatpush1.bf16.msra.mxu1 %v9774_v23  ;;  %v9831_v22 = vcombine.high %v3006_v16, %v3010_v41  ;;  %v3013_v23 = vld [vmem:[%s15253_s5 + $0x840] sm:$0xff] }
 0x3ff   :  { %5924 = vmatprep.subr.bf16.mxu0 %v9781_v24  ;;  %6088 = vmatprep.subr.bf16.mxu1 %v9783_v25  ;;  %v3017_v24 = vld [vmem:[%s15253_s5 + $0x860] sm:$0xff]  ;;  %v3014_v25 = vld [vmem:[%s15253_s5 + $0x848] sm:$0xff] }
 0x400   :  { %v9836_v36 = vcombine.low %v3013_v23, %v3017_v24  ;;  %v9838_v38 = vcombine.low %v3014_v25, %v3018_v26 }
 0x402   :  { %5925 = vmatpush1.bf16.msra.mxu0 %v9780_v37  ;;  %6089 = vmatpush1.bf16.msra.mxu1 %v9782_v31  ;;  %v9837_v37 = vcombine.high %v3013_v23, %v3017_v24  ;;  %v9839_v31 = vcombine.high %v3014_v25, %v3018_v26  ;;  %v3069_v26 = vld [vmem:[%s15253_s5 + $0xa00] sm:$0xff] }
 0x403   :  { %5926 = vmatprep.subr.bf16.mxu0 %v9789_v32  ;;  %6090 = vmatprep.subr.bf16.mxu1 %v9791_v33  ;;  %v3021_v32 = vld [vmem:[%s15253_s5 + $0x880] sm:$0xff] }
 0x404   :  { %v3025_v33 = vld [vmem:[%s15253_s5 + $0x8a0] sm:$0xff] }
 0x405   :  { %v9844_v44 = vcombine.low %v3021_v32, %v3025_v33 }
 0x406   :  { %5927 = vmatpush1.bf16.msra.mxu0 %v9788_v39  ;;  %6091 = vmatpush1.bf16.msra.mxu1 %v9790_v40  ;;  %v9845_v39 = vcombine.high %v3021_v32, %v3025_v33  ;;  %v9847_v40 = vcombine.high %v3022_v6, %v3026_v34  ;;  %v3077_v34 = vld [vmem:[%s15253_s5 + $0xa40] sm:$0xff] }
 0x407   :  { %5928 = vmatprep.subr.bf16.mxu0 %v9797_v56  ;;  %6092 = vmatprep.subr.bf16.mxu1 %v9799_v42  ;;  %v3029_v56 = vld [vmem:[%s15253_s5 + $0x8c0] sm:$0xff] }
 0x408   :  { %v3033_v42 = vld [vmem:[%s15253_s5 + $0x8e0] sm:$0xff] }
 0x409   :  { %v9852_v55 = vcombine.low %v3029_v56, %v3033_v42 }
 0x40a   :  { %5929 = vmatpush1.bf16.msra.mxu0 %v9796_v49  ;;  %6093 = vmatpush1.bf16.msra.mxu1 %v9798_v50  ;;  %v9853_v49 = vcombine.high %v3029_v56, %v3033_v42  ;;  %v9855_v50 = vcombine.high %v3030_v12, %v3034_v43  ;;  %v3085_v43 = vld [vmem:[%s15253_s5 + $0xa80] sm:$0xff] }
 0x40b   :  { %5930 = vmatprep.subr.bf16.mxu0 %v9805_v51  ;;  %6094 = vmatprep.subr.bf16.mxu1 %v9807_v52  ;;  %v3037_v51 = vld [vmem:[%s15253_s5 + $0x900] sm:$0xff] }
 0x40c   :  { %v3041_v52 = vld [vmem:[%s15253_s5 + $0x920] sm:$0xff] }
 0x40d   :  { %v9860_v3 = vcombine.low %v3037_v51, %v3041_v52 }
 0x40e   :  { %5931 = vmatpush1.bf16.msra.mxu0 %v9804_v58  ;;  %6095 = vmatpush1.bf16.msra.mxu1 %v9806_v59  ;;  %v9861_v58 = vcombine.high %v3037_v51, %v3041_v52  ;;  %v9863_v59 = vcombine.high %v3038_v53, %v3042_v54  ;;  %v3093_v54 = vld [vmem:[%s15253_s5 + $0xac0] sm:$0xff] }
 0x40f   :  { %5932 = vmatprep.subr.bf16.mxu0 %v9813_v62  ;;  %6096 = vmatprep.subr.bf16.mxu1 %v9815_v0  ;;  %v3049_v62 = vld [vmem:[%s15253_s5 + $0x960] sm:$0xff]  ;;  %v3046_v0 = vld [vmem:[%s15253_s5 + $0x948] sm:$0xff] }
 0x410   :  { %v9869_v5 = vcombine.high %v3045_v61, %v3049_v62  ;;  %v9868_v14 = vcombine.low %v3045_v61, %v3049_v62  ;;  %v9870_v15 = vcombine.low %v3046_v0, %v3050_v2 }
 0x412   :  { %5933 = vmatpush1.bf16.msra.mxu0 %v9812_v8  ;;  %6097 = vmatpush1.bf16.msra.mxu1 %v9814_v29  ;;  %v9871_v8 = vcombine.high %v3046_v0, %v3050_v2  ;;  %v3053_v29 = vld [vmem:[%s15253_s5 + $0x980] sm:$0xff] }
 0x413   :  { %5934 = vmatprep.subr.bf16.mxu0 %v9821_v11  ;;  %6098 = vmatprep.subr.bf16.mxu1 %v9823_v13  ;;  %v3054_v11 = vld [vmem:[%s15253_s5 + $0x988] sm:$0xff]  ;;  %v9877_v16 = vcombine.high %v3053_v29, %v3057_v10  ;;  %v3101_v2 = vld [vmem:[%s15253_s5 + $0xb00] sm:$0xff] }
 0x414   :  { %v3058_v13 = vld [vmem:[%s15253_s5 + $0x9a8] sm:$0xff] }
 0x415   :  { %v9879_v41 = vcombine.high %v3054_v11, %v3058_v13  ;;  %v9878_v23 = vcombine.low %v3054_v11, %v3058_v13  ;;  %v3109_v13 = vld [vmem:[%s15253_s5 + $0xb40] sm:$0xff] }
 0x416   :  { %5935 = vmatpush1.bf16.msra.mxu0 %v9820_v18  ;;  %6099 = vmatpush1.bf16.msra.mxu1 %v9822_v19  ;;  %v3061_v18 = vld [vmem:[%s15253_s5 + $0x9c0] sm:$0xff] }
 0x417   :  { %5945 = vmatprep.subr.bf16.mxu0 %v9829_v21  ;;  %6109 = vmatprep.subr.bf16.mxu1 %v9831_v22  ;;  %v3065_v19 = vld [vmem:[%s15253_s5 + $0x9e0] sm:$0xff]  ;;  %v3066_v21 = vld [vmem:[%s15253_s5 + $0x9e8] sm:$0xff]  ;;  %v9876_v22 = vcombine.low %v3053_v29, %v3057_v10 }
 0x418   :  { %v9885_v24 = vcombine.high %v3061_v18, %v3065_v19  ;;  %v9887_v25 = vcombine.high %v3062_v20, %v3066_v21  ;;  %v9886_v32 = vcombine.low %v3062_v20, %v3066_v21  ;;  %v3117_v21 = vld [vmem:[%s15253_s5 + $0xb80] sm:$0xff] }
 0x419   :  { %5937 = vmatmul.mubr.bf16.vlgmr.msra.gmra.mrb[12].mxu0 %v12937_v28  ;;  %6101 = vmatmul.mubr.bf16.vlgmr.msra.gmra.mrb[20].mxu1 %v12937_v28 }
 0x41a   :  { %5946 = vmatpush1.bf16.msra.mxu0 %v9828_v27  ;;  %6110 = vmatpush1.bf16.msra.mxu1 %v9830_v30  ;;  %v3073_v27 = vld [vmem:[%s15253_s5 + $0xa20] sm:$0xff]  ;;  %v3070_v30 = vld [vmem:[%s15253_s5 + $0xa08] sm:$0xff] }
 0x41b   :  { %5947 = vmatprep.subr.bf16.mxu0 %v9837_v37  ;;  %6111 = vmatprep.subr.bf16.mxu1 %v9839_v31  ;;  %v3074_v37 = vld [vmem:[%s15253_s5 + $0xa28] sm:$0xff]  ;;  %v9884_v31 = vcombine.low %v3061_v18, %v3065_v19  ;;  %v9893_v33 = vcombine.high %v3069_v26, %v3073_v27 }
 0x41c   :  { %v9895_v6 = vcombine.high %v3070_v30, %v3074_v37  ;;  %v9894_v56 = vcombine.low %v3070_v30, %v3074_v37  ;;  %v1107_v30 = vsub.s32 5, %v11686_v45 }
 0x41e   :  { %5948 = vmatpush1.bf16.msra.mxu0 %v9836_v36  ;;  %6112 = vmatpush1.bf16.msra.mxu1 %v9838_v38  ;;  %v3081_v36 = vld [vmem:[%s15253_s5 + $0xa60] sm:$0xff]  ;;  %v3078_v38 = vld [vmem:[%s15253_s5 + $0xa48] sm:$0xff] }
 0x41f   :  { %5949 = vmatprep.subr.bf16.mxu0 %v9845_v39  ;;  %6113 = vmatprep.subr.bf16.mxu1 %v9847_v40  ;;  %v3082_v39 = vld [vmem:[%s15253_s5 + $0xa68] sm:$0xff]  ;;  %v9892_v40 = vcombine.low %v3069_v26, %v3073_v27  ;;  %v9901_v42 = vcombine.high %v3077_v34, %v3081_v36 }
 0x420   :  { %v9903_v12 = vcombine.high %v3078_v38, %v3082_v39  ;;  %v9902_v51 = vcombine.low %v3078_v38, %v3082_v39 }
 0x422   :  { %5950 = vmatpush1.bf16.msra.mxu0 %v9844_v44  ;;  %6114 = vmatpush1.bf16.msra.mxu1 %v9846_v47  ;;  %v3089_v44 = vld [vmem:[%s15253_s5 + $0xaa0] sm:$0xff]  ;;  %v3086_v47 = vld [vmem:[%s15253_s5 + $0xa88] sm:$0xff] }
 0x423   :  { %5951 = vmatprep.subr.bf16.mxu0 %v9853_v49  ;;  %6115 = vmatprep.subr.bf16.mxu1 %v9855_v50  ;;  %v3090_v49 = vld [vmem:[%s15253_s5 + $0xaa8] sm:$0xff]  ;;  %v9900_v50 = vcombine.low %v3077_v34, %v3081_v36  ;;  %v9909_v52 = vcombine.high %v3085_v43, %v3089_v44 }
 0x424   :  { %v9911_v53 = vcombine.high %v3086_v47, %v3090_v49  ;;  %v9910_v61 = vcombine.low %v3086_v47, %v3090_v49  ;;  %v3126_v34 = vld [vmem:[%s15253_s5 + $0xbc8] sm:$0xff]  ;;  %v3137_v49 = vld [vmem:[%s15253_s5 + $0xc20] sm:$0xff] }
 0x425   :  { %v3130_v36 = vld [vmem:[%s15253_s5 + $0xbe8] sm:$0xff] }
 0x426   :  { %5952 = vmatpush1.bf16.msra.mxu0 %v9852_v55  ;;  %6116 = vmatpush1.bf16.msra.mxu1 %v9854_v57  ;;  %v3097_v55 = vld [vmem:[%s15253_s5 + $0xae0] sm:$0xff]  ;;  %v3094_v57 = vld [vmem:[%s15253_s5 + $0xac8] sm:$0xff] }
 0x427   :  { %5953 = vmatprep.subr.bf16.mxu0 %v9861_v58  ;;  %6117 = vmatprep.subr.bf16.mxu1 %v9863_v59  ;;  %v3098_v58 = vld [vmem:[%s15253_s5 + $0xae8] sm:$0xff]  ;;  %v9908_v59 = vcombine.low %v3085_v43, %v3089_v44  ;;  %v9917_v62 = vcombine.high %v3093_v54, %v3097_v55  ;;  %v9951_v43 = vcombine.high %v3126_v34, %v3130_v36  ;;  %v3133_v44 = vld [vmem:[%s15253_s5 + $0xc00] sm:$0xff] }
 0x428   :  { %v9919_v0 = vcombine.high %v3094_v57, %v3098_v58  ;;  %v9918_v29 = vcombine.low %v3094_v57, %v3098_v58 }
 0x42a   :  { %5954 = vmatpush1.bf16.msra.mxu0 %v9860_v3  ;;  %6118 = vmatpush1.bf16.msra.mxu1 %v9862_v4  ;;  %v3105_v3 = vld [vmem:[%s15253_s5 + $0xb20] sm:$0xff]  ;;  %v3102_v4 = vld [vmem:[%s15253_s5 + $0xb08] sm:$0xff] }
 0x42b   :  { %5955 = vmatprep.subr.bf16.mxu0 %v9869_v5  ;;  %6119 = vmatprep.subr.bf16.mxu1 %v9871_v8  ;;  %v3106_v5 = vld [vmem:[%s15253_s5 + $0xb28] sm:$0xff]  ;;  %v9916_v8 = vcombine.low %v3093_v54, %v3097_v55  ;;  %v9925_v10 = vcombine.high %v3101_v2, %v3105_v3 }
 0x42c   :  { %v9927_v11 = vcombine.high %v3102_v4, %v3106_v5  ;;  %v9926_v18 = vcombine.low %v3102_v4, %v3106_v5 }
 0x42e   :  { %5956 = vmatpush1.bf16.msra.mxu0 %v9868_v14  ;;  %6120 = vmatpush1.bf16.msra.mxu1 %v9870_v15  ;;  %v3113_v14 = vld [vmem:[%s15253_s5 + $0xb60] sm:$0xff]  ;;  %v3110_v15 = vld [vmem:[%s15253_s5 + $0xb48] sm:$0xff] }
 0x42f   :  { %5957 = vmatprep.subr.bf16.mxu0 %v9877_v16  ;;  %6121 = vmatprep.subr.bf16.mxu1 %v9879_v41  ;;  %v3114_v16 = vld [vmem:[%s15253_s5 + $0xb68] sm:$0xff]  ;;  %v9924_v41 = vcombine.low %v3101_v2, %v3105_v3  ;;  %v9933_v19 = vcombine.high %v3109_v13, %v3113_v14  ;;  %v9932_v26 = vcombine.low %v3109_v13, %v3113_v14 }
 0x430   :  { %v9935_v20 = vcombine.high %v3110_v15, %v3114_v16  ;;  %v9934_v27 = vcombine.low %v3110_v15, %v3114_v16  ;;  %v9957_v3 = vcombine.high %v3133_v44, %v3137_v49  ;;  %v3142_v13 = vld [vmem:[%s15253_s5 + $0xc48] sm:$0xff]  ;;  %v9956_v16 = vcombine.low %v3133_v44, %v3137_v49 }
 0x431   :  { %v3146_v14 = vld [vmem:[%s15253_s5 + $0xc68] sm:$0xff] }
 0x432   :  { %5958 = vmatpush1.bf16.msra.mxu0 %v9876_v22  ;;  %6122 = vmatpush1.bf16.msra.mxu1 %v9878_v23  ;;  %v3121_v22 = vld [vmem:[%s15253_s5 + $0xba0] sm:$0xff]  ;;  %v3118_v23 = vld [vmem:[%s15253_s5 + $0xb88] sm:$0xff] }
 0x433   :  { %5959 = vmatprep.subr.bf16.mxu0 %v9885_v24  ;;  %6123 = vmatprep.subr.bf16.mxu1 %v9887_v25  ;;  %v3122_v24 = vld [vmem:[%s15253_s5 + $0xba8] sm:$0xff]  ;;  %v1103_v25 = vsub.s32 4, %v11686_v45  ;;  %v9941_v37 = vcombine.high %v3117_v21, %v3121_v22  ;;  %v9940_v39 = vcombine.low %v3117_v21, %v3121_v22  ;;  %v9967_v21 = vcombine.high %v3142_v13, %v3146_v14  ;;  %v3153_v22 = vld [vmem:[%s15253_s5 + $0xca0] sm:$0xff] }
 0x434   :  { %v3166_v44 = vld [vmem:[%s15253_s5 + $0xd08] sm:$0xff] }
 0x435   :  { %v1104_v38 = vrot.slane %v12708_v35, %v1103_v25 }
 0x436   :  { %5960 = vmatpush1.bf16.msra.mxu0 %v9884_v31  ;;  %6124 = vmatpush1.bf16.msra.mxu1 %v9886_v32  ;;  %v9943_v31 = vcombine.high %v3118_v23, %v3122_v24  ;;  %v1115_v32 = vsub.s32 7, %v11686_v45 }
 0x437   :  { %5961 = vmatprep.subr.bf16.mxu0 %v9893_v33  ;;  %6125 = vmatprep.subr.bf16.mxu1 %v9895_v6  ;;  %v3125_v33 = vld [vmem:[%s15253_s5 + $0xbc0] sm:$0xff] }
 0x438   :  { %v3129_v6 = vld [vmem:[%s15253_s5 + $0xbe0] sm:$0xff] }
 0x439   :  { %v9948_v58 = vcombine.low %v3125_v33, %v3129_v6 }
 0x43a   :  { %5962 = vmatpush1.bf16.msra.mxu0 %v9892_v40  ;;  %6126 = vmatpush1.bf16.msra.mxu1 %v9894_v56  ;;  %v9942_v40 = vcombine.low %v3118_v23, %v3122_v24  ;;  %v1108_v56 = vrot.slane %v12708_v35, %v1107_v30  ;;  %v3150_v23 = vld [vmem:[%s15253_s5 + $0xc88] sm:$0xff] }
 0x43b   :  { %5963 = vmatprep.subr.bf16.mxu0 %v9901_v42  ;;  %6127 = vmatprep.subr.bf16.mxu1 %v9903_v12  ;;  %v1116_v42 = vrot.slane %v12708_v35, %v1115_v32  ;;  %v9949_v12 = vcombine.high %v3125_v33, %v3129_v6  ;;  %v3154_v24 = vld [vmem:[%s15253_s5 + $0xca8] sm:$0xff]  ;;  %v3157_v6 = vld [vmem:[%s15253_s5 + $0xcc0] sm:$0xff] }
 0x43c   :  { %v9975_v33 = vcombine.high %v3150_v23, %v3154_v24 }
 0x43e   :  { %5964 = vmatpush1.bf16.msra.mxu0 %v9900_v50  ;;  %6128 = vmatpush1.bf16.msra.mxu1 %v9902_v51  ;;  %v3134_v50 = vld [vmem:[%s15253_s5 + $0xc08] sm:$0xff] }
 0x43f   :  { %5965 = vmatprep.subr.bf16.mxu0 %v9909_v52  ;;  %6129 = vmatprep.subr.bf16.mxu1 %v9911_v53  ;;  %v3138_v51 = vld [vmem:[%s15253_s5 + $0xc28] sm:$0xff] }
 0x440   :  { %v9959_v4 = vcombine.high %v3134_v50, %v3138_v51 }
 0x442   :  { %5966 = vmatpush1.bf16.msra.mxu0 %v9908_v59  ;;  %6130 = vmatpush1.bf16.msra.mxu1 %v9910_v61  ;;  %v9950_v59 = vcombine.low %v3126_v34, %v3130_v36  ;;  %v3161_v34 = vld [vmem:[%s15253_s5 + $0xce0] sm:$0xff]  ;;  %v3158_v36 = vld [vmem:[%s15253_s5 + $0xcc8] sm:$0xff] }
 0x443   :  { %5967 = vmatprep.subr.bf16.mxu0 %v9917_v62  ;;  %6131 = vmatprep.subr.bf16.mxu1 %v9919_v0  ;;  %v9980_v49 = vcombine.low %v3157_v6, %v3161_v34 }
 0x446   :  { %5968 = vmatpush1.bf16.msra.mxu0 %v9916_v8  ;;  %6132 = vmatpush1.bf16.msra.mxu1 %v9918_v29  ;;  %v3141_v29 = vld [vmem:[%s15253_s5 + $0xc40] sm:$0xff] }
 0x447   :  { %5969 = vmatprep.subr.bf16.mxu0 %v9925_v10  ;;  %6133 = vmatprep.subr.bf16.mxu1 %v9927_v11  ;;  %v3145_v11 = vld [vmem:[%s15253_s5 + $0xc60] sm:$0xff] }
 0x44a   :  { %5970 = vmatpush1.bf16.msra.mxu0 %v9924_v41  ;;  %6134 = vmatpush1.bf16.msra.mxu1 %v9926_v18  ;;  %v9958_v41 = vcombine.low %v3134_v50, %v3138_v51 }
 0x44b   :  { %5971 = vmatprep.subr.bf16.mxu0 %v9933_v19  ;;  %6135 = vmatprep.subr.bf16.mxu1 %v9935_v20  ;;  %v3149_v19 = vld [vmem:[%s15253_s5 + $0xc80] sm:$0xff]  ;;  %v9965_v20 = vcombine.high %v3141_v29, %v3145_v11 }
 0x44e   :  { %5972 = vmatpush1.bf16.msra.mxu0 %v9932_v26  ;;  %6136 = vmatpush1.bf16.msra.mxu1 %v9934_v27  ;;  %v9964_v27 = vcombine.low %v3141_v29, %v3145_v11  ;;  %v3189_v11 = vld [vmem:[%s15253_s5 + $0xdc0] sm:$0xff] }
 0x44f   :  { %5973 = vmatprep.subr.bf16.mxu0 %v9941_v37  ;;  %6137 = vmatprep.subr.bf16.mxu1 %v9943_v31  ;;  %v9966_v37 = vcombine.low %v3142_v13, %v3146_v14  ;;  %v9973_v31 = vcombine.high %v3149_v19, %v3153_v22  ;;  %v3193_v13 = vld [vmem:[%s15253_s5 + $0xde0] sm:$0xff]  ;;  %v3190_v14 = vld [vmem:[%s15253_s5 + $0xdc8] sm:$0xff] }
 0x450   :  { %v2644_v47 = vpop.f32.mrb[8].mxu0 }
 0x451   :  { %v10514_v35 = vadd.f32 %v2644_v47, %v1104_v38  ;;  %v13133_v52 = vpop.f32.mrb[16].mxu1  ;;  %v2646_v53 = vpop.f32.mrb[9].mxu0  ;;  %v3162_v38 = vld [vmem:[%s15253_s5 + $0xce8] sm:$0xff] }
 0x452   :  { %v10515_v54 = vadd.f32 %v2646_v53, %v1108_v56  ;;  %v2728_v55 = vpop.f32.mrb[17].mxu1  ;;  %5974 = vmatpush1.bf16.msra.mxu0 %v9940_v39  ;;  %6138 = vmatpush1.bf16.msra.mxu1 %v9942_v40  ;;  %v2648_v57 = vpop.f32.mrb[10].mxu0  ;;  %v9972_v39 = vcombine.low %v3149_v19, %v3153_v22  ;;  %v9974_v40 = vcombine.low %v3150_v23, %v3154_v24  ;;  %v3170_v47 = vld [vmem:[%s15253_s5 + $0xd28] sm:$0xff]  ;;  %v3173_v53 = vld [vmem:[%s15253_s5 + $0xd40] sm:$0xff] }
 0x453   :  { %v2737_v61 = vmax.f32 %v10514_v35, 0.0  ;;  %v10517_v62 = vadd.f32 %v2728_v55, %v1116_v42  ;;  %v2730_v0 = vpop.f32.mrb[18].mxu1  ;;  %v2649_v2 = vpop.f32.mrb[11].mxu0  ;;  %5975 = vmatprep.subr.bf16.mxu0 %v9949_v12  ;;  %6139 = vmatprep.subr.bf16.mxu1 %v9951_v43  ;;  %v9981_v56 = vcombine.high %v3157_v6, %v3161_v34  ;;  %v9983_v42 = vcombine.high %v3158_v36, %v3162_v38  ;;  %v3165_v12 = vld [vmem:[%s15253_s5 + $0xd00] sm:$0xff]  ;;  %v3174_v55 = vld [vmem:[%s15253_s5 + $0xd48] sm:$0xff] }
 0x454   :  { %v2738_v5 = vmax.f32 %v10515_v54, 0.0  ;;  %v2731_v8 = vpop.f32.mrb[19].mxu1  ;;  %v3169_v43 = vld [vmem:[%s15253_s5 + $0xd20] sm:$0xff]  ;;  %v9982_v50 = vcombine.low %v3158_v36, %v3162_v38  ;;  %v9991_v35 = vcombine.high %v3166_v44, %v3170_v47  ;;  %v3178_v57 = vld [vmem:[%s15253_s5 + $0xd68] sm:$0xff] }
 0x455   :  { %v2740_v10 = vmax.f32 %v10517_v62, 0.0  ;;  %v13149_v18 = vpack.c.bf16 %v2737_v61, %v2737_v61  ;;  %v9989_v51 = vcombine.high %v3165_v12, %v3169_v43  ;;  %v3177_v54 = vld [vmem:[%s15253_s5 + $0xd60] sm:$0xff]  ;;  %v9999_v62 = vcombine.high %v3174_v55, %v3178_v57  ;;  %v3198_v24 = vld [vmem:[%s15253_s5 + $0xe08] sm:$0xff] }
 0x456   :  { %v13147_v15 = vpack.c.bf16 %v2738_v5, %v2738_v5  ;;  %5976 = vmatpush1.bf16.msra.mxu0 %v9948_v58  ;;  %6140 = vmatpush1.bf16.msra.mxu1 %v9950_v59  ;;  %v9988_v58 = vcombine.low %v3165_v12, %v3169_v43  ;;  %v9990_v59 = vcombine.low %v3166_v44, %v3170_v47  ;;  %v3181_v0 = vld [vmem:[%s15253_s5 + $0xd80] sm:$0xff]  ;;  %v3206_v38 = vld [vmem:[%s15253_s5 + $0xe48] sm:$0xff] }
 0x457   :  { %5986 = vmatprep.subr.bf16.mxu0 %v9957_v3  ;;  %6150 = vmatprep.subr.bf16.mxu1 %v9959_v4  ;;  %v13165_v26 = vpack.c.bf16 %v2740_v10, %v2740_v10  ;;  %v9997_v61 = vcombine.high %v3173_v53, %v3177_v54  ;;  %v3185_v2 = vld [vmem:[%s15253_s5 + $0xda0] sm:$0xff]  ;;  %v3182_v3 = vld [vmem:[%s15253_s5 + $0xd88] sm:$0xff]  ;;  %v9996_v5 = vcombine.low %v3173_v53, %v3177_v54 }
 0x458   :  { %5977 = vmatprep.mubr.bf16.mxu0 %v13147_v15  ;;  %6141 = vmatprep.mubr.bf16.mxu1 %v13147_v15  ;;  %v3186_v4 = vld [vmem:[%s15253_s5 + $0xda8] sm:$0xff]  ;;  %v9998_v8 = vcombine.low %v3174_v55, %v3178_v57  ;;  %v10005_v29 = vcombine.high %v3181_v0, %v3185_v2  ;;  %v3197_v22 = vld [vmem:[%s15253_s5 + $0xe00] sm:$0xff] }
 0x459   :  { %5978 = vmatmul.mubr.bf16.vlgmr.msra.gmra.mrb[12].mxu0 %v13149_v18  ;;  %6142 = vmatmul.mubr.bf16.vlgmr.msra.gmra.mrb[20].mxu1 %v13149_v18  ;;  %v10007_v10 = vcombine.high %v3182_v3, %v3186_v4  ;;  %v10006_v19 = vcombine.low %v3182_v3, %v3186_v4  ;;  %v3201_v23 = vld [vmem:[%s15253_s5 + $0xe20] sm:$0xff]  ;;  %v3214_v47 = vld [vmem:[%s15253_s5 + $0xe88] sm:$0xff] }
 0x45a   :  { %5987 = vmatpush1.bf16.msra.mxu0 %v9956_v16  ;;  %6151 = vmatpush1.bf16.msra.mxu1 %v9958_v41  ;;  %v3194_v16 = vld [vmem:[%s15253_s5 + $0xde8] sm:$0xff]  ;;  %v10004_v41 = vcombine.low %v3181_v0, %v3185_v2  ;;  %v3205_v34 = vld [vmem:[%s15253_s5 + $0xe40] sm:$0xff] }
 0x45b   :  { %6018 = vmatprep.mubr.bf16.mxu0 %v13165_v26  ;;  %6182 = vmatprep.mubr.bf16.mxu1 %v13165_v26  ;;  %v3209_v36 = vld [vmem:[%s15253_s5 + $0xe60] sm:$0xff]  ;;  %v3222_v57 = vld [vmem:[%s15253_s5 + $0xec8] sm:$0xff] }
 0x45c   :  { %5988 = vmatprep.subr.bf16.mxu0 %v9965_v20  ;;  %6152 = vmatprep.subr.bf16.mxu1 %v9967_v21  ;;  %v10013_v20 = vcombine.high %v3189_v11, %v3193_v13  ;;  %v10015_v21 = vcombine.high %v3190_v14, %v3194_v16  ;;  %v3213_v43 = vld [vmem:[%s15253_s5 + $0xe80] sm:$0xff]  ;;  %v3230_v4 = vld [vmem:[%s15253_s5 + $0xf08] sm:$0xff] }
 0x45d   :  { %v3217_v44 = vld [vmem:[%s15253_s5 + $0xea0] sm:$0xff] }
 0x45e   :  { %5989 = vmatpush1.bf16.msra.mxu0 %v9964_v27  ;;  %6153 = vmatpush1.bf16.msra.mxu1 %v9966_v37  ;;  %v3202_v27 = vld [vmem:[%s15253_s5 + $0xe28] sm:$0xff]  ;;  %v10012_v37 = vcombine.low %v3189_v11, %v3193_v13  ;;  %v3221_v54 = vld [vmem:[%s15253_s5 + $0xec0] sm:$0xff] }
 0x45f   :  { %5990 = vmatprep.subr.bf16.mxu0 %v9973_v31  ;;  %6154 = vmatprep.subr.bf16.mxu1 %v9975_v33  ;;  %v10014_v31 = vcombine.low %v3190_v14, %v3194_v16  ;;  %v10021_v33 = vcombine.high %v3197_v22, %v3201_v23  ;;  %v10023_v6 = vcombine.high %v3198_v24, %v3202_v27  ;;  %v3225_v55 = vld [vmem:[%s15253_s5 + $0xee0] sm:$0xff]  ;;  %v3238_v16 = vld [vmem:[%s15253_s5 + $0xf48] sm:$0xff] }
 0x460   :  { %v3229_v2 = vld [vmem:[%s15253_s5 + $0xf00] sm:$0xff] }
 0x461   :  { %v3233_v3 = vld [vmem:[%s15253_s5 + $0xf20] sm:$0xff] }
 0x462   :  { %5991 = vmatpush1.bf16.msra.mxu0 %v9972_v39  ;;  %6155 = vmatpush1.bf16.msra.mxu1 %v9974_v40  ;;  %v3210_v39 = vld [vmem:[%s15253_s5 + $0xe68] sm:$0xff]  ;;  %v10020_v40 = vcombine.low %v3197_v22, %v3201_v23  ;;  %v3237_v13 = vld [vmem:[%s15253_s5 + $0xf40] sm:$0xff] }
 0x463   :  { %5992 = vmatprep.subr.bf16.mxu0 %v9981_v56  ;;  %6156 = vmatprep.subr.bf16.mxu1 %v9983_v42  ;;  %v10022_v56 = vcombine.low %v3198_v24, %v3202_v27  ;;  %v10029_v42 = vcombine.high %v3205_v34, %v3209_v36  ;;  %v10031_v12 = vcombine.high %v3206_v38, %v3210_v39  ;;  %v3241_v14 = vld [vmem:[%s15253_s5 + $0xf60] sm:$0xff] }
 0x464   :  { %v10061_v22 = vcombine.high %v3237_v13, %v3241_v14  ;;  %v3245_v24 = vld [vmem:[%s15253_s5 + $0xf80] sm:$0xff] }
 0x465   :  { %v3249_v27 = vld [vmem:[%s15253_s5 + $0xfa0] sm:$0xff] }
 0x466   :  { %5993 = vmatpush1.bf16.msra.mxu0 %v9980_v49  ;;  %6157 = vmatpush1.bf16.msra.mxu1 %v9982_v50  ;;  %v3218_v49 = vld [vmem:[%s15253_s5 + $0xea8] sm:$0xff]  ;;  %v10028_v50 = vcombine.low %v3205_v34, %v3209_v36  ;;  %v11264_v34 = vld [vmem:[%s15261_s13] sm:$0xff] }
 0x467   :  { %5994 = vmatprep.subr.bf16.mxu0 %v9989_v51  ;;  %6158 = vmatprep.subr.bf16.mxu1 %v9991_v35  ;;  %v10030_v51 = vcombine.low %v3206_v38, %v3210_v39  ;;  %v10037_v35 = vcombine.high %v3213_v43, %v3217_v44  ;;  %v10039_v53 = vcombine.high %v3214_v47, %v3218_v49 }
 0x468   :  { %v10069_v38 = vcombine.high %v3245_v24, %v3249_v27 }
 0x46a   :  { %5995 = vmatpush1.bf16.msra.mxu0 %v9988_v58  ;;  %6159 = vmatpush1.bf16.msra.mxu1 %v9990_v59  ;;  %v3226_v58 = vld [vmem:[%s15253_s5 + $0xee8] sm:$0xff]  ;;  %v10036_v59 = vcombine.low %v3213_v43, %v3217_v44  ;;  %v10068_v43 = vcombine.low %v3245_v24, %v3249_v27  ;;  %v2776_v24 = vld [vmem:[%s15253_s5 + $0xd8] sm:$0xff] }
 0x46b   :  { %5996 = vmatprep.subr.bf16.mxu0 %v9997_v61  ;;  %6160 = vmatprep.subr.bf16.mxu1 %v9999_v62  ;;  %v10038_v61 = vcombine.low %v3214_v47, %v3218_v49  ;;  %v10045_v62 = vcombine.high %v3221_v54, %v3225_v55  ;;  %v10047_v0 = vcombine.high %v3222_v57, %v3226_v58 }
 0x46e   :  { %5997 = vmatpush1.bf16.msra.mxu0 %v9996_v5  ;;  %6161 = vmatpush1.bf16.msra.mxu1 %v9998_v8  ;;  %v3234_v5 = vld [vmem:[%s15253_s5 + $0xf28] sm:$0xff]  ;;  %v10044_v8 = vcombine.low %v3221_v54, %v3225_v55 }
 0x46f   :  { %5998 = vmatprep.subr.bf16.mxu0 %v10005_v29  ;;  %6162 = vmatprep.subr.bf16.mxu1 %v10007_v10  ;;  %v10046_v29 = vcombine.low %v3222_v57, %v3226_v58  ;;  %v10053_v10 = vcombine.high %v3229_v2, %v3233_v3  ;;  %v10055_v11 = vcombine.high %v3230_v4, %v3234_v5 }
 0x472   :  { %5999 = vmatpush1.bf16.msra.mxu0 %v10004_v41  ;;  %6163 = vmatpush1.bf16.msra.mxu1 %v10006_v19  ;;  %v3242_v41 = vld [vmem:[%s15253_s5 + $0xf68] sm:$0xff]  ;;  %v10052_v19 = vcombine.low %v3229_v2, %v3233_v3  ;;  %v2764_v2 = vld [vmem:[%s15253_s5 + $0x78] sm:$0xff] }
 0x473   :  { %6000 = vmatprep.subr.bf16.mxu0 %v10013_v20  ;;  %6164 = vmatprep.subr.bf16.mxu1 %v10015_v21  ;;  %v10054_v20 = vcombine.low %v3230_v4, %v3234_v5  ;;  %v1111_v21 = vsub.s32 6, %v11686_v45  ;;  %v10063_v23 = vcombine.high %v3238_v16, %v3242_v41  ;;  %v11131_v45 = vld [vmem:[%s15254_s6 + $0x7c8] ss:$16 sps:$4 sm:$0xff]  }
 0x475   :  { %v1112_v36 = vrot.slane %v11264_v34, %v1111_v21  ;;  %v2787_v34 = vld [vmem:[%s15253_s5 + $0x130] sm:$0xff] }
 0x476   :  { %6001 = vmatpush1.bf16.msra.mxu0 %v10012_v37  ;;  %6165 = vmatpush1.bf16.msra.mxu1 %v10014_v31  ;;  %v3246_v37 = vld [vmem:[%s15253_s5 + $0xf88] sm:$0xff] }
 0x477   :  { %6002 = vmatprep.subr.bf16.mxu0 %v10021_v33  ;;  %6166 = vmatprep.subr.bf16.mxu1 %v10023_v6  ;;  %v3250_v31 = vld [vmem:[%s15253_s5 + $0xfa8] sm:$0xff]  ;;  %v10060_v33 = vcombine.low %v3237_v13, %v3241_v14  ;;  %v10062_v6 = vcombine.low %v3238_v16, %v3242_v41  ;;  %v10516_v47 = vadd.f32 %v13133_v52, %v1112_v36  ;;  %v2756_v52 = vld [vmem:[%s15253_s5 + $0x38] sm:$0xff] }
 0x478   :  { %v10071_v39 = vcombine.high %v3246_v37, %v3250_v31  ;;  %v10070_v44 = vcombine.low %v3246_v37, %v3250_v31  ;;  %v2768_v13 = vld [vmem:[%s15253_s5 + $0x98] sm:$0xff] }
 0x479   :  { %v2739_v57 = vmax.f32 %v10516_v47, 0.0  ;;  %v2772_v14 = vld [vmem:[%s15253_s5 + $0xb8] sm:$0xff] }
 0x47a   :  { %6003 = vmatpush1.bf16.msra.mxu0 %v10020_v40  ;;  %6167 = vmatpush1.bf16.msra.mxu1 %v10022_v56  ;;  %v3253_v40 = vld [vmem:[%s15253_s5 + $0xfc0] sm:$0xff]  ;;  %v9594_v37 = vcombine.low %v2768_v13, %v2772_v14  ;;  %v2784_v36 = vld [vmem:[%s15253_s5 + $0x118] sm:$0xff] }
 0x47b   :  { %6004 = vmatprep.subr.bf16.mxu0 %v10029_v42  ;;  %6168 = vmatprep.subr.bf16.mxu1 %v10031_v12  ;;  %v3257_v56 = vld [vmem:[%s15253_s5 + $0xfe0] sm:$0xff]  ;;  %v3254_v42 = vld [vmem:[%s15253_s5 + $0xfc8] sm:$0xff]  ;;  %v13358_v4 = vpack.c.bf16 %v2739_v57, %v2739_v57  ;;  %v2796_v47 = vld [vmem:[%s15253_s5 + $0x178] sm:$0xff] }
 0x47c   :  { %v3258_v12 = vld [vmem:[%s15253_s5 + $0xfe8] sm:$0xff]  ;;  %v10077_v49 = vcombine.high %v3253_v40, %v3257_v56  ;;  %v10076_v54 = vcombine.low %v3253_v40, %v3257_v56 }
 0x47d   :  { %v10078_v55 = vcombine.low %v3254_v42, %v3258_v12 }
 0x47e   :  { %6005 = vmatpush1.bf16.msra.mxu0 %v10028_v50  ;;  %6169 = vmatpush1.bf16.msra.mxu1 %v10030_v51  ;;  %v10079_v50 = vcombine.high %v3254_v42, %v3258_v12  ;;  %v2751_v51 = vld [vmem:[%s15253_s5 + $0x10] sm:$0xff] }
 0x47f   :  { %6006 = vmatprep.subr.bf16.mxu0 %v10037_v35  ;;  %6170 = vmatprep.subr.bf16.mxu1 %v10039_v53  ;;  %v2755_v35 = vld [vmem:[%s15253_s5 + $0x30] sm:$0xff]  ;;  %v2752_v53 = vld [vmem:[%s15253_s5 + $0x18] sm:$0xff] }
 0x480   :  { %v9577_v58 = vcombine.high %v2751_v51, %v2755_v35  ;;  %v9576_v3 = vcombine.low %v2751_v51, %v2755_v35  ;;  %v9578_v5 = vcombine.low %v2752_v53, %v2756_v52  ;;  %v2791_v12 = vld [vmem:[%s15253_s5 + $0x150] sm:$0xff] }
 0x482   :  { %6007 = vmatpush1.bf16.msra.mxu0 %v10036_v59  ;;  %6171 = vmatpush1.bf16.msra.mxu1 %v10038_v61  ;;  %v9579_v59 = vcombine.high %v2752_v53, %v2756_v52  ;;  %v2759_v61 = vld [vmem:[%s15253_s5 + $0x50] sm:$0xff] }
 0x483   :  { %6008 = vmatprep.subr.bf16.mxu0 %v10045_v62  ;;  %6172 = vmatprep.subr.bf16.mxu1 %v10047_v0  ;;  %v2763_v62 = vld [vmem:[%s15253_s5 + $0x70] sm:$0xff]  ;;  %v2760_v0 = vld [vmem:[%s15253_s5 + $0x58] sm:$0xff] }
 0x484   :  { %v9584_v16 = vcombine.low %v2759_v61, %v2763_v62  ;;  %v9586_v41 = vcombine.low %v2760_v0, %v2764_v2  ;;  %v2799_v53 = vld [vmem:[%s15253_s5 + $0x190] sm:$0xff] }
 0x485   :  { %v2803_v52 = vld [vmem:[%s15253_s5 + $0x1b0] sm:$0xff] }
 0x486   :  { %6009 = vmatpush1.bf16.msra.mxu0 %v10044_v8  ;;  %6173 = vmatpush1.bf16.msra.mxu1 %v10046_v29  ;;  %v9585_v8 = vcombine.high %v2759_v61, %v2763_v62  ;;  %v9587_v29 = vcombine.high %v2760_v0, %v2764_v2  ;;  %v2807_v62 = vld [vmem:[%s15253_s5 + $0x1d0] sm:$0xff]  ;;  %v2808_v2 = vld [vmem:[%s15253_s5 + $0x1d8] sm:$0xff] }
 0x487   :  { %6010 = vmatprep.subr.bf16.mxu0 %v10053_v10  ;;  %6174 = vmatprep.subr.bf16.mxu1 %v10055_v11  ;;  %v2767_v10 = vld [vmem:[%s15253_s5 + $0x90] sm:$0xff] }
 0x488   :  { %v2771_v11 = vld [vmem:[%s15253_s5 + $0xb0] sm:$0xff] }
 0x489   :  { %v9592_v27 = vcombine.low %v2767_v10, %v2771_v11  ;;  %v2811_v0 = vld [vmem:[%s15253_s5 + $0x1f0] sm:$0xff] }
 0x48a   :  { %6011 = vmatpush1.bf16.msra.mxu0 %v10052_v19  ;;  %6175 = vmatpush1.bf16.msra.mxu1 %v10054_v20  ;;  %v9593_v19 = vcombine.high %v2767_v10, %v2771_v11  ;;  %v9595_v20 = vcombine.high %v2768_v13, %v2772_v14  ;;  %v2815_v11 = vld [vmem:[%s15253_s5 + $0x210] sm:$0xff]  ;;  %v2816_v14 = vld [vmem:[%s15253_s5 + $0x218] sm:$0xff] }
 0x48b   :  { %6012 = vmatprep.subr.bf16.mxu0 %v10061_v22  ;;  %6176 = vmatprep.subr.bf16.mxu1 %v10063_v23  ;;  %v2775_v22 = vld [vmem:[%s15253_s5 + $0xd0] sm:$0xff] }
 0x48c   :  { %v2779_v23 = vld [vmem:[%s15253_s5 + $0xf0] sm:$0xff] }
 0x48d   :  { %v9601_v31 = vcombine.high %v2775_v22, %v2779_v23  ;;  %v2819_v13 = vld [vmem:[%s15253_s5 + $0x230] sm:$0xff] }
 0x48e   :  { %6013 = vmatpush1.bf16.msra.mxu0 %v10060_v33  ;;  %6177 = vmatpush1.bf16.msra.mxu1 %v10062_v6  ;;  %v2783_v6 = vld [vmem:[%s15253_s5 + $0x110] sm:$0xff] }
 0x48f   :  { %6014 = vmatprep.subr.bf16.mxu0 %v10069_v38  ;;  %6178 = vmatprep.subr.bf16.mxu1 %v10071_v39  ;;  %v2788_v38 = vld [vmem:[%s15253_s5 + $0x138] sm:$0xff]  ;;  %v9600_v39 = vcombine.low %v2775_v22, %v2779_v23  ;;  %v9609_v56 = vcombine.high %v2783_v6, %v2787_v34  ;;  %v2823_v23 = vld [vmem:[%s15253_s5 + $0x250] sm:$0xff] }
 0x490   :  { %v9611_v42 = vcombine.high %v2784_v36, %v2788_v38 }
 0x492   :  { %6015 = vmatpush1.bf16.msra.mxu0 %v10068_v43  ;;  %6179 = vmatpush1.bf16.msra.mxu1 %v10070_v44  ;;  %v2795_v43 = vld [vmem:[%s15253_s5 + $0x170] sm:$0xff]  ;;  %v2792_v44 = vld [vmem:[%s15253_s5 + $0x158] sm:$0xff] }
 0x493   :  { %6016 = vmatprep.subr.bf16.mxu0 %v10077_v49  ;;  %6180 = vmatprep.subr.bf16.mxu1 %v10079_v50  ;;  %v9608_v49 = vcombine.low %v2783_v6, %v2787_v34  ;;  %v9610_v50 = vcombine.low %v2784_v36, %v2788_v38  ;;  %v9617_v51 = vcombine.high %v2791_v12, %v2795_v43  ;;  %v2831_v34 = vld [vmem:[%s15253_s5 + $0x290] sm:$0xff]  ;;  %v2832_v38 = vld [vmem:[%s15253_s5 + $0x298] sm:$0xff] }
 0x494   :  { %v9619_v35 = vcombine.high %v2792_v44, %v2796_v47  ;;  %v9616_v57 = vcombine.low %v2791_v12, %v2795_v43  ;;  %v2835_v36 = vld [vmem:[%s15253_s5 + $0x2b0] sm:$0xff] }
 0x495   :  { %v2839_v43 = vld [vmem:[%s15253_s5 + $0x2d0] sm:$0xff] }
 0x496   :  { %6017 = vmatpush1.bf16.msra.mxu0 %v10076_v54  ;;  %6181 = vmatpush1.bf16.msra.mxu1 %v10078_v55  ;;  %v2800_v54 = vld [vmem:[%s15253_s5 + $0x198] sm:$0xff] }
 0x497   :  { %6191 = vmatprep.subr.bf16.mxu0 %v9577_v58  ;;  %6355 = vmatprep.subr.bf16.mxu1 %v9579_v59  ;;  %v2804_v55 = vld [vmem:[%s15253_s5 + $0x1b8] sm:$0xff]  ;;  %v9618_v58 = vcombine.low %v2792_v44, %v2796_v47  ;;  %v9625_v59 = vcombine.high %v2799_v53, %v2803_v52  ;;  %v2843_v44 = vld [vmem:[%s15253_s5 + $0x2f0] sm:$0xff] }
 0x498   :  { %v9627_v61 = vcombine.high %v2800_v54, %v2804_v55  ;;  %v2840_v47 = vld [vmem:[%s15253_s5 + $0x2d8] sm:$0xff] }
 0x499   :  { %6019 = vmatmul.mubr.bf16.vlgmr.msra.gmra.mrb[12].mxu0 %v13358_v4  ;;  %6183 = vmatmul.mubr.bf16.vlgmr.msra.gmra.mrb[20].mxu1 %v13358_v4 }
 0x49a   :  { %6192 = vmatpush1.bf16.msra.mxu0 %v9576_v3  ;;  %6223 = vmatprep.mubr.bf16.mxu0 %v12730_v60  ;;  %v2812_v3 = vld [vmem:[%s15253_s5 + $0x1f8] sm:$0xff] }
 0x49b   :  { %6356 = vmatpush1.bf16.msra.mxu1 %v9578_v5  ;;  %6387 = vmatprep.mubr.bf16.mxu1 %v12730_v60  ;;  %v2780_v60 = vld [vmem:[%s15253_s5 + $0xf8] sm:$0xff]  ;;  %v9624_v5 = vcombine.low %v2799_v53, %v2803_v52  ;;  %v9635_v10 = vcombine.high %v2808_v2, %v2812_v3  ;;  %v2847_v52 = vld [vmem:[%s15253_s5 + $0x310] sm:$0xff] }
 0x49c   :  { %6193 = vmatprep.subr.bf16.mxu0 %v9585_v8  ;;  %6357 = vmatprep.subr.bf16.mxu1 %v9587_v29  ;;  %v9603_v33 = vcombine.high %v2776_v24, %v2780_v60  ;;  %v9602_v40 = vcombine.low %v2776_v24, %v2780_v60  ;;  %v9626_v8 = vcombine.low %v2800_v54, %v2804_v55  ;;  %v2827_v24 = vld [vmem:[%s15253_s5 + $0x270] sm:$0xff]  ;;  %v2824_v60 = vld [vmem:[%s15253_s5 + $0x258] sm:$0xff] }
 0x49d   :  { %v9633_v29 = vcombine.high %v2807_v62, %v2811_v0  ;;  %v2851_v54 = vld [vmem:[%s15253_s5 + $0x330] sm:$0xff]  ;;  %v2848_v55 = vld [vmem:[%s15253_s5 + $0x318] sm:$0xff] }
 0x49e   :  { %6194 = vmatpush1.bf16.msra.mxu0 %v9584_v16  ;;  %v2820_v16 = vld [vmem:[%s15253_s5 + $0x238] sm:$0xff] }
 0x49f   :  { %6358 = vmatpush1.bf16.msra.mxu1 %v9586_v41  ;;  %6195 = vmatprep.subr.bf16.mxu0 %v9593_v19  ;;  %v9632_v41 = vcombine.low %v2807_v62, %v2811_v0  ;;  %v9634_v19 = vcombine.low %v2808_v2, %v2812_v3  ;;  %v9643_v22 = vcombine.high %v2816_v14, %v2820_v16  ;;  %v2855_v0 = vld [vmem:[%s15253_s5 + $0x350] sm:$0xff]  ;;  %v2856_v3 = vld [vmem:[%s15253_s5 + $0x358] sm:$0xff] }
 0x4a0   :  { %6359 = vmatprep.subr.bf16.mxu1 %v9595_v20  ;;  %v9641_v20 = vcombine.high %v2815_v11, %v2819_v13  ;;  %v2859_v2 = vld [vmem:[%s15253_s5 + $0x370] sm:$0xff] }
 0x4a2   :  { %6196 = vmatpush1.bf16.msra.mxu0 %v9592_v27  ;;  %v2828_v27 = vld [vmem:[%s15253_s5 + $0x278] sm:$0xff] }
 0x4a3   :  { %6360 = vmatpush1.bf16.msra.mxu1 %v9594_v37  ;;  %6197 = vmatprep.subr.bf16.mxu0 %v9601_v31  ;;  %v9640_v37 = vcombine.low %v2815_v11, %v2819_v13  ;;  %v9642_v31 = vcombine.low %v2816_v14, %v2820_v16  ;;  %v9651_v6 = vcombine.high %v2824_v60, %v2828_v27  ;;  %v2863_v13 = vld [vmem:[%s15253_s5 + $0x390] sm:$0xff]  ;;  %v2864_v16 = vld [vmem:[%s15253_s5 + $0x398] sm:$0xff] }
 0x4a4   :  { %6361 = vmatprep.subr.bf16.mxu1 %v9603_v33  ;;  %v9649_v33 = vcombine.high %v2823_v23, %v2827_v24  ;;  %v2867_v14 = vld [vmem:[%s15253_s5 + $0x3b0] sm:$0xff] }
 0x4a6   :  { %6198 = vmatpush1.bf16.msra.mxu0 %v9600_v39  ;;  %v2836_v39 = vld [vmem:[%s15253_s5 + $0x2b8] sm:$0xff] }
 0x4a7   :  { %6362 = vmatpush1.bf16.msra.mxu1 %v9602_v40  ;;  %6199 = vmatprep.subr.bf16.mxu0 %v9609_v56  ;;  %v9648_v40 = vcombine.low %v2823_v23, %v2827_v24  ;;  %v9650_v56 = vcombine.low %v2824_v60, %v2828_v27  ;;  %v9659_v12 = vcombine.high %v2832_v38, %v2836_v39  ;;  %v2871_v24 = vld [vmem:[%s15253_s5 + $0x3d0] sm:$0xff]  ;;  %v2872_v27 = vld [vmem:[%s15253_s5 + $0x3d8] sm:$0xff] }
 0x4a8   :  { %6363 = vmatprep.subr.bf16.mxu1 %v9611_v42  ;;  %v9657_v42 = vcombine.high %v2831_v34, %v2835_v36  ;;  %v2875_v60 = vld [vmem:[%s15253_s5 + $0x3f0] sm:$0xff] }
 0x4aa   :  { %6200 = vmatpush1.bf16.msra.mxu0 %v9608_v49  ;;  %v2844_v49 = vld [vmem:[%s15253_s5 + $0x2f8] sm:$0xff] }
 0x4ab   :  { %6364 = vmatpush1.bf16.msra.mxu1 %v9610_v50  ;;  %6201 = vmatprep.subr.bf16.mxu0 %v9617_v51  ;;  %v9656_v50 = vcombine.low %v2831_v34, %v2835_v36  ;;  %v9658_v51 = vcombine.low %v2832_v38, %v2836_v39  ;;  %v9667_v53 = vcombine.high %v2840_v47, %v2844_v49  ;;  %v2879_v36 = vld [vmem:[%s15253_s5 + $0x410] sm:$0xff]  ;;  %v2880_v39 = vld [vmem:[%s15253_s5 + $0x418] sm:$0xff] }
 0x4ac   :  { %6365 = vmatprep.subr.bf16.mxu1 %v9619_v35  ;;  %v9665_v35 = vcombine.high %v2839_v43, %v2843_v44  ;;  %v2883_v38 = vld [vmem:[%s15253_s5 + $0x430] sm:$0xff] }
 0x4ae   :  { %6202 = vmatpush1.bf16.msra.mxu0 %v9616_v57  ;;  %v2852_v57 = vld [vmem:[%s15253_s5 + $0x338] sm:$0xff] }
 0x4af   :  { %6366 = vmatpush1.bf16.msra.mxu1 %v9618_v58  ;;  %6203 = vmatprep.subr.bf16.mxu0 %v9625_v59  ;;  %v9664_v58 = vcombine.low %v2839_v43, %v2843_v44  ;;  %v9666_v59 = vcombine.low %v2840_v47, %v2844_v49  ;;  %v9675_v62 = vcombine.high %v2848_v55, %v2852_v57  ;;  %v2887_v44 = vld [vmem:[%s15253_s5 + $0x450] sm:$0xff] }
 0x4b0   :  { %6367 = vmatprep.subr.bf16.mxu1 %v9627_v61  ;;  %v9673_v61 = vcombine.high %v2847_v52, %v2851_v54  ;;  %v2891_v47 = vld [vmem:[%s15253_s5 + $0x470] sm:$0xff]  ;;  %v9704_v49 = vcombine.low %v2879_v36, %v2883_v38 }
 0x4b2   :  { %6204 = vmatpush1.bf16.msra.mxu0 %v9624_v5  ;;  %v2860_v5 = vld [vmem:[%s15253_s5 + $0x378] sm:$0xff] }
 0x4b3   :  { %6368 = vmatpush1.bf16.msra.mxu1 %v9626_v8  ;;  %6205 = vmatprep.subr.bf16.mxu0 %v9633_v29  ;;  %v9672_v8 = vcombine.low %v2847_v52, %v2851_v54  ;;  %v9674_v29 = vcombine.low %v2848_v55, %v2852_v57  ;;  %v9683_v11 = vcombine.high %v2856_v3, %v2860_v5  ;;  %v2895_v52 = vld [vmem:[%s15253_s5 + $0x490] sm:$0xff]  ;;  %v2896_v57 = vld [vmem:[%s15253_s5 + $0x498] sm:$0xff] }
 0x4b4   :  { %6369 = vmatprep.subr.bf16.mxu1 %v9635_v10  ;;  %v9681_v10 = vcombine.high %v2855_v0, %v2859_v2  ;;  %v2899_v54 = vld [vmem:[%s15253_s5 + $0x4b0] sm:$0xff] }
 0x4b6   :  { %6206 = vmatpush1.bf16.msra.mxu0 %v9632_v41  ;;  %v2868_v41 = vld [vmem:[%s15253_s5 + $0x3b8] sm:$0xff] }
 0x4b7   :  { %6370 = vmatpush1.bf16.msra.mxu1 %v9634_v19  ;;  %6207 = vmatprep.subr.bf16.mxu0 %v9641_v20  ;;  %v9680_v19 = vcombine.low %v2855_v0, %v2859_v2  ;;  %v9682_v20 = vcombine.low %v2856_v3, %v2860_v5  ;;  %v9691_v23 = vcombine.high %v2864_v16, %v2868_v41  ;;  %v2903_v2 = vld [vmem:[%s15253_s5 + $0x4d0] sm:$0xff]  ;;  %v2908_v5 = vld [vmem:[%s15253_s5 + $0x4f8] sm:$0xff] }
 0x4b8   :  { %6371 = vmatprep.subr.bf16.mxu1 %v9643_v22  ;;  %v9689_v22 = vcombine.high %v2863_v13, %v2867_v14  ;;  %v2907_v3 = vld [vmem:[%s15253_s5 + $0x4f0] sm:$0xff] }
 0x4ba   :  { %6208 = vmatpush1.bf16.msra.mxu0 %v9640_v37  ;;  %v2876_v37 = vld [vmem:[%s15253_s5 + $0x3f8] sm:$0xff] }
 0x4bb   :  { %6372 = vmatpush1.bf16.msra.mxu1 %v9642_v31  ;;  %6209 = vmatprep.subr.bf16.mxu0 %v9649_v33  ;;  %v9688_v31 = vcombine.low %v2863_v13, %v2867_v14  ;;  %v9690_v33 = vcombine.low %v2864_v16, %v2868_v41  ;;  %v9699_v34 = vcombine.high %v2872_v27, %v2876_v37  ;;  %v2915_v13 = vld [vmem:[%s15253_s5 + $0x530] sm:$0xff]  ;;  %v2912_v14 = vld [vmem:[%s15253_s5 + $0x518] sm:$0xff] }
 0x4bc   :  { %6373 = vmatprep.subr.bf16.mxu1 %v9651_v6  ;;  %v9697_v6 = vcombine.high %v2871_v24, %v2875_v60  ;;  %v2916_v16 = vld [vmem:[%s15253_s5 + $0x538] sm:$0xff]  ;;  %v9728_v41 = vcombine.low %v2903_v2, %v2907_v3 }
 0x4be   :  { %6210 = vmatpush1.bf16.msra.mxu0 %v9648_v40  ;;  %v2884_v40 = vld [vmem:[%s15253_s5 + $0x438] sm:$0xff] }
 0x4bf   :  { %6374 = vmatpush1.bf16.msra.mxu1 %v9650_v56  ;;  %6211 = vmatprep.subr.bf16.mxu0 %v9657_v42  ;;  %v9696_v56 = vcombine.low %v2871_v24, %v2875_v60  ;;  %v9698_v42 = vcombine.low %v2872_v27, %v2876_v37  ;;  %v9707_v43 = vcombine.high %v2880_v39, %v2884_v40  ;;  %v2923_v24 = vld [vmem:[%s15253_s5 + $0x570] sm:$0xff]  ;;  %v2920_v60 = vld [vmem:[%s15253_s5 + $0x558] sm:$0xff] }
 0x4c0   :  { %6375 = vmatprep.subr.bf16.mxu1 %v9659_v12  ;;  %v9705_v12 = vcombine.high %v2879_v36, %v2883_v38  ;;  %v2924_v27 = vld [vmem:[%s15253_s5 + $0x578] sm:$0xff]  ;;  %v2931_v36 = vld [vmem:[%s15253_s5 + $0x5b0] sm:$0xff] }
 0x4c1   :  { %v2928_v38 = vld [vmem:[%s15253_s5 + $0x598] sm:$0xff] }
 0x4c2   :  { %6212 = vmatpush1.bf16.msra.mxu0 %v9656_v50  ;;  %v2888_v50 = vld [vmem:[%s15253_s5 + $0x458] sm:$0xff] }
 0x4c3   :  { %6376 = vmatpush1.bf16.msra.mxu1 %v9658_v51  ;;  %6213 = vmatprep.subr.bf16.mxu0 %v9665_v35  ;;  %v2892_v51 = vld [vmem:[%s15253_s5 + $0x478] sm:$0xff]  ;;  %v9706_v35 = vcombine.low %v2880_v39, %v2884_v40 }
 0x4c4   :  { %6377 = vmatprep.subr.bf16.mxu1 %v9667_v53  ;;  %v9713_v53 = vcombine.high %v2887_v44, %v2891_v47  ;;  %v9715_v55 = vcombine.high %v2888_v50, %v2892_v51  ;;  %v2932_v39 = vld [vmem:[%s15253_s5 + $0x5b8] sm:$0xff] }
 0x4c6   :  { %6214 = vmatpush1.bf16.msra.mxu0 %v9664_v58  ;;  %v2900_v58 = vld [vmem:[%s15253_s5 + $0x4b8] sm:$0xff] }
 0x4c7   :  { %6378 = vmatpush1.bf16.msra.mxu1 %v9666_v59  ;;  %6215 = vmatprep.subr.bf16.mxu0 %v9673_v61  ;;  %v9712_v59 = vcombine.low %v2887_v44, %v2891_v47  ;;  %v9714_v61 = vcombine.low %v2888_v50, %v2892_v51  ;;  %v9723_v0 = vcombine.high %v2896_v57, %v2900_v58  ;;  %v2939_v44 = vld [vmem:[%s15253_s5 + $0x5f0] sm:$0xff]  ;;  %v2936_v47 = vld [vmem:[%s15253_s5 + $0x5d8] sm:$0xff] }
 0x4c8   :  { %6379 = vmatprep.subr.bf16.mxu1 %v9675_v62  ;;  %v9721_v62 = vcombine.high %v2895_v52, %v2899_v54  ;;  %v9754_v51 = vcombine.low %v2928_v38, %v2932_v39 }
 0x4ca   :  { %6216 = vmatpush1.bf16.msra.mxu0 %v9672_v8  ;;  %v9722_v8 = vcombine.low %v2896_v57, %v2900_v58  ;;  %v2948_v57 = vld [vmem:[%s15253_s5 + $0x638] sm:$0xff] }
 0x4cb   :  { %6380 = vmatpush1.bf16.msra.mxu1 %v9674_v29  ;;  %6217 = vmatprep.subr.bf16.mxu0 %v9681_v10  ;;  %v9729_v29 = vcombine.high %v2903_v2, %v2907_v3  ;;  %v2955_v2 = vld [vmem:[%s15253_s5 + $0x670] sm:$0xff]  ;;  %v2952_v3 = vld [vmem:[%s15253_s5 + $0x658] sm:$0xff] }
 0x4cc   :  { %6381 = vmatprep.subr.bf16.mxu1 %v9683_v11  ;;  %v2911_v11 = vld [vmem:[%s15253_s5 + $0x510] sm:$0xff] }
 0x4cd   :  { %v9736_v37 = vcombine.low %v2911_v11, %v2915_v13 }
 0x4ce   :  { %6218 = vmatpush1.bf16.msra.mxu0 %v9680_v19 }
 0x4cf   :  { %6382 = vmatpush1.bf16.msra.mxu1 %v9682_v20  ;;  %6219 = vmatprep.subr.bf16.mxu0 %v9689_v22  ;;  %v9737_v20 = vcombine.high %v2911_v11, %v2915_v13  ;;  %v9739_v22 = vcombine.high %v2912_v14, %v2916_v16  ;;  %v2963_v11 = vld [vmem:[%s15253_s5 + $0x6b0] sm:$0xff]  ;;  %v2960_v13 = vld [vmem:[%s15253_s5 + $0x698] sm:$0xff] }
 0x4d0   :  { %6383 = vmatprep.subr.bf16.mxu1 %v9691_v23  ;;  %v2919_v23 = vld [vmem:[%s15253_s5 + $0x550] sm:$0xff] }
 0x4d1   :  { %v9744_v40 = vcombine.low %v2919_v23, %v2923_v24 }
 0x4d2   :  { %6220 = vmatpush1.bf16.msra.mxu0 %v9688_v31  ;;  %v9738_v31 = vcombine.low %v2912_v14, %v2916_v16  ;;  %v2964_v14 = vld [vmem:[%s15253_s5 + $0x6b8] sm:$0xff] }
 0x4d3   :  { %6384 = vmatpush1.bf16.msra.mxu1 %v9690_v33  ;;  %6221 = vmatprep.subr.bf16.mxu0 %v9697_v6  ;;  %v9745_v33 = vcombine.high %v2919_v23, %v2923_v24  ;;  %v9747_v6 = vcombine.high %v2920_v60, %v2924_v27  ;;  %v2971_v23 = vld [vmem:[%s15253_s5 + $0x6f0] sm:$0xff]  ;;  %v2968_v24 = vld [vmem:[%s15253_s5 + $0x6d8] sm:$0xff] }
 0x4d4   :  { %6385 = vmatprep.subr.bf16.mxu1 %v9699_v34  ;;  %v2927_v34 = vld [vmem:[%s15253_s5 + $0x590] sm:$0xff] }
 0x4d5   :  { %v9752_v50 = vcombine.low %v2927_v34, %v2931_v36 }
 0x4d6   :  { %6222 = vmatpush1.bf16.msra.mxu0 %v9696_v56  ;;  %v9746_v56 = vcombine.low %v2920_v60, %v2924_v27  ;;  %v2972_v60 = vld [vmem:[%s15253_s5 + $0x6f8] sm:$0xff] }
 0x4d7   :  { %6386 = vmatpush1.bf16.msra.mxu1 %v9698_v42  ;;  %6232 = vmatprep.subr.bf16.mxu0 %v9705_v12  ;;  %v9753_v42 = vcombine.high %v2927_v34, %v2931_v36  ;;  %v9755_v12 = vcombine.high %v2928_v38, %v2932_v39  ;;  %v2979_v34 = vld [vmem:[%s15253_s5 + $0x730] sm:$0xff]  ;;  %v2976_v36 = vld [vmem:[%s15253_s5 + $0x718] sm:$0xff] }
 0x4d8   :  { %6396 = vmatprep.subr.bf16.mxu1 %v9707_v43  ;;  %v2935_v43 = vld [vmem:[%s15253_s5 + $0x5d0] sm:$0xff]  ;;  %v2980_v38 = vld [vmem:[%s15253_s5 + $0x738] sm:$0xff] }
 0x4d9   :  { %6224 = vmatmul.mubr.bf16.vlgmr.msra.gmra.mrb[16].mxu0 %v12732_v63  ;;  %v9760_v58 = vcombine.low %v2935_v43, %v2939_v44 }
 0x4da   :  { %6388 = vmatmul.mubr.bf16.vlgmr.msra.gmra.mrb[24].mxu1 %v12732_v63  ;;  %6233 = vmatpush1.bf16.msra.mxu0 %v9704_v49  ;;  %v2904_v63 = vld [vmem:[%s15253_s5 + $0x4d8] sm:$0xff] }
 0x4db   :  { %6264 = vmatprep.mubr.bf16.mxu0 %v12748_v9  ;;  %6397 = vmatpush1.bf16.msra.mxu1 %v9706_v35  ;;  %v9731_v10 = vcombine.high %v2904_v63, %v2908_v5  ;;  %v9730_v19 = vcombine.low %v2904_v63, %v2908_v5  ;;  %v2940_v49 = vld [vmem:[%s15253_s5 + $0x5f8] sm:$0xff]  ;;  %v9761_v35 = vcombine.high %v2935_v43, %v2939_v44  ;;  %v2987_v43 = vld [vmem:[%s15253_s5 + $0x770] sm:$0xff] }
 0x4dc   :  { %6428 = vmatprep.mubr.bf16.mxu1 %v12748_v9  ;;  %6234 = vmatprep.subr.bf16.mxu0 %v9713_v53  ;;  %v9720_v9 = vcombine.low %v2895_v52, %v2899_v54  ;;  %v9763_v53 = vcombine.high %v2936_v47, %v2940_v49  ;;  %v2943_v52 = vld [vmem:[%s15253_s5 + $0x610] sm:$0xff]  ;;  %v2956_v63 = vld [vmem:[%s15253_s5 + $0x678] sm:$0xff] }
 0x4dd   :  { %6398 = vmatprep.subr.bf16.mxu1 %v9715_v55  ;;  %v2947_v54 = vld [vmem:[%s15253_s5 + $0x630] sm:$0xff]  ;;  %v2944_v55 = vld [vmem:[%s15253_s5 + $0x618] sm:$0xff] }
 0x4de   :  { %6235 = vmatpush1.bf16.msra.mxu0 %v9712_v59  ;;  %v9762_v59 = vcombine.low %v2936_v47, %v2940_v49  ;;  %v9768_v5 = vcombine.low %v2943_v52, %v2947_v54  ;;  %v2984_v44 = vld [vmem:[%s15253_s5 + $0x758] sm:$0xff] }
 0x4df   :  { %6399 = vmatpush1.bf16.msra.mxu1 %v9714_v61  ;;  %6236 = vmatprep.subr.bf16.mxu0 %v9721_v62  ;;  %v9769_v61 = vcombine.high %v2943_v52, %v2947_v54  ;;  %v9771_v62 = vcombine.high %v2944_v55, %v2948_v57  ;;  %v2988_v47 = vld [vmem:[%s15253_s5 + $0x778] sm:$0xff]  ;;  %v2995_v52 = vld [vmem:[%s15253_s5 + $0x7b0] sm:$0xff] }
 0x4e0   :  { %6400 = vmatprep.subr.bf16.mxu1 %v9723_v0  ;;  %v2951_v0 = vld [vmem:[%s15253_s5 + $0x650] sm:$0xff]  ;;  %v2992_v54 = vld [vmem:[%s15253_s5 + $0x798] sm:$0xff] }
 0x4e1   :  { %v9776_v16 = vcombine.low %v2951_v0, %v2955_v2 }
 0x4e2   :  { %6237 = vmatpush1.bf16.msra.mxu0 %v9720_v9  ;;  %v9770_v9 = vcombine.low %v2944_v55, %v2948_v57  ;;  %v2996_v55 = vld [vmem:[%s15253_s5 + $0x7b8] sm:$0xff] }
 0x4e3   :  { %6401 = vmatpush1.bf16.msra.mxu1 %v9722_v8  ;;  %6238 = vmatprep.subr.bf16.mxu0 %v9729_v29  ;;  %v9777_v8 = vcombine.high %v2951_v0, %v2955_v2  ;;  %v9779_v29 = vcombine.high %v2952_v3, %v2956_v63  ;;  %v3003_v0 = vld [vmem:[%s15253_s5 + $0x7f0] sm:$0xff]  ;;  %v3000_v2 = vld [vmem:[%s15253_s5 + $0x7d8] sm:$0xff] }
 0x4e4   :  { %6402 = vmatprep.subr.bf16.mxu1 %v9731_v10  ;;  %v2959_v10 = vld [vmem:[%s15253_s5 + $0x690] sm:$0xff] }
 0x4e5   :  { %v9784_v27 = vcombine.low %v2959_v10, %v2963_v11 }
 0x4e6   :  { %6239 = vmatpush1.bf16.msra.mxu0 %v9728_v41  ;;  %v9778_v41 = vcombine.low %v2952_v3, %v2956_v63  ;;  %v3004_v3 = vld [vmem:[%s15253_s5 + $0x7f8] sm:$0xff] }
 0x4e7   :  { %6403 = vmatpush1.bf16.msra.mxu1 %v9730_v19  ;;  %6240 = vmatprep.subr.bf16.mxu0 %v9737_v20  ;;  %v9785_v19 = vcombine.high %v2959_v10, %v2963_v11  ;;  %v9787_v20 = vcombine.high %v2960_v13, %v2964_v14  ;;  %v3011_v10 = vld [vmem:[%s15253_s5 + $0x830] sm:$0xff]  ;;  %v3008_v11 = vld [vmem:[%s15253_s5 + $0x818] sm:$0xff] }
 0x4e8   :  { %6404 = vmatprep.subr.bf16.mxu1 %v9739_v22  ;;  %v2967_v22 = vld [vmem:[%s15253_s5 + $0x6d0] sm:$0xff] }
 0x4e9   :  { %v9792_v39 = vcombine.low %v2967_v22, %v2971_v23 }
 0x4ea   :  { %6241 = vmatpush1.bf16.msra.mxu0 %v9736_v37  ;;  %v9786_v37 = vcombine.low %v2960_v13, %v2964_v14  ;;  %v3012_v13 = vld [vmem:[%s15253_s5 + $0x838] sm:$0xff] }
 0x4eb   :  { %6405 = vmatpush1.bf16.msra.mxu1 %v9738_v31  ;;  %6242 = vmatprep.subr.bf16.mxu0 %v9745_v33  ;;  %v9793_v31 = vcombine.high %v2967_v22, %v2971_v23  ;;  %v9795_v33 = vcombine.high %v2968_v24, %v2972_v60  ;;  %v3019_v22 = vld [vmem:[%s15253_s5 + $0x870] sm:$0xff] }
 0x4ec   :  { %6406 = vmatprep.subr.bf16.mxu1 %v9747_v6  ;;  %v2975_v6 = vld [vmem:[%s15253_s5 + $0x710] sm:$0xff] }
 0x4ed   :  { %v9800_v49 = vcombine.low %v2975_v6, %v2979_v34 }
 0x4ee   :  { %6243 = vmatpush1.bf16.msra.mxu0 %v9744_v40  ;;  %v9794_v40 = vcombine.low %v2968_v24, %v2972_v60  ;;  %v3016_v24 = vld [vmem:[%s15253_s5 + $0x858] sm:$0xff] }
 0x4ef   :  { %6407 = vmatpush1.bf16.msra.mxu1 %v9746_v56  ;;  %6244 = vmatprep.subr.bf16.mxu0 %v9753_v42  ;;  %v9801_v56 = vcombine.high %v2975_v6, %v2979_v34  ;;  %v9803_v42 = vcombine.high %v2976_v36, %v2980_v38  ;;  %v3020_v60 = vld [vmem:[%s15253_s5 + $0x878] sm:$0xff] }
 0x4f0   :  { %6408 = vmatprep.subr.bf16.mxu1 %v9755_v12  ;;  %v2983_v12 = vld [vmem:[%s15253_s5 + $0x750] sm:$0xff]  ;;  %v9843_v6 = vcombine.high %v3016_v24, %v3020_v60  ;;  %v3024_v34 = vld [vmem:[%s15253_s5 + $0x898] sm:$0xff] }
 0x4f1   :  { %v9808_v57 = vcombine.low %v2983_v12, %v2987_v43 }
 0x4f2   :  { %6245 = vmatpush1.bf16.msra.mxu0 %v9752_v50  ;;  %v9802_v50 = vcombine.low %v2976_v36, %v2980_v38  ;;  %v3028_v36 = vld [vmem:[%s15253_s5 + $0x8b8] sm:$0xff] }
 0x4f3   :  { %6409 = vmatpush1.bf16.msra.mxu1 %v9754_v51  ;;  %6246 = vmatprep.subr.bf16.mxu0 %v9761_v35  ;;  %v9809_v51 = vcombine.high %v2983_v12, %v2987_v43  ;;  %v9811_v35 = vcombine.high %v2984_v44, %v2988_v47  ;;  %v3035_v12 = vld [vmem:[%s15253_s5 + $0x8f0] sm:$0xff]  ;;  %v3036_v43 = vld [vmem:[%s15253_s5 + $0x8f8] sm:$0xff] }
 0x4f4   :  { %6410 = vmatprep.subr.bf16.mxu1 %v9763_v53  ;;  %v2991_v53 = vld [vmem:[%s15253_s5 + $0x790] sm:$0xff] }
 0x4f5   :  { %v9816_v63 = vcombine.low %v2991_v53, %v2995_v52 }
 0x4f6   :  { %6247 = vmatpush1.bf16.msra.mxu0 %v9760_v58  ;;  %v9810_v58 = vcombine.low %v2984_v44, %v2988_v47  ;;  %v9850_v44 = vcombine.low %v3024_v34, %v3028_v36 }
 0x4f7   :  { %6411 = vmatpush1.bf16.msra.mxu1 %v9762_v59  ;;  %6248 = vmatprep.subr.bf16.mxu0 %v9769_v61  ;;  %v9817_v59 = vcombine.high %v2991_v53, %v2995_v52  ;;  %v9819_v61 = vcombine.high %v2992_v54, %v2996_v55  ;;  %v3044_v53 = vld [vmem:[%s15253_s5 + $0x938] sm:$0xff] }
 0x4f8   :  { %6412 = vmatprep.subr.bf16.mxu1 %v9771_v62  ;;  %v2999_v62 = vld [vmem:[%s15253_s5 + $0x7d0] sm:$0xff] }
 0x4f9   :  { %v9824_v14 = vcombine.low %v2999_v62, %v3003_v0 }
 0x4fa   :  { %6249 = vmatpush1.bf16.msra.mxu0 %v9768_v5  ;;  %v9818_v5 = vcombine.low %v2992_v54, %v2996_v55 }
 0x4fb   :  { %6413 = vmatpush1.bf16.msra.mxu1 %v9770_v9  ;;  %6250 = vmatprep.subr.bf16.mxu0 %v9777_v8  ;;  %v9825_v9 = vcombine.high %v2999_v62, %v3003_v0  ;;  %v9827_v8 = vcombine.high %v3000_v2, %v3004_v3  ;;  %v3052_v62 = vld [vmem:[%s15253_s5 + $0x978] sm:$0xff] }
 0x4fc   :  { %6414 = vmatprep.subr.bf16.mxu1 %v9779_v29  ;;  %v3007_v29 = vld [vmem:[%s15253_s5 + $0x810] sm:$0xff] }
 0x4fd   :  { %v9832_v23 = vcombine.low %v3007_v29, %v3011_v10 }
 0x4fe   :  { %6251 = vmatpush1.bf16.msra.mxu0 %v9776_v16  ;;  %v9826_v16 = vcombine.low %v3000_v2, %v3004_v3 }
 0x4ff   :  { %6415 = vmatpush1.bf16.msra.mxu1 %v9778_v41  ;;  %6252 = vmatprep.subr.bf16.mxu0 %v9785_v19  ;;  %v9833_v41 = vcombine.high %v3007_v29, %v3011_v10  ;;  %v9835_v19 = vcombine.high %v3008_v11, %v3012_v13  ;;  %v3060_v29 = vld [vmem:[%s15253_s5 + $0x9b8] sm:$0xff] }
 0x500   :  { %6416 = vmatprep.subr.bf16.mxu1 %v9787_v20  ;;  %v3015_v20 = vld [vmem:[%s15253_s5 + $0x850] sm:$0xff] }
 0x501   :  { %v9840_v38 = vcombine.low %v3015_v20, %v3019_v22 }
 0x502   :  { %6253 = vmatpush1.bf16.msra.mxu0 %v9784_v27  ;;  %v9834_v27 = vcombine.low %v3008_v11, %v3012_v13 }
 0x503   :  { %6417 = vmatpush1.bf16.msra.mxu1 %v9786_v37  ;;  %6254 = vmatprep.subr.bf16.mxu0 %v9793_v31  ;;  %v9841_v37 = vcombine.high %v3015_v20, %v3019_v22  ;;  %v3023_v31 = vld [vmem:[%s15253_s5 + $0x890] sm:$0xff]  ;;  %v3068_v20 = vld [vmem:[%s15253_s5 + $0x9f8] sm:$0xff] }
 0x504   :  { %6418 = vmatprep.subr.bf16.mxu1 %v9795_v33  ;;  %v3027_v33 = vld [vmem:[%s15253_s5 + $0x8b0] sm:$0xff] }
 0x506   :  { %6255 = vmatpush1.bf16.msra.mxu0 %v9792_v39  ;;  %v9842_v39 = vcombine.low %v3016_v24, %v3020_v60 }
 0x507   :  { %6419 = vmatpush1.bf16.msra.mxu1 %v9794_v40  ;;  %6256 = vmatprep.subr.bf16.mxu0 %v9801_v56  ;;  %v9849_v40 = vcombine.high %v3023_v31, %v3027_v33  ;;  %v9851_v56 = vcombine.high %v3024_v34, %v3028_v36 }
 0x508   :  { %6420 = vmatprep.subr.bf16.mxu1 %v9803_v42  ;;  %v3031_v42 = vld [vmem:[%s15253_s5 + $0x8d0] sm:$0xff] }
 0x509   :  { %v9857_v47 = vcombine.high %v3031_v42, %v3035_v12  ;;  %v9856_v52 = vcombine.low %v3031_v42, %v3035_v12  ;;  %v3084_v42 = vld [vmem:[%s15253_s5 + $0xa78] sm:$0xff] }
 0x50a   :  { %6257 = vmatpush1.bf16.msra.mxu0 %v9800_v49 }
 0x50b   :  { %6421 = vmatpush1.bf16.msra.mxu1 %v9802_v50  ;;  %6258 = vmatprep.subr.bf16.mxu0 %v9809_v51  ;;  %v3039_v50 = vld [vmem:[%s15253_s5 + $0x910] sm:$0xff] }
 0x50c   :  { %6422 = vmatprep.subr.bf16.mxu1 %v9811_v35  ;;  %v3043_v51 = vld [vmem:[%s15253_s5 + $0x930] sm:$0xff]  ;;  %v3040_v35 = vld [vmem:[%s15253_s5 + $0x918] sm:$0xff] }
 0x50d   :  { %v9865_v55 = vcombine.high %v3039_v50, %v3043_v51  ;;  %v9864_v0 = vcombine.low %v3039_v50, %v3043_v51  ;;  %v9866_v2 = vcombine.low %v3040_v35, %v3044_v53  ;;  %v3092_v50 = vld [vmem:[%s15253_s5 + $0xab8] sm:$0xff] }
 0x50e   :  { %6259 = vmatpush1.bf16.msra.mxu0 %v9808_v57  ;;  %v9867_v57 = vcombine.high %v3040_v35, %v3044_v53 }
 0x50f   :  { %6423 = vmatpush1.bf16.msra.mxu1 %v9810_v58  ;;  %6260 = vmatprep.subr.bf16.mxu0 %v9817_v59  ;;  %v3047_v58 = vld [vmem:[%s15253_s5 + $0x950] sm:$0xff] }
 0x510   :  { %6424 = vmatprep.subr.bf16.mxu1 %v9819_v61  ;;  %v3051_v59 = vld [vmem:[%s15253_s5 + $0x970] sm:$0xff]  ;;  %v3048_v61 = vld [vmem:[%s15253_s5 + $0x958] sm:$0xff] }
 0x511   :  { %v9873_v3 = vcombine.high %v3047_v58, %v3051_v59  ;;  %v9872_v10 = vcombine.low %v3047_v58, %v3051_v59  ;;  %v9874_v11 = vcombine.low %v3048_v61, %v3052_v62  ;;  %v3100_v58 = vld [vmem:[%s15253_s5 + $0xaf8] sm:$0xff] }
 0x512   :  { %6261 = vmatpush1.bf16.msra.mxu0 %v9816_v63  ;;  %v9875_v63 = vcombine.high %v3048_v61, %v3052_v62 }
 0x513   :  { %6425 = vmatpush1.bf16.msra.mxu1 %v9818_v5  ;;  %6262 = vmatprep.subr.bf16.mxu0 %v9825_v9  ;;  %v3055_v5 = vld [vmem:[%s15253_s5 + $0x990] sm:$0xff] }
 0x514   :  { %6426 = vmatprep.subr.bf16.mxu1 %v9827_v8  ;;  %v3059_v9 = vld [vmem:[%s15253_s5 + $0x9b0] sm:$0xff]  ;;  %v3056_v8 = vld [vmem:[%s15253_s5 + $0x998] sm:$0xff] }
 0x515   :  { %v9881_v13 = vcombine.high %v3055_v5, %v3059_v9  ;;  %v9880_v22 = vcombine.low %v3055_v5, %v3059_v9  ;;  %v3108_v5 = vld [vmem:[%s15253_s5 + $0xb38] sm:$0xff] }
 0x516   :  { %6263 = vmatpush1.bf16.msra.mxu0 %v9824_v14  ;;  %v9883_v14 = vcombine.high %v3056_v8, %v3060_v29 }
 0x517   :  { %6427 = vmatpush1.bf16.msra.mxu1 %v9826_v16  ;;  %6273 = vmatprep.subr.bf16.mxu0 %v9833_v41  ;;  %v3063_v16 = vld [vmem:[%s15253_s5 + $0x9d0] sm:$0xff] }
 0x518   :  { %6437 = vmatprep.subr.bf16.mxu1 %v9835_v19  ;;  %v3067_v41 = vld [vmem:[%s15253_s5 + $0x9f0] sm:$0xff]  ;;  %v3064_v19 = vld [vmem:[%s15253_s5 + $0x9d8] sm:$0xff] }
 0x519   :  { %6265 = vmatmul.mubr.bf16.vlgmr.msra.gmra.mrb[16].mxu0 %v12937_v28  ;;  %v9889_v24 = vcombine.high %v3063_v16, %v3067_v41  ;;  %v9891_v60 = vcombine.high %v3064_v19, %v3068_v20  ;;  %v9890_v34 = vcombine.low %v3064_v19, %v3068_v20 }
 0x51a   :  { %6429 = vmatmul.mubr.bf16.vlgmr.msra.gmra.mrb[24].mxu1 %v12937_v28  ;;  %6274 = vmatpush1.bf16.msra.mxu0 %v9832_v23  ;;  %v3032_v28 = vld [vmem:[%s15253_s5 + $0x8d8] sm:$0xff]  ;;  %v9882_v23 = vcombine.low %v3056_v8, %v3060_v29 }
 0x51b   :  { %6305 = vmatprep.mubr.bf16.mxu0 %v13147_v15  ;;  %6438 = vmatpush1.bf16.msra.mxu1 %v9834_v27  ;;  %v9859_v49 = vcombine.high %v3032_v28, %v3036_v43  ;;  %v9858_v54 = vcombine.low %v3032_v28, %v3036_v43  ;;  %v3071_v27 = vld [vmem:[%s15253_s5 + $0xa10] sm:$0xff] }
 0x51c   :  { %6469 = vmatprep.mubr.bf16.mxu1 %v13147_v15  ;;  %6275 = vmatprep.subr.bf16.mxu0 %v9841_v37  ;;  %v9848_v15 = vcombine.low %v3023_v31, %v3027_v33  ;;  %v3075_v37 = vld [vmem:[%s15253_s5 + $0xa30] sm:$0xff]  ;;  %v3072_v31 = vld [vmem:[%s15253_s5 + $0xa18] sm:$0xff] }
 0x51d   :  { %6439 = vmatprep.subr.bf16.mxu1 %v9843_v6  ;;  %v3076_v33 = vld [vmem:[%s15253_s5 + $0xa38] sm:$0xff]  ;;  %v9888_v6 = vcombine.low %v3063_v16, %v3067_v41  ;;  %v9897_v36 = vcombine.high %v3071_v27, %v3075_v37  ;;  %v9896_v12 = vcombine.low %v3071_v27, %v3075_v37 }
 0x51e   :  { %6276 = vmatpush1.bf16.msra.mxu0 %v9840_v38  ;;  %v9899_v38 = vcombine.high %v3072_v31, %v3076_v33  ;;  %v9898_v28 = vcombine.low %v3072_v31, %v3076_v33  ;;  %v3116_v16 = vld [vmem:[%s15253_s5 + $0xb78] sm:$0xff] }
 0x51f   :  { %6440 = vmatpush1.bf16.msra.mxu1 %v9842_v39  ;;  %6277 = vmatprep.subr.bf16.mxu0 %v9849_v40  ;;  %v3079_v39 = vld [vmem:[%s15253_s5 + $0xa50] sm:$0xff]  ;;  %v3124_v27 = vld [vmem:[%s15253_s5 + $0xbb8] sm:$0xff] }
 0x520   :  { %6441 = vmatprep.subr.bf16.mxu1 %v9851_v56  ;;  %v3083_v40 = vld [vmem:[%s15253_s5 + $0xa70] sm:$0xff]  ;;  %v3080_v56 = vld [vmem:[%s15253_s5 + $0xa58] sm:$0xff] }
 0x521   :  { %v9905_v43 = vcombine.high %v3079_v39, %v3083_v40  ;;  %v9904_v51 = vcombine.low %v3079_v39, %v3083_v40  ;;  %v9906_v35 = vcombine.low %v3080_v56, %v3084_v42  ;;  %v3132_v39 = vld [vmem:[%s15253_s5 + $0xbf8] sm:$0xff] }
 0x522   :  { %6278 = vmatpush1.bf16.msra.mxu0 %v9848_v15  ;;  %v9907_v15 = vcombine.high %v3080_v56, %v3084_v42 }
 0x523   :  { %6442 = vmatpush1.bf16.msra.mxu1 %v9850_v44  ;;  %6279 = vmatprep.subr.bf16.mxu0 %v9857_v47  ;;  %v3087_v44 = vld [vmem:[%s15253_s5 + $0xa90] sm:$0xff] }
 0x524   :  { %6443 = vmatprep.subr.bf16.mxu1 %v9859_v49  ;;  %v3091_v47 = vld [vmem:[%s15253_s5 + $0xab0] sm:$0xff]  ;;  %v3088_v49 = vld [vmem:[%s15253_s5 + $0xa98] sm:$0xff] }
 0x525   :  { %v9913_v53 = vcombine.high %v3087_v44, %v3091_v47  ;;  %v9912_v59 = vcombine.low %v3087_v44, %v3091_v47  ;;  %v9914_v61 = vcombine.low %v3088_v49, %v3092_v50  ;;  %v3140_v44 = vld [vmem:[%s15253_s5 + $0xc38] sm:$0xff] }
 0x526   :  { %6280 = vmatpush1.bf16.msra.mxu0 %v9856_v52  ;;  %v9915_v52 = vcombine.high %v3088_v49, %v3092_v50 }
 0x527   :  { %6444 = vmatpush1.bf16.msra.mxu1 %v9858_v54  ;;  %6281 = vmatprep.subr.bf16.mxu0 %v9865_v55  ;;  %v3095_v54 = vld [vmem:[%s15253_s5 + $0xad0] sm:$0xff] }
 0x528   :  { %6445 = vmatprep.subr.bf16.mxu1 %v9867_v57  ;;  %v3099_v55 = vld [vmem:[%s15253_s5 + $0xaf0] sm:$0xff]  ;;  %v3096_v57 = vld [vmem:[%s15253_s5 + $0xad8] sm:$0xff] }
 0x529   :  { %v9921_v62 = vcombine.high %v3095_v54, %v3099_v55  ;;  %v9920_v9 = vcombine.low %v3095_v54, %v3099_v55  ;;  %v9922_v8 = vcombine.low %v3096_v57, %v3100_v58  ;;  %v3144_v54 = vld [vmem:[%s15253_s5 + $0xc58] sm:$0xff] }
 0x52a   :  { %6282 = vmatpush1.bf16.msra.mxu0 %v9864_v0  ;;  %v9923_v0 = vcombine.high %v3096_v57, %v3100_v58  ;;  %v3148_v55 = vld [vmem:[%s15253_s5 + $0xc78] sm:$0xff] }
 0x52b   :  { %6446 = vmatpush1.bf16.msra.mxu1 %v9866_v2  ;;  %6283 = vmatprep.subr.bf16.mxu0 %v9873_v3  ;;  %v3103_v2 = vld [vmem:[%s15253_s5 + $0xb10] sm:$0xff] }
 0x52c   :  { %6447 = vmatprep.subr.bf16.mxu1 %v9875_v63  ;;  %v3107_v3 = vld [vmem:[%s15253_s5 + $0xb30] sm:$0xff]  ;;  %v3104_v63 = vld [vmem:[%s15253_s5 + $0xb18] sm:$0xff] }
 0x52d   :  { %v9929_v29 = vcombine.high %v3103_v2, %v3107_v3  ;;  %v9928_v41 = vcombine.low %v3103_v2, %v3107_v3  ;;  %v9930_v19 = vcombine.low %v3104_v63, %v3108_v5  ;;  %v3156_v2 = vld [vmem:[%s15253_s5 + $0xcb8] sm:$0xff] }
 0x52e   :  { %6284 = vmatpush1.bf16.msra.mxu0 %v9872_v10  ;;  %v9931_v10 = vcombine.high %v3104_v63, %v3108_v5  ;;  %v9970_v63 = vcombine.low %v3144_v54, %v3148_v55 }
 0x52f   :  { %6448 = vmatpush1.bf16.msra.mxu1 %v9874_v11  ;;  %6285 = vmatprep.subr.bf16.mxu0 %v9881_v13  ;;  %v3111_v11 = vld [vmem:[%s15253_s5 + $0xb50] sm:$0xff] }
 0x530   :  { %6449 = vmatprep.subr.bf16.mxu1 %v9883_v14  ;;  %v3115_v13 = vld [vmem:[%s15253_s5 + $0xb70] sm:$0xff]  ;;  %v3112_v14 = vld [vmem:[%s15253_s5 + $0xb58] sm:$0xff] }
 0x531   :  { %v9937_v20 = vcombine.high %v3111_v11, %v3115_v13  ;;  %v9936_v37 = vcombine.low %v3111_v11, %v3115_v13  ;;  %v9938_v31 = vcombine.low %v3112_v14, %v3116_v16 }
 0x532   :  { %6286 = vmatpush1.bf16.msra.mxu0 %v9880_v22  ;;  %v9939_v22 = vcombine.high %v3112_v14, %v3116_v16  ;;  %v3167_v16 = vld [vmem:[%s15253_s5 + $0xd10] sm:$0xff] }
 0x533   :  { %6450 = vmatpush1.bf16.msra.mxu1 %v9882_v23  ;;  %6287 = vmatprep.subr.bf16.mxu0 %v9889_v24  ;;  %v3119_v23 = vld [vmem:[%s15253_s5 + $0xb90] sm:$0xff] }
 0x534   :  { %6451 = vmatprep.subr.bf16.mxu1 %v9891_v60  ;;  %v3123_v24 = vld [vmem:[%s15253_s5 + $0xbb0] sm:$0xff]  ;;  %v3120_v60 = vld [vmem:[%s15253_s5 + $0xb98] sm:$0xff] }
 0x535   :  { %v9945_v33 = vcombine.high %v3119_v23, %v3123_v24  ;;  %v9944_v40 = vcombine.low %v3119_v23, %v3123_v24  ;;  %v9946_v56 = vcombine.low %v3120_v60, %v3124_v27 }
 0x536   :  { %6288 = vmatpush1.bf16.msra.mxu0 %v9888_v6  ;;  %v9947_v6 = vcombine.high %v3120_v60, %v3124_v27  ;;  %v3175_v27 = vld [vmem:[%s15253_s5 + $0xd50] sm:$0xff] }
 0x537   :  { %6452 = vmatpush1.bf16.msra.mxu1 %v9890_v34  ;;  %6289 = vmatprep.subr.bf16.mxu0 %v9897_v36  ;;  %v3127_v34 = vld [vmem:[%s15253_s5 + $0xbd0] sm:$0xff] }
 0x538   :  { %6453 = vmatprep.subr.bf16.mxu1 %v9899_v38  ;;  %v3131_v36 = vld [vmem:[%s15253_s5 + $0xbf0] sm:$0xff]  ;;  %v3128_v38 = vld [vmem:[%s15253_s5 + $0xbd8] sm:$0xff] }
 0x539   :  { %v9953_v42 = vcombine.high %v3127_v34, %v3131_v36  ;;  %v9952_v47 = vcombine.low %v3127_v34, %v3131_v36  ;;  %v9954_v49 = vcombine.low %v3128_v38, %v3132_v39 }
 0x53a   :  { %6290 = vmatpush1.bf16.msra.mxu0 %v9896_v12  ;;  %v9955_v12 = vcombine.high %v3128_v38, %v3132_v39  ;;  %v3183_v39 = vld [vmem:[%s15253_s5 + $0xd90] sm:$0xff] }
 0x53b   :  { %6454 = vmatpush1.bf16.msra.mxu1 %v9898_v28  ;;  %6291 = vmatprep.subr.bf16.mxu0 %v9905_v43  ;;  %v3135_v28 = vld [vmem:[%s15253_s5 + $0xc10] sm:$0xff] }
 0x53c   :  { %6455 = vmatprep.subr.bf16.mxu1 %v9907_v15  ;;  %v3139_v43 = vld [vmem:[%s15253_s5 + $0xc30] sm:$0xff]  ;;  %v3136_v15 = vld [vmem:[%s15253_s5 + $0xc18] sm:$0xff] }
 0x53d   :  { %v9961_v50 = vcombine.high %v3135_v28, %v3139_v43  ;;  %v9962_v57 = vcombine.low %v3136_v15, %v3140_v44 }
 0x53e   :  { %6292 = vmatpush1.bf16.msra.mxu0 %v9904_v51  ;;  %v9963_v51 = vcombine.high %v3136_v15, %v3140_v44 }
 0x53f   :  { %6456 = vmatpush1.bf16.msra.mxu1 %v9906_v35  ;;  %6293 = vmatprep.subr.bf16.mxu0 %v9913_v53  ;;  %v3143_v35 = vld [vmem:[%s15253_s5 + $0xc50] sm:$0xff] }
 0x540   :  { %6457 = vmatprep.subr.bf16.mxu1 %v9915_v52  ;;  %v3147_v53 = vld [vmem:[%s15253_s5 + $0xc70] sm:$0xff]  ;;  %v9960_v52 = vcombine.low %v3135_v28, %v3139_v43 }
 0x541   :  { %v9969_v58 = vcombine.high %v3143_v35, %v3147_v53  ;;  %v9968_v3 = vcombine.low %v3143_v35, %v3147_v53  ;;  %v3192_v53 = vld [vmem:[%s15253_s5 + $0xdd8] sm:$0xff] }
 0x542   :  { %6294 = vmatpush1.bf16.msra.mxu0 %v9912_v59  ;;  %v3151_v59 = vld [vmem:[%s15253_s5 + $0xc90] sm:$0xff] }
 0x543   :  { %6458 = vmatpush1.bf16.msra.mxu1 %v9914_v61  ;;  %6295 = vmatprep.subr.bf16.mxu0 %v9921_v62  ;;  %v3155_v61 = vld [vmem:[%s15253_s5 + $0xcb0] sm:$0xff]  ;;  %v9971_v62 = vcombine.high %v3144_v54, %v3148_v55 }
 0x544   :  { %6459 = vmatprep.subr.bf16.mxu1 %v9923_v0  ;;  %v3152_v0 = vld [vmem:[%s15253_s5 + $0xc98] sm:$0xff]  ;;  %v9977_v5 = vcombine.high %v3151_v59, %v3155_v61 }
 0x545   :  { %v9978_v11 = vcombine.low %v3152_v0, %v3156_v2 }
 0x546   :  { %6296 = vmatpush1.bf16.msra.mxu0 %v9920_v9  ;;  %v9979_v9 = vcombine.high %v3152_v0, %v3156_v2  ;;  %v3199_v2 = vld [vmem:[%s15253_s5 + $0xe10] sm:$0xff] }
 0x547   :  { %6460 = vmatpush1.bf16.msra.mxu1 %v9922_v8  ;;  %6297 = vmatprep.subr.bf16.mxu0 %v9929_v29  ;;  %v3159_v8 = vld [vmem:[%s15253_s5 + $0xcd0] sm:$0xff] }
 0x548   :  { %6461 = vmatprep.subr.bf16.mxu1 %v9931_v10  ;;  %v3163_v29 = vld [vmem:[%s15253_s5 + $0xcf0] sm:$0xff]  ;;  %v3164_v10 = vld [vmem:[%s15253_s5 + $0xcf8] sm:$0xff] }
 0x549   :  { %v9985_v13 = vcombine.high %v3159_v8, %v3163_v29 }
 0x54a   :  { %6298 = vmatpush1.bf16.msra.mxu0 %v9928_v41  ;;  %v3171_v41 = vld [vmem:[%s15253_s5 + $0xd30] sm:$0xff] }
 0x54b   :  { %6462 = vmatpush1.bf16.msra.mxu1 %v9930_v19  ;;  %6299 = vmatprep.subr.bf16.mxu0 %v9937_v20  ;;  %v3168_v19 = vld [vmem:[%s15253_s5 + $0xd18] sm:$0xff]  ;;  %v9993_v24 = vcombine.high %v3167_v16, %v3171_v41 }
 0x54c   :  { %6463 = vmatprep.subr.bf16.mxu1 %v9939_v22  ;;  %v3172_v20 = vld [vmem:[%s15253_s5 + $0xd38] sm:$0xff]  ;;  %v9984_v22 = vcombine.low %v3159_v8, %v3163_v29 }
 0x54d   :  { %v9995_v60 = vcombine.high %v3168_v19, %v3172_v20  ;;  %v9994_v34 = vcombine.low %v3168_v19, %v3172_v20  ;;  %v3215_v20 = vld [vmem:[%s15253_s5 + $0xe90] sm:$0xff] }
 0x54e   :  { %6300 = vmatpush1.bf16.msra.mxu0 %v9936_v37  ;;  %v3179_v37 = vld [vmem:[%s15253_s5 + $0xd70] sm:$0xff] }
 0x54f   :  { %6464 = vmatpush1.bf16.msra.mxu1 %v9938_v31  ;;  %6301 = vmatprep.subr.bf16.mxu0 %v9945_v33  ;;  %v3176_v31 = vld [vmem:[%s15253_s5 + $0xd58] sm:$0xff]  ;;  %v10001_v36 = vcombine.high %v3175_v27, %v3179_v37 }
 0x550   :  { %6465 = vmatprep.subr.bf16.mxu1 %v9947_v6  ;;  %v3180_v33 = vld [vmem:[%s15253_s5 + $0xd78] sm:$0xff]  ;;  %v9992_v6 = vcombine.low %v3167_v16, %v3171_v41 }
 0x551   :  { %v10003_v38 = vcombine.high %v3176_v31, %v3180_v33  ;;  %v10002_v28 = vcombine.low %v3176_v31, %v3180_v33  ;;  %v3223_v33 = vld [vmem:[%s15253_s5 + $0xed0] sm:$0xff] }
 0x552   :  { %6302 = vmatpush1.bf16.msra.mxu0 %v9944_v40  ;;  %v3187_v40 = vld [vmem:[%s15253_s5 + $0xdb0] sm:$0xff] }
 0x553   :  { %6466 = vmatpush1.bf16.msra.mxu1 %v9946_v56  ;;  %6303 = vmatprep.subr.bf16.mxu0 %v9953_v42  ;;  %v3184_v56 = vld [vmem:[%s15253_s5 + $0xd98] sm:$0xff]  ;;  %v10009_v43 = vcombine.high %v3183_v39, %v3187_v40 }
 0x554   :  { %6467 = vmatprep.subr.bf16.mxu1 %v9955_v12  ;;  %v3188_v42 = vld [vmem:[%s15253_s5 + $0xdb8] sm:$0xff]  ;;  %v10000_v12 = vcombine.low %v3175_v27, %v3179_v37 }
 0x556   :  { %6304 = vmatpush1.bf16.msra.mxu0 %v9952_v47  ;;  %v10011_v47 = vcombine.high %v3184_v56, %v3188_v42 }
 0x557   :  { %6468 = vmatpush1.bf16.msra.mxu1 %v9954_v49  ;;  %6314 = vmatprep.subr.bf16.mxu0 %v9961_v50  ;;  %v3191_v49 = vld [vmem:[%s15253_s5 + $0xdd0] sm:$0xff] }
 0x558   :  { %6478 = vmatprep.subr.bf16.mxu1 %v9963_v51  ;;  %v3195_v50 = vld [vmem:[%s15253_s5 + $0xdf0] sm:$0xff] }
 0x559   :  { %6306 = vmatmul.mubr.bf16.vlgmr.msra.gmra.mrb[16].mxu0 %v13149_v18 }
 0x55a   :  { %6470 = vmatmul.mubr.bf16.vlgmr.msra.gmra.mrb[24].mxu1 %v13149_v18  ;;  %6315 = vmatpush1.bf16.msra.mxu0 %v9960_v52  ;;  %v3160_v18 = vld [vmem:[%s15253_s5 + $0xcd8] sm:$0xff] }
 0x55b   :  { %6346 = vmatprep.mubr.bf16.mxu0 %v13165_v26  ;;  %6479 = vmatpush1.bf16.msra.mxu1 %v9962_v57  ;;  %v9987_v14 = vcombine.high %v3160_v18, %v3164_v10  ;;  %v9986_v23 = vcombine.low %v3160_v18, %v3164_v10  ;;  %v3196_v52 = vld [vmem:[%s15253_s5 + $0xdf8] sm:$0xff]  ;;  %v10008_v57 = vcombine.low %v3183_v39, %v3187_v40  ;;  %v3207_v10 = vld [vmem:[%s15253_s5 + $0xe50] sm:$0xff] }
 0x55c   :  { %6510 = vmatprep.mubr.bf16.mxu1 %v13165_v26  ;;  %6316 = vmatprep.subr.bf16.mxu0 %v9969_v58  ;;  %v9976_v26 = vcombine.low %v3151_v59, %v3155_v61  ;;  %v10010_v61 = vcombine.low %v3184_v56, %v3188_v42  ;;  %v10019_v0 = vcombine.high %v3192_v53, %v3196_v52  ;;  %v3231_v42 = vld [vmem:[%s15253_s5 + $0xf10] sm:$0xff] }
 0x55d   :  { %6480 = vmatprep.subr.bf16.mxu1 %v9971_v62  ;;  %v10017_v62 = vcombine.high %v3191_v49, %v3195_v50  ;;  %v10018_v8 = vcombine.low %v3192_v53, %v3196_v52  ;;  %v3239_v52 = vld [vmem:[%s15253_s5 + $0xf50] sm:$0xff] }
 0x55e   :  { %6317 = vmatpush1.bf16.msra.mxu0 %v9968_v3  ;;  %v3203_v3 = vld [vmem:[%s15253_s5 + $0xe30] sm:$0xff] }
 0x55f   :  { %6481 = vmatpush1.bf16.msra.mxu1 %v9970_v63  ;;  %6318 = vmatprep.subr.bf16.mxu0 %v9977_v5  ;;  %v3200_v63 = vld [vmem:[%s15253_s5 + $0xe18] sm:$0xff]  ;;  %v10025_v29 = vcombine.high %v3199_v2, %v3203_v3 }
 0x560   :  { %6482 = vmatprep.subr.bf16.mxu1 %v9979_v9  ;;  %v3204_v5 = vld [vmem:[%s15253_s5 + $0xe38] sm:$0xff]  ;;  %v10016_v9 = vcombine.low %v3191_v49, %v3195_v50 }
 0x561   :  { %v10027_v18 = vcombine.high %v3200_v63, %v3204_v5  ;;  %v10026_v16 = vcombine.low %v3200_v63, %v3204_v5  ;;  %v3252_v63 = vld [vmem:[%s15253_s5 + $0xfb8] sm:$0xff]  ;;  %v14119_v5 = vld [vmem:[%s15262_s14] sm:$0xff] }
 0x562   :  { %6319 = vmatpush1.bf16.msra.mxu0 %v9976_v26  ;;  %v3211_v26 = vld [vmem:[%s15253_s5 + $0xe70] sm:$0xff] }
 0x563   :  { %6483 = vmatpush1.bf16.msra.mxu1 %v9978_v11  ;;  %6320 = vmatprep.subr.bf16.mxu0 %v9985_v13  ;;  %v3208_v11 = vld [vmem:[%s15253_s5 + $0xe58] sm:$0xff]  ;;  %v10033_v41 = vcombine.high %v3207_v10, %v3211_v26 }
 0x564   :  { %6484 = vmatprep.subr.bf16.mxu1 %v9987_v14  ;;  %v3212_v13 = vld [vmem:[%s15253_s5 + $0xe78] sm:$0xff]  ;;  %v10024_v14 = vcombine.low %v3199_v2, %v3203_v3  ;;  %v3251_v2 = vld [vmem:[%s15253_s5 + $0xfb0] sm:$0xff] }
 0x565   :  { %v10035_v19 = vcombine.high %v3208_v11, %v3212_v13  ;;  %v10034_v27 = vcombine.low %v3208_v11, %v3212_v13  ;;  %v3248_v3 = vld [vmem:[%s15253_s5 + $0xf98] sm:$0xff]  ;;  %v3270_v11 = vrot.slane %v14119_v5, %v11695_v48 }
 0x566   :  { %6321 = vmatpush1.bf16.msra.mxu0 %v9984_v22  ;;  %v3219_v22 = vld [vmem:[%s15253_s5 + $0xeb0] sm:$0xff]  ;;  %v3256_v13 = vld [vmem:[%s15253_s5 + $0xfd8] sm:$0xff] }
 0x567   :  { %6485 = vmatpush1.bf16.msra.mxu1 %v9986_v23  ;;  %6322 = vmatprep.subr.bf16.mxu0 %v9993_v24  ;;  %v3216_v23 = vld [vmem:[%s15253_s5 + $0xe98] sm:$0xff]  ;;  %v10041_v37 = vcombine.high %v3215_v20, %v3219_v22 }
 0x568   :  { %6486 = vmatprep.subr.bf16.mxu1 %v9995_v60  ;;  %v3220_v24 = vld [vmem:[%s15253_s5 + $0xeb8] sm:$0xff]  ;;  %v10032_v60 = vcombine.low %v3207_v10, %v3211_v26  ;;  %v3255_v10 = vld [vmem:[%s15253_s5 + $0xfd0] sm:$0xff] }
 0x569   :  { %v10043_v31 = vcombine.high %v3216_v23, %v3220_v24  ;;  %v10042_v39 = vcombine.low %v3216_v23, %v3220_v24  ;;  %v3259_v26 = vld [vmem:[%s15253_s5 + $0xff0] sm:$0xff] }
 0x56a   :  { %6323 = vmatpush1.bf16.msra.mxu0 %v9992_v6  ;;  %v3227_v6 = vld [vmem:[%s15253_s5 + $0xef0] sm:$0xff]  ;;  %v10080_v23 = vcombine.low %v3255_v10, %v3259_v26 }
 0x56b   :  { %6487 = vmatpush1.bf16.msra.mxu1 %v9994_v34  ;;  %6324 = vmatprep.subr.bf16.mxu0 %v10001_v36  ;;  %v3224_v34 = vld [vmem:[%s15253_s5 + $0xed8] sm:$0xff]  ;;  %v10049_v40 = vcombine.high %v3223_v33, %v3227_v6 }
 0x56c   :  { %v14012_v15 = vpop.f32.mrb[12].mxu0  ;;  %v14014_v44 = vpop.f32.mrb[20].mxu1  ;;  %6488 = vmatprep.subr.bf16.mxu1 %v10003_v38  ;;  %v3228_v36 = vld [vmem:[%s15253_s5 + $0xef8] sm:$0xff]  ;;  %v10040_v38 = vcombine.low %v3215_v20, %v3219_v22 }
 0x56d   :  { %v14022_v51 = vpop.f32.mrb[13].mxu0  ;;  %v14024_v35 = vpop.f32.mrb[21].mxu1  ;;  %v10051_v56 = vcombine.high %v3224_v34, %v3228_v36  ;;  %v10050_v49 = vcombine.low %v3224_v34, %v3228_v36  ;;  %v10767_v34 = vld [vmem:[%s15254_s6 + $0x2c] ss:$16 sps:$4 sm:$0xff]   ;;  %v10762_v36 = vld [vmem:[%s15254_s6 + $0x20] ss:$16 sps:$4 sm:$0xff]  }
 0x56e   :  { %v6024_v54 = vpop.f32.mrb[14].mxu0  ;;  %v6188_v55 = vpop.f32.mrb[22].mxu1  ;;  %6325 = vmatpush1.bf16.msra.mxu0 %v10000_v12  ;;  %v3235_v12 = vld [vmem:[%s15253_s5 + $0xf30] sm:$0xff]  ;;  %v10519_v22 = vadd.f32 %v14022_v51, %v3270_v11 }
 0x56f   :  { %6489 = vmatpush1.bf16.msra.mxu1 %v10002_v28  ;;  %v6025_v58 = vpop.f32.mrb[15].mxu0  ;;  %v6189_v59 = vpop.f32.mrb[23].mxu1  ;;  %6326 = vmatprep.subr.bf16.mxu0 %v10009_v43  ;;  %v3232_v28 = vld [vmem:[%s15253_s5 + $0xf18] sm:$0xff]  ;;  %v10057_v50 = vcombine.high %v3231_v42, %v3235_v12  ;;  %v3243_v54 = vld [vmem:[%s15253_s5 + $0xf70] sm:$0xff] }
 0x570   :  { %6490 = vmatprep.subr.bf16.mxu1 %v10011_v47  ;;  %v3236_v43 = vld [vmem:[%s15253_s5 + $0xf38] sm:$0xff]  ;;  %v10048_v47 = vcombine.low %v3223_v33, %v3227_v6  ;;  %v10056_v58 = vcombine.low %v3231_v42, %v3235_v12  ;;  %v10756_v51 = vld [vmem:[%s15254_s6] ss:$16 sps:$4 sm:$0xff]   ;;  %v10764_v33 = vld [vmem:[%s15254_s6 + $0x24] ss:$16 sps:$4 sm:$0xff]  }
 0x571   :  { %v10059_v53 = vcombine.high %v3232_v28, %v3236_v43  ;;  %v3240_v55 = vld [vmem:[%s15253_s5 + $0xf58] sm:$0xff]  ;;  %v10058_v59 = vcombine.low %v3232_v28, %v3236_v43  ;;  %v10776_v42 = vld [vmem:[%s15254_s6 + $0x64] ss:$16 sps:$4 sm:$0xff]   ;;  %v10774_v28 = vld [vmem:[%s15254_s6 + $0x60] ss:$16 sps:$4 sm:$0xff]  }
 0x572   :  { %6327 = vmatpush1.bf16.msra.mxu0 %v10008_v57  ;;  %v3244_v57 = vld [vmem:[%s15253_s5 + $0xf78] sm:$0xff]  ;;  %v10810_v11 = vld [vmem:[%s15254_s6 + $0x120] ss:$16 sps:$4 sm:$0xff]  }
 0x573   :  { %6491 = vmatpush1.bf16.msra.mxu1 %v10010_v61  ;;  %6328 = vmatprep.subr.bf16.mxu0 %v10017_v62  ;;  %v10065_v61 = vcombine.high %v3239_v52, %v3243_v54  ;;  %v10067_v62 = vcombine.high %v3240_v55, %v3244_v57  ;;  %v10779_v12 = vld [vmem:[%s15254_s6 + $0x6c] ss:$16 sps:$4 sm:$0xff]   ;;  %v10777_v43 = vld [vmem:[%s15254_s6 + $0x68] ss:$16 sps:$4 sm:$0xff]  }
 0x574   :  { %6492 = vmatprep.subr.bf16.mxu1 %v10019_v0  ;;  %v3247_v0 = vld [vmem:[%s15253_s5 + $0xf90] sm:$0xff] }
 0x576   :  { %6329 = vmatpush1.bf16.msra.mxu0 %v10016_v9  ;;  %v10064_v9 = vcombine.low %v3239_v52, %v3243_v54  ;;  %v10788_v52 = vld [vmem:[%s15254_s6 + $0xa4] ss:$16 sps:$4 sm:$0xff]   ;;  %v10791_v54 = vld [vmem:[%s15254_s6 + $0xac] ss:$16 sps:$4 sm:$0xff]  }
 0x577   :  { %6493 = vmatpush1.bf16.msra.mxu1 %v10018_v8  ;;  %6330 = vmatprep.subr.bf16.mxu0 %v10025_v29  ;;  %v10066_v8 = vcombine.low %v3240_v55, %v3244_v57  ;;  %v10073_v29 = vcombine.high %v3247_v0, %v3251_v2  ;;  %v10786_v55 = vld [vmem:[%s15254_s6 + $0xa0] ss:$16 sps:$4 sm:$0xff]   ;;  %v10789_v57 = vld [vmem:[%s15254_s6 + $0xa8] ss:$16 sps:$4 sm:$0xff]  }
 0x578   :  { %6494 = vmatprep.subr.bf16.mxu1 %v10027_v18  ;;  %v10075_v18 = vcombine.high %v3248_v3, %v3252_v63 }
 0x57a   :  { %6331 = vmatpush1.bf16.msra.mxu0 %v10024_v14  ;;  %v3260_v14 = vld [vmem:[%s15253_s5 + $0xff8] sm:$0xff] }
 0x57b   :  { %6495 = vmatpush1.bf16.msra.mxu1 %v10026_v16  ;;  %6332 = vmatprep.subr.bf16.mxu0 %v10033_v41  ;;  %v10072_v16 = vcombine.low %v3247_v0, %v3251_v2  ;;  %v10074_v41 = vcombine.low %v3248_v3, %v3252_v63  ;;  %v10083_v20 = vcombine.high %v3256_v13, %v3260_v14  ;;  %v10800_v0 = vld [vmem:[%s15254_s6 + $0xe4] ss:$16 sps:$4 sm:$0xff]   ;;  %v10803_v2 = vld [vmem:[%s15254_s6 + $0xec] ss:$16 sps:$4 sm:$0xff]   ;;  %v10798_v3 = vld [vmem:[%s15254_s6 + $0xe0] ss:$16 sps:$4 sm:$0xff]  }
 0x57c   :  { %6496 = vmatprep.subr.bf16.mxu1 %v10035_v19  ;;  %v10081_v19 = vcombine.high %v3255_v10, %v3259_v26  ;;  %v10082_v24 = vcombine.low %v3256_v13, %v3260_v14  ;;  %v10801_v63 = vld [vmem:[%s15254_s6 + $0xe8] ss:$16 sps:$4 sm:$0xff]   ;;  %v10812_v10 = vld [vmem:[%s15254_s6 + $0x124] ss:$16 sps:$4 sm:$0xff]   ;;  %v10815_v26 = vld [vmem:[%s15254_s6 + $0x12c] ss:$16 sps:$4 sm:$0xff]  }
 0x57d   :  { %v10813_v13 = vld [vmem:[%s15254_s6 + $0x128] ss:$16 sps:$4 sm:$0xff]   ;;  %v10818_v14 = vld [vmem:[%s15254_s6 + $0x144] ss:$16 sps:$4 sm:$0xff]  }
 0x57e   :  { %6333 = vmatpush1.bf16.msra.mxu0 %v10032_v60  ;;  %v10758_v60 = vld [vmem:[%s15254_s6 + $0x4] ss:$16 sps:$4 sm:$0xff]  }
 0x57f   :  { %6497 = vmatpush1.bf16.msra.mxu1 %v10034_v27  ;;  %6334 = vmatprep.subr.bf16.mxu0 %v10041_v37  ;;  %v10761_v27 = vld [vmem:[%s15254_s6 + $0xc] ss:$16 sps:$4 sm:$0xff]   ;;  %v6520_v37 = vmax.f32 %v10519_v22, 0.0 }
 0x580   :  { %6498 = vmatprep.subr.bf16.mxu1 %v10043_v31  ;;  %v10759_v31 = vld [vmem:[%s15254_s6 + $0x8] ss:$16 sps:$4 sm:$0xff]   ;;  %v10827_v22 = vld [vmem:[%s15254_s6 + $0x16c] ss:$16 sps:$4 sm:$0xff]  }
 0x581   :  { %v6528_v6 = vpack.c.bf16 %v6520_v37, %v6520_v37  ;;  %v10828_v37 = vld [vmem:[%s15254_s6 + $0x180] ss:$16 sps:$4 sm:$0xff]  }
 0x582   :  { %6335 = vmatpush1.bf16.msra.mxu0 %v10040_v38  ;;  %v10765_v38 = vld [vmem:[%s15254_s6 + $0x28] ss:$16 sps:$4 sm:$0xff]  }
 0x583   :  { %6499 = vmatpush1.bf16.msra.mxu1 %v10042_v39  ;;  %6336 = vmatprep.subr.bf16.mxu0 %v10049_v40  ;;  %v10770_v39 = vld [vmem:[%s15254_s6 + $0x44] ss:$16 sps:$4 sm:$0xff]   ;;  %v10768_v40 = vld [vmem:[%s15254_s6 + $0x40] ss:$16 sps:$4 sm:$0xff]  }
 0x584   :  { %6500 = vmatprep.subr.bf16.mxu1 %v10051_v56  ;;  %v10771_v56 = vld [vmem:[%s15254_s6 + $0x48] ss:$16 sps:$4 sm:$0xff]  }
 0x586   :  { %6337 = vmatpush1.bf16.msra.mxu0 %v10048_v47  ;;  %v10782_v47 = vld [vmem:[%s15254_s6 + $0x84] ss:$16 sps:$4 sm:$0xff]  }
 0x587   :  { %6501 = vmatpush1.bf16.msra.mxu1 %v10050_v49  ;;  %6338 = vmatprep.subr.bf16.mxu0 %v10057_v50  ;;  %v10785_v49 = vld [vmem:[%s15254_s6 + $0x8c] ss:$16 sps:$4 sm:$0xff]   ;;  %v10780_v50 = vld [vmem:[%s15254_s6 + $0x80] ss:$16 sps:$4 sm:$0xff]  }
 0x588   :  { %6502 = vmatprep.subr.bf16.mxu1 %v10059_v53  ;;  %v10783_v53 = vld [vmem:[%s15254_s6 + $0x88] ss:$16 sps:$4 sm:$0xff]  }
 0x58a   :  { %6339 = vmatpush1.bf16.msra.mxu0 %v10056_v58  ;;  %v10794_v58 = vld [vmem:[%s15254_s6 + $0xc4] ss:$16 sps:$4 sm:$0xff]  }
 0x58b   :  { %6503 = vmatpush1.bf16.msra.mxu1 %v10058_v59  ;;  %6340 = vmatprep.subr.bf16.mxu0 %v10065_v61  ;;  %v10797_v59 = vld [vmem:[%s15254_s6 + $0xcc] ss:$16 sps:$4 sm:$0xff]   ;;  %v10792_v61 = vld [vmem:[%s15254_s6 + $0xc0] ss:$16 sps:$4 sm:$0xff]  }
 0x58c   :  { %6504 = vmatprep.subr.bf16.mxu1 %v10067_v62  ;;  %v10795_v62 = vld [vmem:[%s15254_s6 + $0xc8] ss:$16 sps:$4 sm:$0xff]  }
 0x58e   :  { %6341 = vmatpush1.bf16.msra.mxu0 %v10064_v9  ;;  %v10806_v9 = vld [vmem:[%s15254_s6 + $0x104] ss:$16 sps:$4 sm:$0xff]  }
 0x58f   :  { %6505 = vmatpush1.bf16.msra.mxu1 %v10066_v8  ;;  %6342 = vmatprep.subr.bf16.mxu0 %v10073_v29  ;;  %v10809_v8 = vld [vmem:[%s15254_s6 + $0x10c] ss:$16 sps:$4 sm:$0xff]   ;;  %v10804_v29 = vld [vmem:[%s15254_s6 + $0x100] ss:$16 sps:$4 sm:$0xff]  }
 0x590   :  { %6506 = vmatprep.subr.bf16.mxu1 %v10075_v18  ;;  %v10807_v18 = vld [vmem:[%s15254_s6 + $0x108] ss:$16 sps:$4 sm:$0xff]  }
 0x592   :  { %6343 = vmatpush1.bf16.msra.mxu0 %v10072_v16  ;;  %v10821_v16 = vld [vmem:[%s15254_s6 + $0x14c] ss:$16 sps:$4 sm:$0xff]  }
 0x593   :  { %6507 = vmatpush1.bf16.msra.mxu1 %v10074_v41  ;;  %6344 = vmatprep.subr.bf16.mxu0 %v10081_v19  ;;  %v10816_v41 = vld [vmem:[%s15254_s6 + $0x140] ss:$16 sps:$4 sm:$0xff]   ;;  %v10819_v19 = vld [vmem:[%s15254_s6 + $0x148] ss:$16 sps:$4 sm:$0xff]  }
 0x594   :  { %6508 = vmatprep.subr.bf16.mxu1 %v10083_v20  ;;  %v10824_v20 = vld [vmem:[%s15254_s6 + $0x164] ss:$16 sps:$4 sm:$0xff]  }
 0x596   :  { %6345 = vmatpush1.bf16.msra.mxu0 %v10080_v23  ;;  %v10822_v23 = vld [vmem:[%s15254_s6 + $0x160] ss:$16 sps:$4 sm:$0xff]  }
 0x597   :  { %6509 = vmatpush1.bf16.msra.mxu1 %v10082_v24  ;;  %8093 = vmatprep.subr.bf16.mxu0 %v10758_v60  ;;  %v10825_v24 = vld [vmem:[%s15254_s6 + $0x168] ss:$16 sps:$4 sm:$0xff]   ;;  %v10830_v60 = vld [vmem:[%s15254_s6 + $0x184] ss:$16 sps:$4 sm:$0xff]  }
 0x598   :  { %8257 = vmatprep.subr.bf16.mxu1 %v10761_v27  ;;  %v10833_v27 = vld [vmem:[%s15254_s6 + $0x18c] ss:$16 sps:$4 sm:$0xff]  }
 0x599   :  { %6347 = vmatmul.mubr.bf16.vlgmr.msra.gmra.mrb[16].mxu0 %v13358_v4 }
 0x59a   :  { %6511 = vmatmul.mubr.bf16.vlgmr.msra.gmra.mrb[24].mxu1 %v13358_v4  ;;  %8094 = vmatpush1.bf16.msra.mxu0 %v10756_v51  ;;  %v10773_v4 = vld [vmem:[%s15254_s6 + $0x4c] ss:$16 sps:$4 sm:$0xff]   ;;  %v10831_v51 = vld [vmem:[%s15254_s6 + $0x188] ss:$16 sps:$4 sm:$0xff]  }
 0x59b   :  { %8125 = vmatprep.mubr.bf16.mxu0 %v6528_v6  ;;  %8258 = vmatpush1.bf16.msra.mxu1 %v10759_v31  ;;  %v10836_v31 = vld [vmem:[%s15254_s6 + $0x1a4] ss:$16 sps:$4 sm:$0xff]  }
 0x59c   :  { %8289 = vmatprep.mubr.bf16.mxu1 %v6528_v6  ;;  %8095 = vmatprep.subr.bf16.mxu0 %v10764_v33  ;;  %v10839_v33 = vld [vmem:[%s15254_s6 + $0x1ac] ss:$16 sps:$4 sm:$0xff]   ;;  %v10834_v6 = vld [vmem:[%s15254_s6 + $0x1a0] ss:$16 sps:$4 sm:$0xff]  }
 0x59d   :  { %8259 = vmatprep.subr.bf16.mxu1 %v10767_v34  ;;  %v3266_v34 = vrot.slane %v14119_v5, %v11689_v46 }
 0x59e   :  { %8096 = vmatpush1.bf16.msra.mxu0 %v10762_v36  ;;  %v10837_v36 = vld [vmem:[%s15254_s6 + $0x1a8] ss:$16 sps:$4 sm:$0xff]  }
 0x59f   :  { %8260 = vmatpush1.bf16.msra.mxu1 %v10765_v38  ;;  %8097 = vmatprep.subr.bf16.mxu0 %v10770_v39  ;;  %v10842_v38 = vld [vmem:[%s15254_s6 + $0x1c4] ss:$16 sps:$4 sm:$0xff]   ;;  %v10845_v39 = vld [vmem:[%s15254_s6 + $0x1cc] ss:$16 sps:$4 sm:$0xff]  }
 0x5a0   :  { %8261 = vmatprep.subr.bf16.mxu1 %v10773_v4  ;;  %v3278_v4 = vrot.slane %v14119_v5, %v11897_v7 }
 0x5a2   :  { %8098 = vmatpush1.bf16.msra.mxu0 %v10768_v40  ;;  %v10840_v40 = vld [vmem:[%s15254_s6 + $0x1c0] ss:$16 sps:$4 sm:$0xff]  }
 0x5a3   :  { %8262 = vmatpush1.bf16.msra.mxu1 %v10771_v56  ;;  %8099 = vmatprep.subr.bf16.mxu0 %v10776_v42  ;;  %v10518_v56 = vadd.f32 %v14012_v15, %v3266_v34  ;;  %v10843_v42 = vld [vmem:[%s15254_s6 + $0x1c8] ss:$16 sps:$4 sm:$0xff]   ;;  %v10846_v15 = vld [vmem:[%s15254_s6 + $0x1e0] ss:$16 sps:$4 sm:$0xff]  }
 0x5a4   :  { %8263 = vmatprep.subr.bf16.mxu1 %v10779_v12  ;;  %v10848_v12 = vld [vmem:[%s15254_s6 + $0x1e4] ss:$16 sps:$4 sm:$0xff]   ;;  %v10903_v34 = vld [vmem:[%s15254_s6 + $0x308] ss:$16 sps:$4 sm:$0xff]  }
 0x5a6   :  { %8100 = vmatpush1.bf16.msra.mxu0 %v10774_v28  ;;  %v10851_v28 = vld [vmem:[%s15254_s6 + $0x1ec] ss:$16 sps:$4 sm:$0xff]  }
 0x5a7   :  { %8264 = vmatpush1.bf16.msra.mxu1 %v10777_v43  ;;  %8101 = vmatprep.subr.bf16.mxu0 %v10782_v47  ;;  %v10521_v43 = vadd.f32 %v14024_v35, %v3278_v4  ;;  %v6519_v47 = vmax.f32 %v10518_v56, 0.0  ;;  %v10857_v35 = vld [vmem:[%s15254_s6 + $0x20c] ss:$16 sps:$4 sm:$0xff]   ;;  %v10909_v4 = vld [vmem:[%s15254_s6 + $0x328] ss:$16 sps:$4 sm:$0xff]  }
 0x5a8   :  { %8265 = vmatprep.subr.bf16.mxu1 %v10785_v49  ;;  %v10849_v49 = vld [vmem:[%s15254_s6 + $0x1e8] ss:$16 sps:$4 sm:$0xff]   ;;  %v10917_v56 = vld [vmem:[%s15254_s6 + $0x34c] ss:$16 sps:$4 sm:$0xff]  }
 0x5aa   :  { %8102 = vmatpush1.bf16.msra.mxu0 %v10780_v50  ;;  %v10854_v50 = vld [vmem:[%s15254_s6 + $0x204] ss:$16 sps:$4 sm:$0xff]  }
 0x5ab   :  { %8266 = vmatpush1.bf16.msra.mxu1 %v10783_v53  ;;  %8103 = vmatprep.subr.bf16.mxu0 %v10788_v52  ;;  %v6522_v53 = vmax.f32 %v10521_v43, 0.0  ;;  %v10852_v52 = vld [vmem:[%s15254_s6 + $0x200] ss:$16 sps:$4 sm:$0xff]   ;;  %v10923_v43 = vld [vmem:[%s15254_s6 + $0x36c] ss:$16 sps:$4 sm:$0xff]  }
 0x5ac   :  { %8267 = vmatprep.subr.bf16.mxu1 %v10791_v54  ;;  %v6527_v54 = vpack.c.bf16 %v6519_v47, %v6519_v47  ;;  %v10921_v47 = vld [vmem:[%s15254_s6 + $0x368] ss:$16 sps:$4 sm:$0xff]  }
 0x5ae   :  { %8104 = vmatpush1.bf16.msra.mxu0 %v10786_v55  ;;  %v10855_v55 = vld [vmem:[%s15254_s6 + $0x208] ss:$16 sps:$4 sm:$0xff]  }
 0x5af   :  { %8268 = vmatpush1.bf16.msra.mxu1 %v10789_v57  ;;  %8105 = vmatprep.subr.bf16.mxu0 %v10794_v58  ;;  %v10860_v57 = vld [vmem:[%s15254_s6 + $0x224] ss:$16 sps:$4 sm:$0xff]   ;;  %v6530_v58 = vpack.c.bf16 %v6522_v53, %v6522_v53  ;;  %v10927_v53 = vld [vmem:[%s15254_s6 + $0x388] ss:$16 sps:$4 sm:$0xff]  }
 0x5b0   :  { %8269 = vmatprep.subr.bf16.mxu1 %v10797_v59  ;;  %v10863_v59 = vld [vmem:[%s15254_s6 + $0x22c] ss:$16 sps:$4 sm:$0xff]  }
 0x5b2   :  { %8106 = vmatpush1.bf16.msra.mxu0 %v10792_v61  ;;  %v10858_v61 = vld [vmem:[%s15254_s6 + $0x220] ss:$16 sps:$4 sm:$0xff]  }
 0x5b3   :  { %8270 = vmatpush1.bf16.msra.mxu1 %v10795_v62  ;;  %8107 = vmatprep.subr.bf16.mxu0 %v10800_v0  ;;  %v10861_v62 = vld [vmem:[%s15254_s6 + $0x228] ss:$16 sps:$4 sm:$0xff]   ;;  %v10866_v0 = vld [vmem:[%s15254_s6 + $0x244] ss:$16 sps:$4 sm:$0xff]  }
 0x5b4   :  { %8271 = vmatprep.subr.bf16.mxu1 %v10803_v2  ;;  %v10869_v2 = vld [vmem:[%s15254_s6 + $0x24c] ss:$16 sps:$4 sm:$0xff]  }
 0x5b6   :  { %8108 = vmatpush1.bf16.msra.mxu0 %v10798_v3  ;;  %v10864_v3 = vld [vmem:[%s15254_s6 + $0x240] ss:$16 sps:$4 sm:$0xff]  }
 0x5b7   :  { %8272 = vmatpush1.bf16.msra.mxu1 %v10801_v63  ;;  %8109 = vmatprep.subr.bf16.mxu0 %v10806_v9  ;;  %v10867_v63 = vld [vmem:[%s15254_s6 + $0x248] ss:$16 sps:$4 sm:$0xff]   ;;  %v10872_v9 = vld [vmem:[%s15254_s6 + $0x264] ss:$16 sps:$4 sm:$0xff]  }
 0x5b8   :  { %8273 = vmatprep.subr.bf16.mxu1 %v10809_v8  ;;  %v10875_v8 = vld [vmem:[%s15254_s6 + $0x26c] ss:$16 sps:$4 sm:$0xff]  }
 0x5ba   :  { %8110 = vmatpush1.bf16.msra.mxu0 %v10804_v29  ;;  %v10870_v29 = vld [vmem:[%s15254_s6 + $0x260] ss:$16 sps:$4 sm:$0xff]  }
 0x5bb   :  { %8274 = vmatpush1.bf16.msra.mxu1 %v10807_v18  ;;  %8111 = vmatprep.subr.bf16.mxu0 %v10812_v10  ;;  %v10873_v18 = vld [vmem:[%s15254_s6 + $0x268] ss:$16 sps:$4 sm:$0xff]   ;;  %v10878_v10 = vld [vmem:[%s15254_s6 + $0x284] ss:$16 sps:$4 sm:$0xff]  }
 0x5bc   :  { %8275 = vmatprep.subr.bf16.mxu1 %v10815_v26  ;;  %v10881_v26 = vld [vmem:[%s15254_s6 + $0x28c] ss:$16 sps:$4 sm:$0xff]  }
 0x5be   :  { %8112 = vmatpush1.bf16.msra.mxu0 %v10810_v11  ;;  %v10876_v11 = vld [vmem:[%s15254_s6 + $0x280] ss:$16 sps:$4 sm:$0xff]  }
 0x5bf   :  { %8276 = vmatpush1.bf16.msra.mxu1 %v10813_v13  ;;  %8113 = vmatprep.subr.bf16.mxu0 %v10818_v14  ;;  %v10879_v13 = vld [vmem:[%s15254_s6 + $0x288] ss:$16 sps:$4 sm:$0xff]   ;;  %v10884_v14 = vld [vmem:[%s15254_s6 + $0x2a4] ss:$16 sps:$4 sm:$0xff]  }
 0x5c0   :  { %8277 = vmatprep.subr.bf16.mxu1 %v10821_v16  ;;  %v10887_v16 = vld [vmem:[%s15254_s6 + $0x2ac] ss:$16 sps:$4 sm:$0xff]  }
 0x5c2   :  { %8114 = vmatpush1.bf16.msra.mxu0 %v10816_v41  ;;  %v10882_v41 = vld [vmem:[%s15254_s6 + $0x2a0] ss:$16 sps:$4 sm:$0xff]  }
 0x5c3   :  { %8278 = vmatpush1.bf16.msra.mxu1 %v10819_v19  ;;  %8115 = vmatprep.subr.bf16.mxu0 %v10824_v20  ;;  %v10885_v19 = vld [vmem:[%s15254_s6 + $0x2a8] ss:$16 sps:$4 sm:$0xff]   ;;  %v10890_v20 = vld [vmem:[%s15254_s6 + $0x2c4] ss:$16 sps:$4 sm:$0xff]  }
 0x5c4   :  { %8279 = vmatprep.subr.bf16.mxu1 %v10827_v22  ;;  %v10893_v22 = vld [vmem:[%s15254_s6 + $0x2cc] ss:$16 sps:$4 sm:$0xff]  }
 0x5c6   :  { %8116 = vmatpush1.bf16.msra.mxu0 %v10822_v23  ;;  %v10888_v23 = vld [vmem:[%s15254_s6 + $0x2c0] ss:$16 sps:$4 sm:$0xff]  }
 0x5c7   :  { %8280 = vmatpush1.bf16.msra.mxu1 %v10825_v24  ;;  %8117 = vmatprep.subr.bf16.mxu0 %v10830_v60  ;;  %v10891_v24 = vld [vmem:[%s15254_s6 + $0x2c8] ss:$16 sps:$4 sm:$0xff]   ;;  %v10896_v60 = vld [vmem:[%s15254_s6 + $0x2e4] ss:$16 sps:$4 sm:$0xff]  }
 0x5c8   :  { %8281 = vmatprep.subr.bf16.mxu1 %v10833_v27  ;;  %v10899_v27 = vld [vmem:[%s15254_s6 + $0x2ec] ss:$16 sps:$4 sm:$0xff]  }
 0x5ca   :  { %8118 = vmatpush1.bf16.msra.mxu0 %v10828_v37  ;;  %v10894_v37 = vld [vmem:[%s15254_s6 + $0x2e0] ss:$16 sps:$4 sm:$0xff]  }
 0x5cb   :  { %8282 = vmatpush1.bf16.msra.mxu1 %v10831_v51  ;;  %8119 = vmatprep.subr.bf16.mxu0 %v10836_v31  ;;  %v10897_v51 = vld [vmem:[%s15254_s6 + $0x2e8] ss:$16 sps:$4 sm:$0xff]   ;;  %v10902_v31 = vld [vmem:[%s15254_s6 + $0x304] ss:$16 sps:$4 sm:$0xff]  }
 0x5cc   :  { %8283 = vmatprep.subr.bf16.mxu1 %v10839_v33  ;;  %v10905_v33 = vld [vmem:[%s15254_s6 + $0x30c] ss:$16 sps:$4 sm:$0xff]  }
 0x5ce   :  { %8120 = vmatpush1.bf16.msra.mxu0 %v10834_v6  ;;  %v10900_v6 = vld [vmem:[%s15254_s6 + $0x300] ss:$16 sps:$4 sm:$0xff]  }
 0x5cf   :  { %8284 = vmatpush1.bf16.msra.mxu1 %v10837_v36  ;;  %8121 = vmatprep.subr.bf16.mxu0 %v10842_v38  ;;  %v10908_v36 = vld [vmem:[%s15254_s6 + $0x324] ss:$16 sps:$4 sm:$0xff]   ;;  %v10911_v38 = vld [vmem:[%s15254_s6 + $0x32c] ss:$16 sps:$4 sm:$0xff]  }
 0x5d0   :  { %8285 = vmatprep.subr.bf16.mxu1 %v10845_v39  ;;  %v10906_v39 = vld [vmem:[%s15254_s6 + $0x320] ss:$16 sps:$4 sm:$0xff]  }
 0x5d2   :  { %8122 = vmatpush1.bf16.msra.mxu0 %v10840_v40  ;;  %v10914_v40 = vld [vmem:[%s15254_s6 + $0x344] ss:$16 sps:$4 sm:$0xff]  }
 0x5d3   :  { %8286 = vmatpush1.bf16.msra.mxu1 %v10843_v42  ;;  %8123 = vmatprep.subr.bf16.mxu0 %v10848_v12  ;;  %v10912_v42 = vld [vmem:[%s15254_s6 + $0x340] ss:$16 sps:$4 sm:$0xff]   ;;  %v10915_v12 = vld [vmem:[%s15254_s6 + $0x348] ss:$16 sps:$4 sm:$0xff]  }
 0x5d4   :  { %8287 = vmatprep.subr.bf16.mxu1 %v10851_v28  ;;  %v10920_v28 = vld [vmem:[%s15254_s6 + $0x364] ss:$16 sps:$4 sm:$0xff]  }
 0x5d6   :  { %8124 = vmatpush1.bf16.msra.mxu0 %v10846_v15  ;;  %v10918_v15 = vld [vmem:[%s15254_s6 + $0x360] ss:$16 sps:$4 sm:$0xff]  }
 0x5d7   :  { %8288 = vmatpush1.bf16.msra.mxu1 %v10849_v49  ;;  %8134 = vmatprep.subr.bf16.mxu0 %v10854_v50  ;;  %v10926_v49 = vld [vmem:[%s15254_s6 + $0x384] ss:$16 sps:$4 sm:$0xff]   ;;  %v10929_v50 = vld [vmem:[%s15254_s6 + $0x38c] ss:$16 sps:$4 sm:$0xff]  }
 0x5d8   :  { %8298 = vmatprep.subr.bf16.mxu1 %v10857_v35  ;;  %v10924_v35 = vld [vmem:[%s15254_s6 + $0x380] ss:$16 sps:$4 sm:$0xff]  }
 0x5d9   :  { %8126 = vmatmul.mubr.bf16.vlgmr.msra.gmra.mrb[20].mxu0 %v6527_v54 }
 0x5da   :  { %8290 = vmatmul.mubr.bf16.vlgmr.msra.gmra.mrb[28].mxu1 %v6527_v54  ;;  %8135 = vmatpush1.bf16.msra.mxu0 %v10852_v52  ;;  %v10932_v52 = vld [vmem:[%s15254_s6 + $0x3a4] ss:$16 sps:$4 sm:$0xff]   ;;  %v10935_v54 = vld [vmem:[%s15254_s6 + $0x3ac] ss:$16 sps:$4 sm:$0xff]  }
 0x5db   :  { %8166 = vmatprep.mubr.bf16.mxu0 %v6530_v58  ;;  %8299 = vmatpush1.bf16.msra.mxu1 %v10855_v55  ;;  %v10930_v55 = vld [vmem:[%s15254_s6 + $0x3a0] ss:$16 sps:$4 sm:$0xff]  }
 0x5dc   :  { %8330 = vmatprep.mubr.bf16.mxu1 %v6530_v58  ;;  %8136 = vmatprep.subr.bf16.mxu0 %v10860_v57  ;;  %v3274_v57 = vrot.slane %v14119_v5, %v12076_v17  ;;  %v10933_v58 = vld [vmem:[%s15254_s6 + $0x3a8] ss:$16 sps:$4 sm:$0xff]  }
 0x5dd   :  { %8300 = vmatprep.subr.bf16.mxu1 %v10863_v59  ;;  %v10938_v59 = vld [vmem:[%s15254_s6 + $0x3c4] ss:$16 sps:$4 sm:$0xff]  }
 0x5de   :  { %8137 = vmatpush1.bf16.msra.mxu0 %v10858_v61  ;;  %v10941_v61 = vld [vmem:[%s15254_s6 + $0x3cc] ss:$16 sps:$4 sm:$0xff]  }
 0x5df   :  { %8301 = vmatpush1.bf16.msra.mxu1 %v10861_v62  ;;  %8138 = vmatprep.subr.bf16.mxu0 %v10866_v0  ;;  %v10936_v62 = vld [vmem:[%s15254_s6 + $0x3c0] ss:$16 sps:$4 sm:$0xff]   ;;  %v10520_v0 = vadd.f32 %v14014_v44, %v3274_v57  ;;  %v11010_v57 = vld [vmem:[%s15254_s6 + $0x544] ss:$16 sps:$4 sm:$0xff]  }
 0x5e0   :  { %8302 = vmatprep.subr.bf16.mxu1 %v10869_v2  ;;  %v10939_v2 = vld [vmem:[%s15254_s6 + $0x3c8] ss:$16 sps:$4 sm:$0xff]   ;;  %v10942_v44 = vld [vmem:[%s15254_s6 + $0x3e0] ss:$16 sps:$4 sm:$0xff]  }
 0x5e2   :  { %8139 = vmatpush1.bf16.msra.mxu0 %v10864_v3  ;;  %v10944_v3 = vld [vmem:[%s15254_s6 + $0x3e4] ss:$16 sps:$4 sm:$0xff]  }
 0x5e3   :  { %8303 = vmatpush1.bf16.msra.mxu1 %v10867_v63  ;;  %8140 = vmatprep.subr.bf16.mxu0 %v10872_v9  ;;  %v10947_v63 = vld [vmem:[%s15254_s6 + $0x3ec] ss:$16 sps:$4 sm:$0xff]   ;;  %v6521_v9 = vmax.f32 %v10520_v0, 0.0 }
 0x5e4   :  { %8304 = vmatprep.subr.bf16.mxu1 %v10875_v8  ;;  %v10945_v8 = vld [vmem:[%s15254_s6 + $0x3e8] ss:$16 sps:$4 sm:$0xff]   ;;  %v11019_v0 = vld [vmem:[%s15254_s6 + $0x56c] ss:$16 sps:$4 sm:$0xff]  }
 0x5e6   :  { %8141 = vmatpush1.bf16.msra.mxu0 %v10870_v29  ;;  %v10950_v29 = vld [vmem:[%s15254_s6 + $0x404] ss:$16 sps:$4 sm:$0xff]  }
 0x5e7   :  { %8305 = vmatpush1.bf16.msra.mxu1 %v10873_v18  ;;  %8142 = vmatprep.subr.bf16.mxu0 %v10878_v10  ;;  %v10953_v18 = vld [vmem:[%s15254_s6 + $0x40c] ss:$16 sps:$4 sm:$0xff]   ;;  %v10948_v10 = vld [vmem:[%s15254_s6 + $0x400] ss:$16 sps:$4 sm:$0xff]  }
 0x5e8   :  { %8306 = vmatprep.subr.bf16.mxu1 %v10881_v26  ;;  %v6529_v26 = vpack.c.bf16 %v6521_v9, %v6521_v9  ;;  %v11020_v9 = vld [vmem:[%s15254_s6 + $0x580] ss:$16 sps:$4 sm:$0xff]  }
 0x5ea   :  { %8143 = vmatpush1.bf16.msra.mxu0 %v10876_v11  ;;  %v10951_v11 = vld [vmem:[%s15254_s6 + $0x408] ss:$16 sps:$4 sm:$0xff]  }
 0x5eb   :  { %8307 = vmatpush1.bf16.msra.mxu1 %v10879_v13  ;;  %8144 = vmatprep.subr.bf16.mxu0 %v10884_v14  ;;  %v10956_v13 = vld [vmem:[%s15254_s6 + $0x424] ss:$16 sps:$4 sm:$0xff]   ;;  %v10959_v14 = vld [vmem:[%s15254_s6 + $0x42c] ss:$16 sps:$4 sm:$0xff]  }
 0x5ec   :  { %8308 = vmatprep.subr.bf16.mxu1 %v10887_v16  ;;  %v10954_v16 = vld [vmem:[%s15254_s6 + $0x420] ss:$16 sps:$4 sm:$0xff]  }
 0x5ee   :  { %8145 = vmatpush1.bf16.msra.mxu0 %v10882_v41  ;;  %v10957_v41 = vld [vmem:[%s15254_s6 + $0x428] ss:$16 sps:$4 sm:$0xff]  }
 0x5ef   :  { %8309 = vmatpush1.bf16.msra.mxu1 %v10885_v19  ;;  %8146 = vmatprep.subr.bf16.mxu0 %v10890_v20  ;;  %v10962_v19 = vld [vmem:[%s15254_s6 + $0x444] ss:$16 sps:$4 sm:$0xff]   ;;  %v10965_v20 = vld [vmem:[%s15254_s6 + $0x44c] ss:$16 sps:$4 sm:$0xff]  }
 0x5f0   :  { %8310 = vmatprep.subr.bf16.mxu1 %v10893_v22  ;;  %v10960_v22 = vld [vmem:[%s15254_s6 + $0x440] ss:$16 sps:$4 sm:$0xff]  }
 0x5f2   :  { %8147 = vmatpush1.bf16.msra.mxu0 %v10888_v23  ;;  %v10963_v23 = vld [vmem:[%s15254_s6 + $0x448] ss:$16 sps:$4 sm:$0xff]  }
 0x5f3   :  { %8311 = vmatpush1.bf16.msra.mxu1 %v10891_v24  ;;  %8148 = vmatprep.subr.bf16.mxu0 %v10896_v60  ;;  %v10968_v24 = vld [vmem:[%s15254_s6 + $0x464] ss:$16 sps:$4 sm:$0xff]   ;;  %v10971_v60 = vld [vmem:[%s15254_s6 + $0x46c] ss:$16 sps:$4 sm:$0xff]  }
 0x5f4   :  { %8312 = vmatprep.subr.bf16.mxu1 %v10899_v27  ;;  %v10966_v27 = vld [vmem:[%s15254_s6 + $0x460] ss:$16 sps:$4 sm:$0xff]  }
 0x5f6   :  { %8149 = vmatpush1.bf16.msra.mxu0 %v10894_v37  ;;  %v10969_v37 = vld [vmem:[%s15254_s6 + $0x468] ss:$16 sps:$4 sm:$0xff]  }
 0x5f7   :  { %8313 = vmatpush1.bf16.msra.mxu1 %v10897_v51  ;;  %8150 = vmatprep.subr.bf16.mxu0 %v10902_v31  ;;  %v10974_v51 = vld [vmem:[%s15254_s6 + $0x484] ss:$16 sps:$4 sm:$0xff]   ;;  %v10977_v31 = vld [vmem:[%s15254_s6 + $0x48c] ss:$16 sps:$4 sm:$0xff]  }
 0x5f8   :  { %8314 = vmatprep.subr.bf16.mxu1 %v10905_v33  ;;  %v10972_v33 = vld [vmem:[%s15254_s6 + $0x480] ss:$16 sps:$4 sm:$0xff]  }
 0x5fa   :  { %8151 = vmatpush1.bf16.msra.mxu0 %v10900_v6  ;;  %v10975_v6 = vld [vmem:[%s15254_s6 + $0x488] ss:$16 sps:$4 sm:$0xff]  }
 0x5fb   :  { %8315 = vmatpush1.bf16.msra.mxu1 %v10903_v34  ;;  %8152 = vmatprep.subr.bf16.mxu0 %v10908_v36  ;;  %v10980_v34 = vld [vmem:[%s15254_s6 + $0x4a4] ss:$16 sps:$4 sm:$0xff]   ;;  %v10983_v36 = vld [vmem:[%s15254_s6 + $0x4ac] ss:$16 sps:$4 sm:$0xff]  }
 0x5fc   :  { %8316 = vmatprep.subr.bf16.mxu1 %v10911_v38  ;;  %v10978_v38 = vld [vmem:[%s15254_s6 + $0x4a0] ss:$16 sps:$4 sm:$0xff]  }
 0x5fe   :  { %8153 = vmatpush1.bf16.msra.mxu0 %v10906_v39  ;;  %v10981_v39 = vld [vmem:[%s15254_s6 + $0x4a8] ss:$16 sps:$4 sm:$0xff]  }
 0x5ff   :  { %8317 = vmatpush1.bf16.msra.mxu1 %v10909_v4  ;;  %8154 = vmatprep.subr.bf16.mxu0 %v10914_v40  ;;  %v10986_v4 = vld [vmem:[%s15254_s6 + $0x4c4] ss:$16 sps:$4 sm:$0xff]   ;;  %v10989_v40 = vld [vmem:[%s15254_s6 + $0x4cc] ss:$16 sps:$4 sm:$0xff]  }
 0x600   :  { %8318 = vmatprep.subr.bf16.mxu1 %v10917_v56  ;;  %v10984_v56 = vld [vmem:[%s15254_s6 + $0x4c0] ss:$16 sps:$4 sm:$0xff]  }
 0x602   :  { %8155 = vmatpush1.bf16.msra.mxu0 %v10912_v42  ;;  %v10987_v42 = vld [vmem:[%s15254_s6 + $0x4c8] ss:$16 sps:$4 sm:$0xff]  }
 0x603   :  { %8319 = vmatpush1.bf16.msra.mxu1 %v10915_v12  ;;  %8156 = vmatprep.subr.bf16.mxu0 %v10920_v28  ;;  %v10992_v12 = vld [vmem:[%s15254_s6 + $0x4e4] ss:$16 sps:$4 sm:$0xff]   ;;  %v10995_v28 = vld [vmem:[%s15254_s6 + $0x4ec] ss:$16 sps:$4 sm:$0xff]  }
 0x604   :  { %8320 = vmatprep.subr.bf16.mxu1 %v10923_v43  ;;  %v10990_v43 = vld [vmem:[%s15254_s6 + $0x4e0] ss:$16 sps:$4 sm:$0xff]  }
 0x606   :  { %8157 = vmatpush1.bf16.msra.mxu0 %v10918_v15  ;;  %v10993_v15 = vld [vmem:[%s15254_s6 + $0x4e8] ss:$16 sps:$4 sm:$0xff]  }
 0x607   :  { %8321 = vmatpush1.bf16.msra.mxu1 %v10921_v47  ;;  %8158 = vmatprep.subr.bf16.mxu0 %v10926_v49  ;;  %v10998_v47 = vld [vmem:[%s15254_s6 + $0x504] ss:$16 sps:$4 sm:$0xff]   ;;  %v11001_v49 = vld [vmem:[%s15254_s6 + $0x50c] ss:$16 sps:$4 sm:$0xff]  }
 0x608   :  { %8322 = vmatprep.subr.bf16.mxu1 %v10929_v50  ;;  %v10996_v50 = vld [vmem:[%s15254_s6 + $0x500] ss:$16 sps:$4 sm:$0xff]  }
 0x60a   :  { %8159 = vmatpush1.bf16.msra.mxu0 %v10924_v35  ;;  %v10999_v35 = vld [vmem:[%s15254_s6 + $0x508] ss:$16 sps:$4 sm:$0xff]  }
 0x60b   :  { %8323 = vmatpush1.bf16.msra.mxu1 %v10927_v53  ;;  %8160 = vmatprep.subr.bf16.mxu0 %v10932_v52  ;;  %v11004_v53 = vld [vmem:[%s15254_s6 + $0x524] ss:$16 sps:$4 sm:$0xff]   ;;  %v11007_v52 = vld [vmem:[%s15254_s6 + $0x52c] ss:$16 sps:$4 sm:$0xff]  }
 0x60c   :  { %8324 = vmatprep.subr.bf16.mxu1 %v10935_v54  ;;  %v11002_v54 = vld [vmem:[%s15254_s6 + $0x520] ss:$16 sps:$4 sm:$0xff]  }
 0x60e   :  { %8161 = vmatpush1.bf16.msra.mxu0 %v10930_v55  ;;  %v11005_v55 = vld [vmem:[%s15254_s6 + $0x528] ss:$16 sps:$4 sm:$0xff]  }
 0x60f   :  { %8325 = vmatpush1.bf16.msra.mxu1 %v10933_v58  ;;  %8162 = vmatprep.subr.bf16.mxu0 %v10938_v59  ;;  %v11013_v58 = vld [vmem:[%s15254_s6 + $0x54c] ss:$16 sps:$4 sm:$0xff]   ;;  %v11008_v59 = vld [vmem:[%s15254_s6 + $0x540] ss:$16 sps:$4 sm:$0xff]  }
 0x610   :  { %8326 = vmatprep.subr.bf16.mxu1 %v10941_v61  ;;  %v11011_v61 = vld [vmem:[%s15254_s6 + $0x548] ss:$16 sps:$4 sm:$0xff]  }
 0x612   :  { %8163 = vmatpush1.bf16.msra.mxu0 %v10936_v62  ;;  %v11016_v62 = vld [vmem:[%s15254_s6 + $0x564] ss:$16 sps:$4 sm:$0xff]  }
 0x613   :  { %8327 = vmatpush1.bf16.msra.mxu1 %v10939_v2  ;;  %8164 = vmatprep.subr.bf16.mxu0 %v10944_v3  ;;  %v11014_v2 = vld [vmem:[%s15254_s6 + $0x560] ss:$16 sps:$4 sm:$0xff]   ;;  %v11017_v3 = vld [vmem:[%s15254_s6 + $0x568] ss:$16 sps:$4 sm:$0xff]  }
 0x614   :  { %8328 = vmatprep.subr.bf16.mxu1 %v10947_v63  ;;  %v11022_v63 = vld [vmem:[%s15254_s6 + $0x584] ss:$16 sps:$4 sm:$0xff]  }
 0x616   :  { %8165 = vmatpush1.bf16.msra.mxu0 %v10942_v44  ;;  %v11025_v44 = vld [vmem:[%s15254_s6 + $0x58c] ss:$16 sps:$4 sm:$0xff]  }
 0x617   :  { %8329 = vmatpush1.bf16.msra.mxu1 %v10945_v8  ;;  %8175 = vmatprep.subr.bf16.mxu0 %v10950_v29  ;;  %v11023_v8 = vld [vmem:[%s15254_s6 + $0x588] ss:$16 sps:$4 sm:$0xff]   ;;  %v11028_v29 = vld [vmem:[%s15254_s6 + $0x5a4] ss:$16 sps:$4 sm:$0xff]  }
 0x618   :  { %8339 = vmatprep.subr.bf16.mxu1 %v10953_v18  ;;  %v11031_v18 = vld [vmem:[%s15254_s6 + $0x5ac] ss:$16 sps:$4 sm:$0xff]  }
 0x619   :  { %8167 = vmatmul.mubr.bf16.vlgmr.msra.gmra.mrb[20].mxu0 %v6529_v26 }
 0x61a   :  { %8331 = vmatmul.mubr.bf16.vlgmr.msra.gmra.mrb[28].mxu1 %v6529_v26  ;;  %8176 = vmatpush1.bf16.msra.mxu0 %v10948_v10  ;;  %v11026_v10 = vld [vmem:[%s15254_s6 + $0x5a0] ss:$16 sps:$4 sm:$0xff]   ;;  %v11029_v26 = vld [vmem:[%s15254_s6 + $0x5a8] ss:$16 sps:$4 sm:$0xff]  }
 0x61b   :  { %8340 = vmatpush1.bf16.msra.mxu1 %v10951_v11  ;;  %8177 = vmatprep.subr.bf16.mxu0 %v10956_v13  ;;  %v11034_v11 = vld [vmem:[%s15254_s6 + $0x5c4] ss:$16 sps:$4 sm:$0xff]   ;;  %v11037_v13 = vld [vmem:[%s15254_s6 + $0x5cc] ss:$16 sps:$4 sm:$0xff]  }
 0x61c   :  { %8341 = vmatprep.subr.bf16.mxu1 %v10959_v14  ;;  %v11032_v14 = vld [vmem:[%s15254_s6 + $0x5c0] ss:$16 sps:$4 sm:$0xff]  }
 0x61e   :  { %8178 = vmatpush1.bf16.msra.mxu0 %v10954_v16  ;;  %v11035_v16 = vld [vmem:[%s15254_s6 + $0x5c8] ss:$16 sps:$4 sm:$0xff]  }
 0x61f   :  { %8342 = vmatpush1.bf16.msra.mxu1 %v10957_v41  ;;  %8179 = vmatprep.subr.bf16.mxu0 %v10962_v19  ;;  %v11040_v41 = vld [vmem:[%s15254_s6 + $0x5e4] ss:$16 sps:$4 sm:$0xff]   ;;  %v11043_v19 = vld [vmem:[%s15254_s6 + $0x5ec] ss:$16 sps:$4 sm:$0xff]  }
 0x620   :  { %8343 = vmatprep.subr.bf16.mxu1 %v10965_v20  ;;  %v11038_v20 = vld [vmem:[%s15254_s6 + $0x5e0] ss:$16 sps:$4 sm:$0xff]  }
 0x622   :  { %8180 = vmatpush1.bf16.msra.mxu0 %v10960_v22  ;;  %v11041_v22 = vld [vmem:[%s15254_s6 + $0x5e8] ss:$16 sps:$4 sm:$0xff]  }
 0x623   :  { %8344 = vmatpush1.bf16.msra.mxu1 %v10963_v23  ;;  %8181 = vmatprep.subr.bf16.mxu0 %v10968_v24  ;;  %v11046_v23 = vld [vmem:[%s15254_s6 + $0x604] ss:$16 sps:$4 sm:$0xff]   ;;  %v11049_v24 = vld [vmem:[%s15254_s6 + $0x60c] ss:$16 sps:$4 sm:$0xff]  }
 0x624   :  { %8345 = vmatprep.subr.bf16.mxu1 %v10971_v60  ;;  %v3282_v60 = vrot.slane %v14119_v5, %v1103_v25 }
 0x626   :  { %8182 = vmatpush1.bf16.msra.mxu0 %v10966_v27  ;;  %v3286_v27 = vrot.slane %v14119_v5, %v1107_v30 }
 0x627   :  { %8346 = vmatpush1.bf16.msra.mxu1 %v10969_v37  ;;  %8183 = vmatprep.subr.bf16.mxu0 %v10974_v51  ;;  %v3294_v37 = vrot.slane %v14119_v5, %v1115_v32  ;;  %v11044_v32 = vld [vmem:[%s15254_s6 + $0x600] ss:$16 sps:$4 sm:$0xff]   ;;  %v11047_v5 = vld [vmem:[%s15254_s6 + $0x608] ss:$16 sps:$4 sm:$0xff]  }
 0x628   :  { %8347 = vmatprep.subr.bf16.mxu1 %v10977_v31 }
 0x62a   :  { %8184 = vmatpush1.bf16.msra.mxu0 %v10972_v33 }
 0x62b   :  { %8348 = vmatpush1.bf16.msra.mxu1 %v10975_v6  ;;  %8185 = vmatprep.subr.bf16.mxu0 %v10980_v34 }
 0x62c   :  { %8349 = vmatprep.subr.bf16.mxu1 %v10983_v36 }
 0x62e   :  { %8186 = vmatpush1.bf16.msra.mxu0 %v10978_v38 }
 0x62f   :  { %8350 = vmatpush1.bf16.msra.mxu1 %v10981_v39  ;;  %8187 = vmatprep.subr.bf16.mxu0 %v10986_v4 }
 0x630   :  { %8351 = vmatprep.subr.bf16.mxu1 %v10989_v40 }
 0x632   :  { %8188 = vmatpush1.bf16.msra.mxu0 %v10984_v56 }
 0x633   :  { %8352 = vmatpush1.bf16.msra.mxu1 %v10987_v42  ;;  %8189 = vmatprep.subr.bf16.mxu0 %v10992_v12 }
 0x634   :  { %8353 = vmatprep.subr.bf16.mxu1 %v10995_v28 }
 0x636   :  { %8190 = vmatpush1.bf16.msra.mxu0 %v10990_v43  ;;  %v11052_v43 = vld [vmem:[%s15254_s6 + $0x624] ss:$16 sps:$4 sm:$0xff]  }
 0x637   :  { %8354 = vmatpush1.bf16.msra.mxu1 %v10993_v15  ;;  %8191 = vmatprep.subr.bf16.mxu0 %v10998_v47  ;;  %v11055_v15 = vld [vmem:[%s15254_s6 + $0x62c] ss:$16 sps:$4 sm:$0xff]  }
 0x638   :  { %8355 = vmatprep.subr.bf16.mxu1 %v11001_v49  ;;  %v11050_v49 = vld [vmem:[%s15254_s6 + $0x620] ss:$16 sps:$4 sm:$0xff]  }
 0x63a   :  { %8192 = vmatpush1.bf16.msra.mxu0 %v10996_v50  ;;  %v11053_v50 = vld [vmem:[%s15254_s6 + $0x628] ss:$16 sps:$4 sm:$0xff]  }
 0x63b   :  { %8356 = vmatpush1.bf16.msra.mxu1 %v10999_v35  ;;  %8193 = vmatprep.subr.bf16.mxu0 %v11004_v53  ;;  %v11058_v35 = vld [vmem:[%s15254_s6 + $0x644] ss:$16 sps:$4 sm:$0xff]   ;;  %v11061_v53 = vld [vmem:[%s15254_s6 + $0x64c] ss:$16 sps:$4 sm:$0xff]  }
 0x63c   :  { %8357 = vmatprep.subr.bf16.mxu1 %v11007_v52  ;;  %v11056_v52 = vld [vmem:[%s15254_s6 + $0x640] ss:$16 sps:$4 sm:$0xff]  }
 0x63e   :  { %8194 = vmatpush1.bf16.msra.mxu0 %v11002_v54  ;;  %v11059_v54 = vld [vmem:[%s15254_s6 + $0x648] ss:$16 sps:$4 sm:$0xff]  }
 0x63f   :  { %8358 = vmatpush1.bf16.msra.mxu1 %v11005_v55  ;;  %8195 = vmatprep.subr.bf16.mxu0 %v11010_v57  ;;  %v11064_v55 = vld [vmem:[%s15254_s6 + $0x664] ss:$16 sps:$4 sm:$0xff]   ;;  %v11067_v57 = vld [vmem:[%s15254_s6 + $0x66c] ss:$16 sps:$4 sm:$0xff]  }
 0x640   :  { %8359 = vmatprep.subr.bf16.mxu1 %v11013_v58  ;;  %v11062_v58 = vld [vmem:[%s15254_s6 + $0x660] ss:$16 sps:$4 sm:$0xff]  }
 0x642   :  { %8196 = vmatpush1.bf16.msra.mxu0 %v11008_v59  ;;  %v11065_v59 = vld [vmem:[%s15254_s6 + $0x668] ss:$16 sps:$4 sm:$0xff]  }
 0x643   :  { %8360 = vmatpush1.bf16.msra.mxu1 %v11011_v61  ;;  %8197 = vmatprep.subr.bf16.mxu0 %v11016_v62  ;;  %v11070_v61 = vld [vmem:[%s15254_s6 + $0x684] ss:$16 sps:$4 sm:$0xff]   ;;  %v11073_v62 = vld [vmem:[%s15254_s6 + $0x68c] ss:$16 sps:$4 sm:$0xff]  }
 0x644   :  { %8361 = vmatprep.subr.bf16.mxu1 %v11019_v0  ;;  %v11068_v0 = vld [vmem:[%s15254_s6 + $0x680] ss:$16 sps:$4 sm:$0xff]  }
 0x646   :  { %8198 = vmatpush1.bf16.msra.mxu0 %v11014_v2  ;;  %v11071_v2 = vld [vmem:[%s15254_s6 + $0x688] ss:$16 sps:$4 sm:$0xff]  }
 0x647   :  { %8362 = vmatpush1.bf16.msra.mxu1 %v11017_v3  ;;  %8199 = vmatprep.subr.bf16.mxu0 %v11022_v63  ;;  %v11076_v3 = vld [vmem:[%s15254_s6 + $0x6a4] ss:$16 sps:$4 sm:$0xff]   ;;  %v11079_v63 = vld [vmem:[%s15254_s6 + $0x6ac] ss:$16 sps:$4 sm:$0xff]  }
 0x648   :  { %8363 = vmatprep.subr.bf16.mxu1 %v11025_v44  ;;  %v11074_v44 = vld [vmem:[%s15254_s6 + $0x6a0] ss:$16 sps:$4 sm:$0xff]  }
 0x64a   :  { %8200 = vmatpush1.bf16.msra.mxu0 %v11020_v9  ;;  %v11077_v9 = vld [vmem:[%s15254_s6 + $0x6a8] ss:$16 sps:$4 sm:$0xff]  }
 0x64b   :  { %8364 = vmatpush1.bf16.msra.mxu1 %v11023_v8  ;;  %8201 = vmatprep.subr.bf16.mxu0 %v11028_v29  ;;  %v11082_v8 = vld [vmem:[%s15254_s6 + $0x6c4] ss:$16 sps:$4 sm:$0xff]   ;;  %v11085_v29 = vld [vmem:[%s15254_s6 + $0x6cc] ss:$16 sps:$4 sm:$0xff]  }
 0x64c   :  { %8365 = vmatprep.subr.bf16.mxu1 %v11031_v18  ;;  %v11080_v18 = vld [vmem:[%s15254_s6 + $0x6c0] ss:$16 sps:$4 sm:$0xff]  }
 0x64e   :  { %8202 = vmatpush1.bf16.msra.mxu0 %v11026_v10  ;;  %v11083_v10 = vld [vmem:[%s15254_s6 + $0x6c8] ss:$16 sps:$4 sm:$0xff]  }
 0x64f   :  { %8366 = vmatpush1.bf16.msra.mxu1 %v11029_v26  ;;  %8203 = vmatprep.subr.bf16.mxu0 %v11034_v11  ;;  %v11088_v26 = vld [vmem:[%s15254_s6 + $0x6e4] ss:$16 sps:$4 sm:$0xff]   ;;  %v11091_v11 = vld [vmem:[%s15254_s6 + $0x6ec] ss:$16 sps:$4 sm:$0xff]  }
 0x650   :  { %8367 = vmatprep.subr.bf16.mxu1 %v11037_v13  ;;  %v11086_v13 = vld [vmem:[%s15254_s6 + $0x6e0] ss:$16 sps:$4 sm:$0xff]  }
 0x652   :  { %8204 = vmatpush1.bf16.msra.mxu0 %v11032_v14  ;;  %v11089_v14 = vld [vmem:[%s15254_s6 + $0x6e8] ss:$16 sps:$4 sm:$0xff]  }
 0x653   :  { %8368 = vmatpush1.bf16.msra.mxu1 %v11035_v16  ;;  %8205 = vmatprep.subr.bf16.mxu0 %v11040_v41  ;;  %v11094_v16 = vld [vmem:[%s15254_s6 + $0x704] ss:$16 sps:$4 sm:$0xff]   ;;  %v11097_v41 = vld [vmem:[%s15254_s6 + $0x70c] ss:$16 sps:$4 sm:$0xff]  }
 0x654   :  { %8369 = vmatprep.subr.bf16.mxu1 %v11043_v19  ;;  %v11092_v19 = vld [vmem:[%s15254_s6 + $0x700] ss:$16 sps:$4 sm:$0xff]  }
 0x656   :  { %8206 = vmatpush1.bf16.msra.mxu0 %v11038_v20  ;;  %v11095_v20 = vld [vmem:[%s15254_s6 + $0x708] ss:$16 sps:$4 sm:$0xff]  }
 0x657   :  { %8370 = vmatpush1.bf16.msra.mxu1 %v11041_v22  ;;  %8216 = vmatprep.subr.bf16.mxu0 %v11046_v23  ;;  %v11100_v22 = vld [vmem:[%s15254_s6 + $0x724] ss:$16 sps:$4 sm:$0xff]   ;;  %v11103_v23 = vld [vmem:[%s15254_s6 + $0x72c] ss:$16 sps:$4 sm:$0xff]  }
 0x658   :  { %8380 = vmatprep.subr.bf16.mxu1 %v11049_v24  ;;  %v11098_v24 = vld [vmem:[%s15254_s6 + $0x720] ss:$16 sps:$4 sm:$0xff]  }
 0x66c   :  { %v6348_v51 = vpop.f32.mrb[16].mxu0 }
 0x66d   :  { %v10522_v31 = vadd.f32 %v6348_v51, %v3282_v60  ;;  %v14738_v33 = vpop.f32.mrb[24].mxu1  ;;  %v6350_v6 = vpop.f32.mrb[17].mxu0  ;;  %v11101_v60 = vld [vmem:[%s15254_s6 + $0x728] ss:$16 sps:$4 sm:$0xff]   ;;  %v11104_v51 = vld [vmem:[%s15254_s6 + $0x740] ss:$16 sps:$4 sm:$0xff]  }
 0x66e   :  { %v10523_v34 = vadd.f32 %v6350_v6, %v3286_v27  ;;  %v6514_v36 = vpop.f32.mrb[25].mxu1  ;;  %v6352_v38 = vpop.f32.mrb[18].mxu0  ;;  %v11106_v27 = vld [vmem:[%s15254_s6 + $0x744] ss:$16 sps:$4 sm:$0xff]  }
 0x66f   :  { %v6523_v39 = vmax.f32 %v10522_v31, 0.0  ;;  %v10525_v4 = vadd.f32 %v6514_v36, %v3294_v37  ;;  %v6516_v40 = vpop.f32.mrb[26].mxu1  ;;  %v6353_v25 = vpop.f32.mrb[19].mxu0  ;;  %v11109_v37 = vld [vmem:[%s15254_s6 + $0x74c] ss:$16 sps:$4 sm:$0xff]  }
 0x670   :  { %v6524_v56 = vmax.f32 %v10523_v34, 0.0  ;;  %v6517_v42 = vpop.f32.mrb[27].mxu1  ;;  %v11107_v31 = vld [vmem:[%s15254_s6 + $0x748] ss:$16 sps:$4 sm:$0xff]   ;;  %v11112_v6 = vld [vmem:[%s15254_s6 + $0x764] ss:$16 sps:$4 sm:$0xff]  }
 0x671   :  { %v6526_v12 = vmax.f32 %v10525_v4, 0.0  ;;  %v6531_v28 = vpack.c.bf16 %v6523_v39, %v6523_v39  ;;  %v11115_v34 = vld [vmem:[%s15254_s6 + $0x76c] ss:$16 sps:$4 sm:$0xff]   ;;  %v11110_v36 = vld [vmem:[%s15254_s6 + $0x760] ss:$16 sps:$4 sm:$0xff]  }
 0x672   :  { %v6532_v30 = vpack.c.bf16 %v6524_v56, %v6524_v56  ;;  %v11113_v38 = vld [vmem:[%s15254_s6 + $0x768] ss:$16 sps:$4 sm:$0xff]   ;;  %v11118_v39 = vld [vmem:[%s15254_s6 + $0x784] ss:$16 sps:$4 sm:$0xff]   ;;  %v11121_v4 = vld [vmem:[%s15254_s6 + $0x78c] ss:$16 sps:$4 sm:$0xff]  }
 0x673   :  { %v6534_v47 = vpack.c.bf16 %v6526_v12, %v6526_v12  ;;  %v11116_v40 = vld [vmem:[%s15254_s6 + $0x780] ss:$16 sps:$4 sm:$0xff]   ;;  %v11119_v25 = vld [vmem:[%s15254_s6 + $0x788] ss:$16 sps:$4 sm:$0xff]   ;;  %v11124_v56 = vld [vmem:[%s15254_s6 + $0x7a4] ss:$16 sps:$4 sm:$0xff]  }
 0x674   :  { %8207 = vmatprep.mubr.bf16.mxu0 %v6532_v30  ;;  %8371 = vmatprep.mubr.bf16.mxu1 %v6532_v30  ;;  %v11127_v42 = vld [vmem:[%s15254_s6 + $0x7ac] ss:$16 sps:$4 sm:$0xff]   ;;  %v11122_v12 = vld [vmem:[%s15254_s6 + $0x7a0] ss:$16 sps:$4 sm:$0xff]   ;;  %v11125_v30 = vld [vmem:[%s15254_s6 + $0x7a8] ss:$16 sps:$4 sm:$0xff]  }
 0x675   :  { %8208 = vmatmul.mubr.bf16.vlgmr.msra.gmra.mrb[20].mxu0 %v6531_v28  ;;  %8372 = vmatmul.mubr.bf16.vlgmr.msra.gmra.mrb[28].mxu1 %v6531_v28  ;;  %v11130_v28 = vld [vmem:[%s15254_s6 + $0x7c4] ss:$16 sps:$4 sm:$0xff]  }
 0x676   :  { %8217 = vmatpush1.bf16.msra.mxu0 %v11044_v32  ;;  %8381 = vmatpush1.bf16.msra.mxu1 %v11047_v5  ;;  %v11265_v32 = vld [vmem:[%s15262_s14] sm:$0xff] }
 0x677   :  { %8248 = vmatprep.mubr.bf16.mxu0 %v6534_v47  ;;  %8412 = vmatprep.mubr.bf16.mxu1 %v6534_v47  ;;  %v3290_v5 = vrot.slane %v11265_v32, %v1111_v21  ;;  %v11136_v47 = vld [vmem:[%s15254_s6 + $0x7e4] ss:$16 sps:$4 sm:$0xff]  }
 0x678   :  { %8218 = vmatprep.subr.bf16.mxu0 %v11052_v43  ;;  %8382 = vmatprep.subr.bf16.mxu1 %v11055_v15  ;;  %v11133_v43 = vld [vmem:[%s15254_s6 + $0x7cc] ss:$16 sps:$4 sm:$0xff]   ;;  %v11128_v15 = vld [vmem:[%s15254_s6 + $0x7c0] ss:$16 sps:$4 sm:$0xff]  }
 0x679   :  { %v10524_v21 = vadd.f32 %v14738_v33, %v3290_v5  ;;  %v11137_v33 = vld [vmem:[%s15254_s6 + $0x7e8] ss:$16 sps:$4 sm:$0xff]  }
 0x67a   :  { %8219 = vmatpush1.bf16.msra.mxu0 %v11050_v49  ;;  %8383 = vmatpush1.bf16.msra.mxu1 %v11053_v50  ;;  %v11139_v49 = vld [vmem:[%s15254_s6 + $0x7ec] ss:$16 sps:$4 sm:$0xff]   ;;  %v11134_v50 = vld [vmem:[%s15254_s6 + $0x7e0] ss:$16 sps:$4 sm:$0xff]  }
 0x67b   :  { %8220 = vmatprep.subr.bf16.mxu0 %v11058_v35  ;;  %8384 = vmatprep.subr.bf16.mxu1 %v11061_v53  ;;  %v6525_v35 = vmax.f32 %v10524_v21, 0.0  ;;  %v11142_v53 = vld [vmem:[%s15255_s7 + $0x4] ss:$8 sps:$4 sm:$0xff]  }
 0x67e   :  { %8221 = vmatpush1.bf16.msra.mxu0 %v11056_v52  ;;  %8385 = vmatpush1.bf16.msra.mxu1 %v11059_v54  ;;  %v11140_v52 = vld [vmem:[%s15255_s7] ss:$8 sps:$4 sm:$0xff]   ;;  %v6533_v54 = vpack.c.bf16 %v6525_v35, %v6525_v35 }
 0x67f   :  { %8222 = vmatprep.subr.bf16.mxu0 %v11064_v55  ;;  %8386 = vmatprep.subr.bf16.mxu1 %v11067_v57  ;;  %v11145_v55 = vld [vmem:[%s15255_s7 + $0x14] ss:$8 sps:$4 sm:$0xff]   ;;  %v11143_v57 = vld [vmem:[%s15255_s7 + $0x10] ss:$8 sps:$4 sm:$0xff]  }
 0x682   :  { %8223 = vmatpush1.bf16.msra.mxu0 %v11062_v58  ;;  %8387 = vmatpush1.bf16.msra.mxu1 %v11065_v59  ;;  %v11148_v58 = vld [vmem:[%s15255_s7 + $0x24] ss:$8 sps:$4 sm:$0xff]   ;;  %v11146_v59 = vld [vmem:[%s15255_s7 + $0x20] ss:$8 sps:$4 sm:$0xff]  }
 0x683   :  { %8224 = vmatprep.subr.bf16.mxu0 %v11070_v61  ;;  %8388 = vmatprep.subr.bf16.mxu1 %v11073_v62  ;;  %v11151_v61 = vld [vmem:[%s15255_s7 + $0x34] ss:$8 sps:$4 sm:$0xff]   ;;  %v11149_v62 = vld [vmem:[%s15255_s7 + $0x30] ss:$8 sps:$4 sm:$0xff]  }
 0x686   :  { %8225 = vmatpush1.bf16.msra.mxu0 %v11068_v0  ;;  %8389 = vmatpush1.bf16.msra.mxu1 %v11071_v2  ;;  %v11154_v0 = vld [vmem:[%s15255_s7 + $0x44] ss:$8 sps:$4 sm:$0xff]   ;;  %v11152_v2 = vld [vmem:[%s15255_s7 + $0x40] ss:$8 sps:$4 sm:$0xff]  }
 0x687   :  { %8226 = vmatprep.subr.bf16.mxu0 %v11076_v3  ;;  %8390 = vmatprep.subr.bf16.mxu1 %v11079_v63  ;;  %v11157_v3 = vld [vmem:[%s15255_s7 + $0x54] ss:$8 sps:$4 sm:$0xff]   ;;  %v11155_v63 = vld [vmem:[%s15255_s7 + $0x50] ss:$8 sps:$4 sm:$0xff]  }
 0x68a   :  { %8227 = vmatpush1.bf16.msra.mxu0 %v11074_v44  ;;  %8391 = vmatpush1.bf16.msra.mxu1 %v11077_v9  ;;  %v11160_v44 = vld [vmem:[%s15255_s7 + $0x64] ss:$8 sps:$4 sm:$0xff]   ;;  %v11158_v9 = vld [vmem:[%s15255_s7 + $0x60] ss:$8 sps:$4 sm:$0xff]  }
 0x68b   :  { %8228 = vmatprep.subr.bf16.mxu0 %v11082_v8  ;;  %8392 = vmatprep.subr.bf16.mxu1 %v11085_v29  ;;  %v11163_v8 = vld [vmem:[%s15255_s7 + $0x74] ss:$8 sps:$4 sm:$0xff]   ;;  %v11161_v29 = vld [vmem:[%s15255_s7 + $0x70] ss:$8 sps:$4 sm:$0xff]  }
 0x68e   :  { %8229 = vmatpush1.bf16.msra.mxu0 %v11080_v18  ;;  %8393 = vmatpush1.bf16.msra.mxu1 %v11083_v10  ;;  %v11166_v18 = vld [vmem:[%s15255_s7 + $0x84] ss:$8 sps:$4 sm:$0xff]   ;;  %v11164_v10 = vld [vmem:[%s15255_s7 + $0x80] ss:$8 sps:$4 sm:$0xff]  }
 0x68f   :  { %8230 = vmatprep.subr.bf16.mxu0 %v11088_v26  ;;  %8394 = vmatprep.subr.bf16.mxu1 %v11091_v11  ;;  %v11169_v26 = vld [vmem:[%s15255_s7 + $0x94] ss:$8 sps:$4 sm:$0xff]   ;;  %v11167_v11 = vld [vmem:[%s15255_s7 + $0x90] ss:$8 sps:$4 sm:$0xff]  }
 0x692   :  { %8231 = vmatpush1.bf16.msra.mxu0 %v11086_v13  ;;  %8395 = vmatpush1.bf16.msra.mxu1 %v11089_v14  ;;  %v11172_v13 = vld [vmem:[%s15255_s7 + $0xa4] ss:$8 sps:$4 sm:$0xff]   ;;  %v11170_v14 = vld [vmem:[%s15255_s7 + $0xa0] ss:$8 sps:$4 sm:$0xff]  }
 0x693   :  { %8232 = vmatprep.subr.bf16.mxu0 %v11094_v16  ;;  %8396 = vmatprep.subr.bf16.mxu1 %v11097_v41  ;;  %v11175_v16 = vld [vmem:[%s15255_s7 + $0xb4] ss:$8 sps:$4 sm:$0xff]   ;;  %v11173_v41 = vld [vmem:[%s15255_s7 + $0xb0] ss:$8 sps:$4 sm:$0xff]  }
 0x696   :  { %8233 = vmatpush1.bf16.msra.mxu0 %v11092_v19  ;;  %8397 = vmatpush1.bf16.msra.mxu1 %v11095_v20  ;;  %v11178_v19 = vld [vmem:[%s15255_s7 + $0xc4] ss:$8 sps:$4 sm:$0xff]   ;;  %v11176_v20 = vld [vmem:[%s15255_s7 + $0xc0] ss:$8 sps:$4 sm:$0xff]  }
 0x697   :  { %8234 = vmatprep.subr.bf16.mxu0 %v11100_v22  ;;  %8398 = vmatprep.subr.bf16.mxu1 %v11103_v23  ;;  %v11181_v22 = vld [vmem:[%s15255_s7 + $0xd4] ss:$8 sps:$4 sm:$0xff]   ;;  %v11179_v23 = vld [vmem:[%s15255_s7 + $0xd0] ss:$8 sps:$4 sm:$0xff]  }
 0x69a   :  { %8235 = vmatpush1.bf16.msra.mxu0 %v11098_v24  ;;  %8399 = vmatpush1.bf16.msra.mxu1 %v11101_v60  ;;  %v11184_v24 = vld [vmem:[%s15255_s7 + $0xe4] ss:$8 sps:$4 sm:$0xff]   ;;  %v11182_v60 = vld [vmem:[%s15255_s7 + $0xe0] ss:$8 sps:$4 sm:$0xff]  }
 0x69b   :  { %8236 = vmatprep.subr.bf16.mxu0 %v11106_v27  ;;  %8400 = vmatprep.subr.bf16.mxu1 %v11109_v37  ;;  %v11187_v27 = vld [vmem:[%s15255_s7 + $0xf4] ss:$8 sps:$4 sm:$0xff]   ;;  %v11185_v37 = vld [vmem:[%s15255_s7 + $0xf0] ss:$8 sps:$4 sm:$0xff]  }
 0x69e   :  { %8237 = vmatpush1.bf16.msra.mxu0 %v11104_v51  ;;  %8401 = vmatpush1.bf16.msra.mxu1 %v11107_v31  ;;  %v11190_v51 = vld [vmem:[%s15255_s7 + $0x104] ss:$8 sps:$4 sm:$0xff]  }
 0x69f   :  { %8238 = vmatprep.subr.bf16.mxu0 %v11112_v6  ;;  %8402 = vmatprep.subr.bf16.mxu1 %v11115_v34  ;;  %v11236_v31 = vld [vmem:[%s15256_s8 + $0x40] sm:$0xff]   ;;  %v11238_v34 = vld [vmem:[%s15256_s8 + $0x48] sm:$0xff]  }
 0x6a0   :  { %v11237_v6 = vld [vmem:[%s15256_s8] sm:$0xff]  }
 0x6a2   :  { %8239 = vmatpush1.bf16.msra.mxu0 %v11110_v36  ;;  %8403 = vmatpush1.bf16.msra.mxu1 %v11113_v38  ;;  %v11239_v36 = vld [vmem:[%s15256_s8 + $0x8] sm:$0xff]   ;;  %v11240_v38 = vld [vmem:[%s15256_s8 + $0x50] sm:$0xff]  }
 0x6a3   :  { %8240 = vmatprep.subr.bf16.mxu0 %v11118_v39  ;;  %8404 = vmatprep.subr.bf16.mxu1 %v11121_v4  ;;  %v11241_v39 = vld [vmem:[%s15256_s8 + $0x10] sm:$0xff]   ;;  %v11242_v4 = vld [vmem:[%s15256_s8 + $0x58] sm:$0xff]  }
 0x6a6   :  { %8241 = vmatpush1.bf16.msra.mxu0 %v11116_v40  ;;  %8405 = vmatpush1.bf16.msra.mxu1 %v11119_v25  ;;  %v11243_v40 = vld [vmem:[%s15256_s8 + $0x18] sm:$0xff]   ;;  %v11244_v25 = vld [vmem:[%s15256_s8 + $0x60] sm:$0xff]  }
 0x6a7   :  { %8242 = vmatprep.subr.bf16.mxu0 %v11124_v56  ;;  %8406 = vmatprep.subr.bf16.mxu1 %v11127_v42  ;;  %v11245_v56 = vld [vmem:[%s15256_s8 + $0x20] sm:$0xff]   ;;  %v11246_v42 = vld [vmem:[%s15256_s8 + $0x68] sm:$0xff]  }
 0x6aa   :  { %8243 = vmatpush1.bf16.msra.mxu0 %v11122_v12  ;;  %8407 = vmatpush1.bf16.msra.mxu1 %v11125_v30  ;;  %v11247_v12 = vld [vmem:[%s15256_s8 + $0x28] sm:$0xff]   ;;  %v15070_v30 = vld [vmem:[%s15263_s15] sm:$0xf] }
 0x6ab   :  { %8244 = vmatprep.subr.bf16.mxu0 %v11130_v28  ;;  %8408 = vmatprep.subr.bf16.mxu1 %v11133_v43  ;;  %v6796_v32 = vrot.slane %v15070_v30, %v11689_v46  ;;  %v6800_v5 = vrot.slane %v15070_v30, %v11695_v48  ;;  %v6808_v28 = vrot.slane %v15070_v30, %v11897_v7  ;;  %v11188_v7 = vld [vmem:[%s15255_s7 + $0x100] ss:$8 sps:$4 sm:$0xff]  }
 0x6ae   :  { %8245 = vmatpush1.bf16.msra.mxu0 %v11128_v15  ;;  %8409 = vmatpush1.bf16.msra.mxu1 %v11131_v45 }
 0x6af   :  { %8246 = vmatprep.subr.bf16.mxu0 %v11136_v47  ;;  %8410 = vmatprep.subr.bf16.mxu1 %v11139_v49 }
 0x6b2   :  { %8247 = vmatpush1.bf16.msra.mxu0 %v11134_v50  ;;  %8411 = vmatpush1.bf16.msra.mxu1 %v11137_v33 }
 0x6b3   :  { %8825 = vmatprep.subr.bf16.mxu0 %v11142_v53  ;;  %10439 = vmatprep.subr.bf16.mxu1 %v11236_v31  ;;  %v6804_v31 = vrot.slane %v15070_v30, %v12076_v17  ;;  %v11233_v17 = vld [vmem:[%s15255_s7 + $0x1f0] ss:$8 sps:$4 sm:$0xff]  }
 0x6b5   :  { %8249 = vmatmul.mubr.bf16.vlgmr.msra.gmra.mrb[20].mxu0 %v6533_v54  ;;  %8413 = vmatmul.mubr.bf16.vlgmr.msra.gmra.mrb[28].mxu1 %v6533_v54 }
 0x6b6   :  { %8826 = vmatpush1.bf16.msra.mxu0 %v11140_v52  ;;  %10440 = vmatpush3.bf16.msra.mxu1 %v11237_v6  ;;  %v11232_v6 = vld [vmem:[%s15255_s7 + $0x1e4] ss:$8 sps:$4 sm:$0xff]  }
 0x6b7   :  { %8827 = vmatprep.subr.bf16.mxu0 %v11145_v55  ;;  %10441 = vmatprep.subr.bf16.mxu1 %v11238_v34  ;;  %v11230_v34 = vld [vmem:[%s15255_s7 + $0x1e0] ss:$8 sps:$4 sm:$0xff]  }
 0x6ba   :  { %8828 = vmatpush1.bf16.msra.mxu0 %v11143_v57  ;;  %10442 = vmatpush3.bf16.msra.mxu1 %v11239_v36 }
 0x6bb   :  { %8829 = vmatprep.subr.bf16.mxu0 %v11148_v58  ;;  %10443 = vmatprep.subr.bf16.mxu1 %v11240_v38  ;;  %v11235_v38 = vld [vmem:[%s15255_s7 + $0x1f4] ss:$8 sps:$4 sm:$0xff]  }
 0x6be   :  { %8830 = vmatpush1.bf16.msra.mxu0 %v11146_v59  ;;  %10444 = vmatpush3.bf16.msra.mxu1 %v11241_v39 }
 0x6bf   :  { %8831 = vmatprep.subr.bf16.mxu0 %v11151_v61  ;;  %10445 = vmatprep.subr.bf16.mxu1 %v11242_v4  ;;  %v11193_v61 = vld [vmem:[%s15255_s7 + $0x114] ss:$8 sps:$4 sm:$0xff]  }
 0x6c2   :  { %8832 = vmatpush1.bf16.msra.mxu0 %v11149_v62  ;;  %10446 = vmatpush3.bf16.msra.mxu1 %v11243_v40  ;;  %v11248_v40 = vld [vmem:[%s15256_s8 + $0x70] sm:$0xff]  }
 0x6c3   :  { %8833 = vmatprep.subr.bf16.mxu0 %v11154_v0  ;;  %10447 = vmatprep.subr.bf16.mxu1 %v11244_v25  ;;  %v11191_v0 = vld [vmem:[%s15255_s7 + $0x110] ss:$8 sps:$4 sm:$0xff]  }
 0x6c4   :  { %v11249_v25 = vld [vmem:[%s15256_s8 + $0x30] sm:$0xff]  }
 0x6c6   :  { %8834 = vmatpush1.bf16.msra.mxu0 %v11152_v2  ;;  %10448 = vmatpush3.bf16.msra.mxu1 %v11245_v56  ;;  %v11196_v2 = vld [vmem:[%s15255_s7 + $0x124] ss:$8 sps:$4 sm:$0xff]   ;;  %v11250_v56 = vld [vmem:[%s15256_s8 + $0x78] sm:$0xff]  }
 0x6c7   :  { %8835 = vmatprep.subr.bf16.mxu0 %v11157_v3  ;;  %10449 = vmatprep.subr.bf16.mxu1 %v11246_v42  ;;  %v11194_v3 = vld [vmem:[%s15255_s7 + $0x120] ss:$8 sps:$4 sm:$0xff]   ;;  %v11251_v42 = vld [vmem:[%s15256_s8 + $0x38] sm:$0xff]  }
 0x6ca   :  { %8836 = vmatpush1.bf16.msra.mxu0 %v11155_v63  ;;  %10450 = vmatpush3.bf16.msra.mxu1 %v11247_v12  ;;  %v11199_v63 = vld [vmem:[%s15255_s7 + $0x134] ss:$8 sps:$4 sm:$0xff]   ;;  %v8493_v12 = vld [vmem:[%s15264_s16] sm:$0x3] }
 0x6cb   :  { %8837 = vmatprep.subr.bf16.mxu0 %v11160_v44  ;;  %v11197_v44 = vld [vmem:[%s15255_s7 + $0x130] ss:$8 sps:$4 sm:$0xff]   ;;  %10451 = vmatprep.subr.bf16.mxu1 %v11248_v40  ;;  %v8498_v30 = vrot.slane %v8493_v12, %v11689_v46  ;;  %v11253_v46 = vld [vmem:[%s15257_s9 + $0x8] sm:$0xff]  }
 0x6ce   :  { %8838 = vmatpush1.bf16.msra.mxu0 %v11158_v9  ;;  %v11202_v9 = vld [vmem:[%s15255_s7 + $0x144] ss:$8 sps:$4 sm:$0xff]   ;;  %10452 = vmatpush3.bf16.msra.mxu1 %v11249_v25 }
 0x6cf   :  { %8839 = vmatprep.subr.bf16.mxu0 %v11163_v8  ;;  %v11200_v8 = vld [vmem:[%s15255_s7 + $0x140] ss:$8 sps:$4 sm:$0xff]   ;;  %10453 = vmatprep.subr.bf16.mxu1 %v11250_v56 }
 0x6d2   :  { %8840 = vmatpush1.bf16.msra.mxu0 %v11161_v29  ;;  %v11205_v29 = vld [vmem:[%s15255_s7 + $0x154] ss:$8 sps:$4 sm:$0xff]   ;;  %10454 = vmatpush3.bf16.msra.mxu1 %v11251_v42 }
 0x6d3   :  { %8841 = vmatprep.subr.bf16.mxu0 %v11166_v18  ;;  %v11203_v18 = vld [vmem:[%s15255_s7 + $0x150] ss:$8 sps:$4 sm:$0xff]   ;;  %10490 = vmatprep.subr.bf16.mxu1 %v11290_v1 }
 0x6d6   :  { %8842 = vmatpush1.bf16.msra.mxu0 %v11164_v10  ;;  %v11208_v10 = vld [vmem:[%s15255_s7 + $0x164] ss:$8 sps:$4 sm:$0xff]  }
 0x6d7   :  { %8843 = vmatprep.subr.bf16.mxu0 %v11169_v26  ;;  %v11206_v26 = vld [vmem:[%s15255_s7 + $0x160] ss:$8 sps:$4 sm:$0xff]  }
 0x6da   :  { %8844 = vmatpush1.bf16.msra.mxu0 %v11167_v11  ;;  %v11211_v11 = vld [vmem:[%s15255_s7 + $0x174] ss:$8 sps:$4 sm:$0xff]  }
 0x6db   :  { %8845 = vmatprep.subr.bf16.mxu0 %v11172_v13  ;;  %v11209_v13 = vld [vmem:[%s15255_s7 + $0x170] ss:$8 sps:$4 sm:$0xff]  }
 0x6de   :  { %8846 = vmatpush1.bf16.msra.mxu0 %v11170_v14  ;;  %v11214_v14 = vld [vmem:[%s15255_s7 + $0x184] ss:$8 sps:$4 sm:$0xff]  }
 0x6df   :  { %8847 = vmatprep.subr.bf16.mxu0 %v11175_v16  ;;  %v11212_v16 = vld [vmem:[%s15255_s7 + $0x180] ss:$8 sps:$4 sm:$0xff]  }
 0x6e2   :  { %8848 = vmatpush1.bf16.msra.mxu0 %v11173_v41  ;;  %v11217_v41 = vld [vmem:[%s15255_s7 + $0x194] ss:$8 sps:$4 sm:$0xff]  }
 0x6e3   :  { %8849 = vmatprep.subr.bf16.mxu0 %v11178_v19  ;;  %v11215_v19 = vld [vmem:[%s15255_s7 + $0x190] ss:$8 sps:$4 sm:$0xff]  }
 0x6e6   :  { %8850 = vmatpush1.bf16.msra.mxu0 %v11176_v20  ;;  %v11220_v20 = vld [vmem:[%s15255_s7 + $0x1a4] ss:$8 sps:$4 sm:$0xff]  }
 0x6e7   :  { %8851 = vmatprep.subr.bf16.mxu0 %v11181_v22  ;;  %v11218_v22 = vld [vmem:[%s15255_s7 + $0x1a0] ss:$8 sps:$4 sm:$0xff]  }
 0x6ea   :  { %8852 = vmatpush1.bf16.msra.mxu0 %v11179_v23  ;;  %v11223_v23 = vld [vmem:[%s15255_s7 + $0x1b4] ss:$8 sps:$4 sm:$0xff]  }
 0x6eb   :  { %8853 = vmatprep.subr.bf16.mxu0 %v11184_v24  ;;  %v11221_v24 = vld [vmem:[%s15255_s7 + $0x1b0] ss:$8 sps:$4 sm:$0xff]  }
 0x6ee   :  { %8854 = vmatpush1.bf16.msra.mxu0 %v11182_v60  ;;  %v11226_v60 = vld [vmem:[%s15255_s7 + $0x1c4] ss:$8 sps:$4 sm:$0xff]  }
 0x6ef   :  { %8855 = vmatprep.subr.bf16.mxu0 %v11187_v27  ;;  %v11224_v27 = vld [vmem:[%s15255_s7 + $0x1c0] ss:$8 sps:$4 sm:$0xff]  }
 0x6f2   :  { %8856 = vmatpush1.bf16.msra.mxu0 %v11185_v37  ;;  %v11229_v37 = vld [vmem:[%s15255_s7 + $0x1d4] ss:$8 sps:$4 sm:$0xff]  }
 0x6f3   :  { %8866 = vmatprep.subr.bf16.mxu0 %v11190_v51  ;;  %v11227_v51 = vld [vmem:[%s15255_s7 + $0x1d0] ss:$8 sps:$4 sm:$0xff]  }
 0x788   :  { %v8250_v43 = vpop.f32.mrb[20].mxu0  ;;  %v15078_v15 = vpop.f32.mrb[28].mxu1 }
 0x789   :  { %v10526_v45 = vadd.f32 %v8250_v43, %v6796_v32  ;;  %v8252_v21 = vpop.f32.mrb[21].mxu0  ;;  %v8416_v47 = vpop.f32.mrb[29].mxu1  ;;  %v10528_v36 = vadd.f32 %v15078_v15, %v6804_v31  ;;  %v8502_v32 = vrot.slane %v8493_v12, %v11695_v48  ;;  %v11254_v48 = vld [vmem:[%s15257_s9 + $0x10] sm:$0xff]  }
 0x78a   :  { %v10527_v49 = vadd.f32 %v8252_v21, %v6800_v5  ;;  %v10529_v50 = vadd.f32 %v8416_v47, %v6808_v28  ;;  %v8254_v33 = vpop.f32.mrb[22].mxu0  ;;  %v8418_v35 = vpop.f32.mrb[30].mxu1 }
 0x78b   :  { %v8421_v53 = vmax.f32 %v10526_v45, 0.0  ;;  %v8255_v52 = vpop.f32.mrb[23].mxu0  ;;  %v8419_v54 = vpop.f32.mrb[31].mxu1  ;;  %v8423_v39 = vmax.f32 %v10528_v36, 0.0  ;;  %v11252_v33 = vld [vmem:[%s15257_s9] sm:$0xff]  }
 0x78c   :  { %v8422_v55 = vmax.f32 %v10527_v49, 0.0  ;;  %v8424_v57 = vmax.f32 %v10529_v50, 0.0  ;;  %v11256_v52 = vld [vmem:[%s15257_s9 + $0x20] sm:$0xff]   ;;  %v11257_v54 = vld [vmem:[%s15257_s9 + $0x28] sm:$0xff]  }
 0x78d   :  { %v8425_v59 = vpack.c.bf16 %v8421_v53, %v8421_v53  ;;  %v8427_v4 = vpack.c.bf16 %v8423_v39, %v8423_v39  ;;  %v11255_v53 = vld [vmem:[%s15257_s9 + $0x18] sm:$0xff]  }
 0x78e   :  { %v8426_v58 = vpack.c.bf16 %v8422_v55, %v8422_v55  ;;  %v8428_v62 = vpack.c.bf16 %v8424_v57, %v8424_v57  ;;  %v11258_v55 = vld [vmem:[%s15257_s9 + $0x30] sm:$0xff]   ;;  %v11259_v57 = vld [vmem:[%s15257_s9 + $0x38] sm:$0xff]   ;;  %s11293_s9 = smov [#allocation2]  }
 0x790   :  { %8857 = vmatprep.mubr.bf16.mxu0 %v8426_v58 }
 0x791   :  { %8858 = vmatmul.mubr.bf16.vlgmr.msra.gmra.mrb[24].mxu0 %v8425_v59 }
 0x792   :  { %8867 = vmatpush1.bf16.msra.mxu0 %v11188_v7  ;;  %8898 = vmatprep.mubr.bf16.mxu0 %v8428_v62  ;;  %v10404_v7 = vld [vmem:[%s15265_s17] ss:$0 sm:$0xff]  ;;  %s9219_s17 = sshll.u32 %s11293_s9, 4  ;;  %s9220_s17 = int_to_ptr.vmem [resolvable:$true] %s9219_s17 }
 0x793   :  { %8868 = vmatprep.subr.bf16.mxu0 %v11193_v61  ;;  %p11271_p1 = scmp.lt.s32.totalorder %s9220_s17, %s9220_s17 }
 0x796   :  { %8869 = vmatpush1.bf16.msra.mxu0 %v11191_v0 }
 0x797   :  { %8870 = vmatprep.subr.bf16.mxu0 %v11196_v2 }
 0x79a   :  { %8871 = vmatpush1.bf16.msra.mxu0 %v11194_v3 }
 0x79b   :  { %8872 = vmatprep.subr.bf16.mxu0 %v11199_v63 }
 0x79e   :  { %8873 = vmatpush1.bf16.msra.mxu0 %v11197_v44 }
 0x79f   :  { %8874 = vmatprep.subr.bf16.mxu0 %v11202_v9 }
 0x7a2   :  { %8875 = vmatpush1.bf16.msra.mxu0 %v11200_v8 }
 0x7a3   :  { %8876 = vmatprep.subr.bf16.mxu0 %v11205_v29 }
 0x7a6   :  { %8877 = vmatpush1.bf16.msra.mxu0 %v11203_v18 }
 0x7a7   :  { %8878 = vmatprep.subr.bf16.mxu0 %v11208_v10 }
 0x7aa   :  { %8879 = vmatpush1.bf16.msra.mxu0 %v11206_v26 }
 0x7ab   :  { %8880 = vmatprep.subr.bf16.mxu0 %v11211_v11 }
 0x7ae   :  { %8881 = vmatpush1.bf16.msra.mxu0 %v11209_v13 }
 0x7af   :  { %8882 = vmatprep.subr.bf16.mxu0 %v11214_v14 }
 0x7b2   :  { %8883 = vmatpush1.bf16.msra.mxu0 %v11212_v16 }
 0x7b3   :  { %8884 = vmatprep.subr.bf16.mxu0 %v11217_v41 }
 0x7b6   :  { %8885 = vmatpush1.bf16.msra.mxu0 %v11215_v19 }
 0x7b7   :  { %8886 = vmatprep.subr.bf16.mxu0 %v11220_v20 }
 0x7ba   :  { %8887 = vmatpush1.bf16.msra.mxu0 %v11218_v22 }
 0x7bb   :  { %8888 = vmatprep.subr.bf16.mxu0 %v11223_v23 }
 0x7be   :  { %8889 = vmatpush1.bf16.msra.mxu0 %v11221_v24 }
 0x7bf   :  { %8890 = vmatprep.subr.bf16.mxu0 %v11226_v60 }
 0x7c2   :  { %8891 = vmatpush1.bf16.msra.mxu0 %v11224_v27 }
 0x7c3   :  { %8892 = vmatprep.subr.bf16.mxu0 %v11229_v37 }
 0x7c6   :  { %8893 = vmatpush1.bf16.msra.mxu0 %v11227_v51 }
 0x7c7   :  { %8894 = vmatprep.subr.bf16.mxu0 %v11232_v6 }
 0x7ca   :  { %8895 = vmatpush1.bf16.msra.mxu0 %v11230_v34 }
 0x7cb   :  { %8896 = vmatprep.subr.bf16.mxu0 %v11235_v38 }
 0x7ce   :  { %8897 = vmatpush1.bf16.msra.mxu0 %v11233_v17 }
 0x7d1   :  { %8899 = vmatmul.mubr.bf16.vlgmr.msra.gmra.mrb[24].mxu0 %v8427_v4 }
 0x8a4   :  { %v8900_v5 = vpop.f32.mrb[24].mxu0 }
 0x8a5   :  { %v10530_v28 = vadd.f32 %v8900_v5, %v8498_v30  ;;  %v8902_v43 = vpop.f32.mrb[25].mxu0 }
 0x8a6   :  { %v10531_v15 = vadd.f32 %v8902_v43, %v8502_v32  ;;  %v8904_v45 = vpop.f32.mrb[26].mxu0 }
 0x8a7   :  { %v8907_v21 = vmax.f32 %v10530_v28, 0.0  ;;  %v8905_v47 = vpop.f32.mrb[27].mxu0 }
 0x8a8   :  { %v8908_v49 = vmax.f32 %v10531_v15, 0.0 }
 0x8a9   :  { %v8909_v35 = vpack.c.bf16 %v8907_v21, %v8907_v21 }
 0x8aa   :  { %v8910_v50 = vpack.c.bf16 %v8908_v49, %v8908_v49 }
 0x8ac   :  { %9078 = vmatprep.mubr.bf16.mxu1 %v8910_v50 }
 0x8ad   :  { %9079 = vmatmul.mubr.bf16.vlgmr.msra.gmra.mrb[32].mxu1 %v8909_v35 }
 0x8ae   :  { %10491 = vmatpush3.bf16.msra.mxu1 %v11252_v33  ;;  %10506 = vmatprep.mubr.msk.bf16.mxu1 %vm11291_vm0, %v11290_v1 }
 0x8af   :  { %10492 = vmatprep.subr.bf16.mxu1 %v11290_v1 }
 0x8b2   :  { %10493 = vmatpush3.bf16.msra.mxu1 %v11253_v46 }
 0x8b3   :  { %10494 = vmatprep.subr.bf16.mxu1 %v11290_v1 }
 0x8b6   :  { %10495 = vmatpush3.bf16.msra.mxu1 %v11254_v48 }
 0x8b7   :  { %10496 = vmatprep.subr.bf16.mxu1 %v11290_v1 }
 0x8ba   :  { %10497 = vmatpush3.bf16.msra.mxu1 %v11255_v53 }
 0x8bb   :  { %10498 = vmatprep.subr.bf16.mxu1 %v11290_v1 }
 0x8be   :  { %10499 = vmatpush3.bf16.msra.mxu1 %v11256_v52 }
 0x8bf   :  { %10500 = vmatprep.subr.bf16.mxu1 %v11290_v1 }
 0x8c2   :  { %10501 = vmatpush3.bf16.msra.mxu1 %v11257_v54 }
 0x8c3   :  { %10502 = vmatprep.subr.bf16.mxu1 %v11290_v1 }
 0x8c6   :  { %10503 = vmatpush3.bf16.msra.mxu1 %v11258_v55 }
 0x8c7   :  { %10504 = vmatprep.subr.bf16.mxu1 %v11290_v1  ;;  %v10421_v1 = vld [vmem:[%s15266_s18] ss:$0 sm:$0xff]  ;;  %s11266_s18 = scalar_lea.vmem %s9220_s17, 128 }
 0x8c8   :  { %p11267_p0 = scmp.ne.s32.totalorder %s9220_s17, %s11266_s18  ;;  %p11272_p2 = scmp.lt.s32.totalorder %s11266_s18, %s11266_s18 }
 0x8ca   :  { %10505 = vmatpush3.bf16.msra.mxu1 %v11259_v57  ;;  %p11273_p3 = por %p11272_p2, %p11271_p1 }
 0x8cc   :  { %p11274_p4 = pnand %p11273_p3, %p11267_p0 }
 0x980   :  { %v10455_v58 = vpop.f32.mrb[32].mxu1 }
 0x981   :  { %v10456_v59 = vpop.f32.mrb[33].mxu1 }
 0x982   :  { %v10457_v61 = vadd.f32 %v10456_v59, %v10455_v58  ;;  %v10458_v62 = vpop.f32.mrb[34].mxu1 }
 0x983   :  { %v10459_v0 = vpop.f32.mrb[35].mxu1 }
 0x984   :  { %v9081_v2 = vadd.f32 %v10457_v61, %v10404_v7 }
 0x986   :  { %v9086_v3 = vmax.f32 %v9081_v2, 0.0 }
 0x988   :  { %v9087_v63 = vpack.c.bf16 %v9086_v3, %v9086_v3 }
 0x98a   :  { %10507 = vmatmul.mubr.bf16.vlgmr.msra.gmra.mrb[36].mxu1 %v9087_v63 }
 0xa5d   :  { %v9193_v44 = vpop.f32.mrb[36].mxu1 }
 0xa5e   :  { %v9194_v9 = vadd.f32 %v10421_v1, %v9193_v44  ;;  %v10508_v8 = vpop.f32.mrb[37].mxu1 }
 0xa5f   :  { %v9196_v29 = vpop.f32.mrb[38].mxu1 }
 0xa60   :  { %v10509_v18 = vpop.f32.mrb[39].mxu1  ;;  %v9200_v10 = vsel %vm9199_vm1, %v9194_v9, -inf }
 0xa61   :  { %9201 = vmax.xlane.f32.xlu0 %v9200_v10 }
 0xaee   :  { %v9202_v26 = vpop.xlane.xlu0 %9201 }
 0xaef   :  { %v9203_v11 = vsub.f32 %v9194_v9, %v9202_v26 }
 0xaf1   :  { %v9204_v13 = vmul.f32 1.442695, %v9203_v11 }
 0xaf3   :  { %11260 = vpow2.f32 %v9204_v13 }
 0xafd   :  { %v11261_v14 = vpop.eup %11260 }
 0xafe   :  { %v9206_v16 = vsel %vm9199_vm1, %v11261_v14, 0.0 }
 0xaff   :  { %9207 = vadd.xlane.f32.xlu0 %v9206_v16 }
 0xb8c   :  { %v9208_v41 = vpop.xlane.xlu0 %9207 }
 0xb8d   :  { %11262 = vlog2.f32 %v9208_v41 }
 0xb97   :  { %v11263_v19 = vpop.eup %11262 }
 0xb98   :  { %v9210_v20 = vmul.f32 0.6931472, %v11263_v19 }
 0xb9a   :  { %v9211_v22 = vsub.f32 %v9203_v11, %v9210_v20 }
 0xb9c   :  { %9212 = vst.msk [vmem:[#allocation2] sm:$0xff] %vm9199_vm1, %v9211_v22 }
 0xb9d   :  { %11277 = shalt.err (!%p11274_p4)
}
 0xb9e   :  { %s11278_s27 = scalar_lea.hbm %s15267_s19, 128 }
 0xb9f   :  { %p11279_p5 = scmp.ne.s32.totalorder %s15267_s19, %s11278_s27  ;;  %p11282_p6 = scmp.lt.u32.totalorder %s11278_s27, %s15267_s19 }
 0xba1   :  { %p11284_p7 = pnand %p11282_p6, %p11279_p5 }
 0xba3   :  { %11287 = shalt.err (!%p11284_p7)
}
 0xba4   :  { %9222 = dma.vmem_to_hbm [thread:$0]  %s9220_s17, 128, %s15267_s19, [#allocation3]  }
 0xba5   :  { %11288 = dma.done.wait [#allocation3], 128  }
 0xba6   :  { %11289 = vsyncadd [#allocation3], 4294967168 }
 0xba7   :  { %9226 = vsyncpa [#allocation3], 1 }

</bundles_post_ra>
